<compile_context>
chip_gen: v7x
topology: tpu7x:2x2x1
jax: 0.10.0
libtpu: 0.0.40
codegen_flags: <defaults>
</compile_context>

<pallas_src>
import jax
import jax.numpy as jnp
import numpy as np
from jax.experimental import pallas as pl
from jax.experimental.pallas import tpu as pltpu


_PARAM_ORDER = (
    "wa1", "wb1", "b1r", "wa2", "wb2", "b2r", "wa3", "wb3", "b3r",
    "w1f", "m1", "r1", "b1l", "e8", "w2a", "b2s",
    "wda1", "wdb1", "bd1r", "wda2", "wdb2", "bd2r", "wda3", "wdb3", "bd3r",
    "w4", "bd4r",
)

_NROW = 14       # valid slab rows per activation (length 1791 -> 14 rows at G=128)
_ROW0 = 8        # scratch row where slab row 0 lives (keeps every store tile-aligned)


# ----------------------------------------------------------------------------
# Fused AE kernel: full encoder + decoder for one batch element.
# ----------------------------------------------------------------------------
def _ae_fused_kernel(
    x_ref,
    wa1_ref, wb1_ref, b1r_ref,
    wa2_ref, wb2_ref, b2r_ref,
    wa3_ref, wb3_ref, b3r_ref,
    w1f_ref, m1_ref, r1_ref, b1l_ref,
    e8_ref, w2a_ref, b2s_ref,
    wda1_ref, wdb1_ref, bd1r_ref,
    wda2_ref, wdb2_ref, bd2r_ref,
    wda3_ref, wdb3_ref, bd3r_ref,
    w4_ref, bd4r_ref,
    out_ref,
    a1_ref, a2_ref, y0_ref, y1_ref, y2_ref,
):
    f32 = jnp.float32
    bf16 = jnp.bfloat16

    def mm(a, b):
        return jnp.dot(a, b, preferred_element_type=f32)

    def store_slab(ref, val):
        # scratch layout: rows [0:8) zero, rows [8:22) data, rows [22:24) zero.
        cols = ref.shape[1]
        z8 = jnp.zeros((8, cols), ref.dtype)
        ref[pl.ds(0, 8), :] = z8
        ref[pl.ds(16, 8), :] = z8
        ref[pl.ds(_ROW0, _NROW), :] = val.astype(ref.dtype)

    def enc_layer(ref, wa_ref, wb_ref, br_ref):
        # strided Conv1d on slab activations: aligned block + block shifted by
        # one slab row, folded into two banded-matrix matmuls.
        xa = ref[pl.ds(_ROW0, _NROW), :].astype(bf16)
        xb = ref[pl.ds(_ROW0 + 1, _NROW), :].astype(bf16)
        acc = mm(xa, wa_ref[...]) + mm(xb, wb_ref[...]) + br_ref[...]
        return jnp.maximum(acc, 0.0)

    def dec_layer(ref, wa_ref, wb_ref, br_ref):
        # ConvTranspose1d (stride 4) on slab activations: aligned block +
        # block shifted one slab row backwards (row 7 of the scratch is zero).
        xa = ref[pl.ds(_ROW0, _NROW), :].astype(bf16)
        xb = ref[pl.ds(_ROW0 - 1, _NROW), :].astype(bf16)
        return mm(xa, wa_ref[...]) + mm(xb, wb_ref[...]) + br_ref[...]

    def zero_last_slot(v, ncols):
        # zero the single pad slot (last ncols columns of the last slab row)
        # so it cannot leak into valid outputs of the next transposed conv.
        rows, cols = v.shape
        r = jax.lax.broadcasted_iota(jnp.int32, (rows, cols), 0)
        c = jax.lax.broadcasted_iota(jnp.int32, (rows, cols), 1)
        return jnp.where((r == rows - 1) & (c >= cols - ncols), 0.0, v)

    # ------------------------------ encoder ------------------------------
    xa = x_ref[pl.ds(0, _NROW), :].astype(bf16)          # (14, 128)
    xb = x_ref[pl.ds(1, _NROW), :].astype(bf16)
    a1 = jnp.maximum(mm(xa, wa1_ref[...]) + mm(xb, wb1_ref[...]) + b1r_ref[...],
                     0.0)                                # (14, 32*F)
    store_slab(a1_ref, a1)

    a2 = enc_layer(a1_ref, wa2_ref, wb2_ref, b2r_ref)    # (14, 8*2F)
    store_slab(a2_ref, a2)

    a3 = enc_layer(a2_ref, wa3_ref, wb3_ref, b3r_ref)    # (14, 2*4F) f32

    # --------------------------- bottleneck (f32) ---------------------------
    t1 = mm(a3, w1f_ref[...]) * m1_ref[...]              # (14, 14*latent)
    zsum = mm(jnp.ones((1, _NROW), f32), t1)             # (1, 14*latent)
    z = mm(zsum, r1_ref[...]) + b1l_ref[...]             # (1, latent)

    zb = jnp.broadcast_to(z, (_NROW, z.shape[1]))        # (14, latent)
    zexp = mm(zb, e8_ref[...]) * m1_ref[...]             # (14, 14*latent)
    y0 = mm(zexp, w2a_ref[...]) + b2s_ref[...]           # (14, 2*4F)
    store_slab(y0_ref, y0)

    # ------------------------------ decoder ------------------------------
    y1 = jnp.maximum(dec_layer(y0_ref, wda1_ref, wdb1_ref, bd1r_ref), 0.0)
    y1 = zero_last_slot(y1, y1.shape[1] // 8)            # zero pad slot (pos 111)
    store_slab(y1_ref, y1)

    y2 = jnp.maximum(dec_layer(y1_ref, wda2_ref, wdb2_ref, bd2r_ref), 0.0)
    y2 = zero_last_slot(y2, y2.shape[1] // 32)           # zero pad slot (pos 447)
    store_slab(y2_ref, y2)

    y3 = jnp.maximum(dec_layer(y2_ref, wda3_ref, wdb3_ref, bd3r_ref), 0.0)  # (14, 512)

    out_ref[...] = mm(y3.astype(bf16), w4_ref[...]) + bd4r_ref[...]          # (14, 128)


# ----------------------------------------------------------------------------
# One-time parameter repacking (hoisted out of the per-forward path).
# ----------------------------------------------------------------------------
def prepare_params(p, filters, latent_dim):
    F = filters
    L3 = 27
    C3 = 4 * F
    G3 = 2
    lat = latent_dim
    f32, bf16 = jnp.float32, jnp.bfloat16

    def np32(a):
        return np.asarray(a, dtype=np.float32)

    def conv_mats(w, gy):
        # Conv1d (stride 4, K=7): banded matrices for slab rows j and j+1.
        co, ci, K = w.shape
        gx = 4 * gy
        wa = np.zeros((gx * ci, gy * co), np.float32)
        wb = np.zeros((gx * ci, gy * co), np.float32)
        wt = np.transpose(w, (2, 1, 0))                       # (K, ci, co)
        for pp in range(gy):
            for q in range(gx):
                k = q - 4 * pp
                if 0 <= k < K:
                    wa[q * ci:(q + 1) * ci, pp * co:(pp + 1) * co] = wt[k]
                k = q + gx - 4 * pp
                if 0 <= k < K:
                    wb[q * ci:(q + 1) * ci, pp * co:(pp + 1) * co] = wt[k]
        return jnp.asarray(wa, bf16), jnp.asarray(wb, bf16)

    def tconv_mats(w, gy):
        # ConvTranspose1d (stride 4, K=7): banded matrices for rows j and j-1.
        ci, co, K = w.shape
        gx = gy // 4
        wa = np.zeros((gx * ci, gy * co), np.float32)
        wb = np.zeros((gx * ci, gy * co), np.float32)
        for pp in range(gy):
            for q in range(gx):
                k = pp - 4 * q
                if 0 <= k < K:
                    wa[q * ci:(q + 1) * ci, pp * co:(pp + 1) * co] = w[:, :, k]
                k = pp + gy - 4 * q
                if 0 <= k < K:
                    wb[q * ci:(q + 1) * ci, pp * co:(pp + 1) * co] = w[:, :, k]
        return jnp.asarray(wa, bf16), jnp.asarray(wb, bf16)

    def bias_row(b, gy):
        return jnp.asarray(np.tile(np32(b), gy)[None, :], f32)

    wa1, wb1 = conv_mats(np32(p["conv1_w"]), 32)
    wa2, wb2 = conv_mats(np32(p["conv2_w"]), 8)
    wa3, wb3 = conv_mats(np32(p["conv3_w"]), G3)
    wda1, wdb1 = tconv_mats(np32(p["dconv1_w"]), 8)
    wda2, wdb2 = tconv_mats(np32(p["dconv2_w"]), 32)
    wda3, wdb3 = tconv_mats(np32(p["dconv3_w"]), 128)

    # lin1: z[d] = b + sum_{c,l} a3[l,c] * W1[d, c*27 + l]  (kept in f32)
    w1 = np32(p["lin1_w"]).reshape(lat, C3, L3)               # [d, c, l]
    w1f = np.zeros((G3 * C3, _NROW * lat), np.float32)
    for j in range(_NROW):
        for pp in range(G3):
            l = G3 * j + pp
            if l < L3:
                w1f[pp * C3:(pp + 1) * C3, j * lat:(j + 1) * lat] = w1[:, :, l].T
    m1 = np.kron(np.eye(_NROW, dtype=np.float32), np.ones((1, lat), np.float32))
    r1 = np.tile(np.eye(lat, dtype=np.float32), (_NROW, 1))
    e8 = np.tile(np.eye(lat, dtype=np.float32), (1, _NROW))

    # lin2 + unflatten:  y0[l, c] = b2[c*27+l] + sum_d z[d] * W2[c*27+l, d]
    w2 = np32(p["lin2_w"])                                    # (C3*27, lat)
    b2v = np32(p["lin2_b"])
    w2a = np.zeros((_NROW * lat, G3 * C3), np.float32)
    b2s = np.zeros((_NROW, G3 * C3), np.float32)
    for j in range(_NROW):
        for pp in range(G3):
            l = G3 * j + pp
            if l < L3:
                for c in range(C3):
                    w2a[j * lat:(j + 1) * lat, pp * C3 + c] = w2[c * L3 + l, :]
                    b2s[j, pp * C3 + c] = b2v[c * L3 + l]

    # dconv4 (1x1): per-slot dot with the F-vector of weights.
    w4v = np32(p["dconv4_w"]).reshape(F)
    w4big = np.zeros((128 * F, 128), np.float32)
    for q in range(128):
        w4big[q * F:(q + 1) * F, q] = w4v

    return {
        "wa1": wa1, "wb1": wb1, "b1r": bias_row(p["conv1_b"], 32),
        "wa2": wa2, "wb2": wb2, "b2r": bias_row(p["conv2_b"], 8),
        "wa3": wa3, "wb3": wb3, "b3r": bias_row(p["conv3_b"], G3),
        "w1f": jnp.asarray(w1f, f32), "m1": jnp.asarray(m1, f32),
        "r1": jnp.asarray(r1, f32),
        "b1l": jnp.asarray(np32(p["lin1_b"])[None, :], f32),
        "e8": jnp.asarray(e8, f32), "w2a": jnp.asarray(w2a, f32),
        "b2s": jnp.asarray(b2s, f32),
        "wda1": wda1, "wdb1": wdb1, "bd1r": bias_row(p["dconv1_b"], 8),
        "wda2": wda2, "wdb2": wdb2, "bd2r": bias_row(p["dconv2_b"], 32),
        "wda3": wda3, "wdb3": wdb3, "bd3r": bias_row(p["dconv3_b"], 128),
        "w4": jnp.asarray(w4big, bf16),
        "bd4r": jnp.asarray(np.full((1, 128), np32(p["dconv4_b"])[0]), f32),
    }


# ----------------------------------------------------------------------------
# Forward pass wrapper: one fused pallas_call for the whole AE.
# ----------------------------------------------------------------------------
def ae_forward(kp, x_blue):
    """x_blue: (B, 1, 1791) f32 -> reconstruction (B, 1, 1791) f32."""
    B, _, L0 = x_blue.shape
    # Architecture requires L0 = 1791 (three stride-4 k=7 convs ending at 27).
    x_pad = jnp.pad(x_blue[:, 0, :], ((0, 0), (0, 16 * 128 - L0)))
    x_slab = x_pad.reshape(B, 16, 128)                        # lane-dense input

    consts = [kp[name] for name in _PARAM_ORDER]

    def const_spec(arr):
        zeros = (0,) * arr.ndim
        return pl.BlockSpec(arr.shape, lambda b, _z=zeros: _z)

    in_specs = [pl.BlockSpec((None, 16, 128), lambda b: (b, 0, 0))]
    in_specs += [const_spec(a) for a in consts]

    f32 = jnp.float32
    scratch_shapes = [
        pltpu.VMEM((24, 128), f32),    # a1 slab
        pltpu.VMEM((24, 64), f32),     # a2 slab
        pltpu.VMEM((24, 32), f32),     # y0 slab
        pltpu.VMEM((24, 128), f32),    # y1 slab
        pltpu.VMEM((24, 256), f32),    # y2 slab
    ]

    out = pl.pallas_call(
        _ae_fused_kernel,
        out_shape=jax.ShapeDtypeStruct((B, _NROW, 128), f32),
        grid=(B,),
        in_specs=in_specs,
        out_specs=pl.BlockSpec((None, _NROW, 128), lambda b: (b, 0, 0)),
        scratch_shapes=scratch_shapes,
        compiler_params=pltpu.CompilerParams(
            dimension_semantics=("parallel",),
            vmem_limit_bytes=16 * 1024 * 1024,
        ),
    )(x_slab, *consts)

    # (B, 14, 128) -> (B, 1, 1791): drop the single pad sample, free reshapes.
    return out.reshape(B, _NROW * 128)[:, :L0].reshape(B, 1, L0)


# ----------------------------------------------------------------------------
# Parameter init mimicking PyTorch defaults (uniform +/- 1/sqrt(fan_in)).
# ----------------------------------------------------------------------------
def init_params(key, filters, latent_dim):
    F_ = filters

    def uni(k, shape, fan_in):
        bound = 1.0 / float(fan_in) ** 0.5
        return jax.random.uniform(k, shape, jnp.float32, -bound, bound)

    ks = jax.random.split(key, 18)
    p = {}
    # encoder
    p["conv1_w"] = uni(ks[0], (F_, 1, 7), 1 * 7)
    p["conv1_b"] = uni(ks[1], (F_,), 1 * 7)
    p["conv2_w"] = uni(ks[2], (2 * F_, F_, 7), F_ * 7)
    p["conv2_b"] = uni(ks[3], (2 * F_,), F_ * 7)
    p["conv3_w"] = uni(ks[4], (4 * F_, 2 * F_, 7), 2 * F_ * 7)
    p["conv3_b"] = uni(ks[5], (4 * F_,), 2 * F_ * 7)
    p["lin1_w"] = uni(ks[6], (latent_dim, 4 * F_ * 27), 4 * F_ * 27)
    p["lin1_b"] = uni(ks[7], (latent_dim,), 4 * F_ * 27)
    # decoder
    p["lin2_w"] = uni(ks[8], (4 * F_ * 27, latent_dim), latent_dim)
    p["lin2_b"] = uni(ks[9], (4 * F_ * 27,), latent_dim)
    p["dconv1_w"] = uni(ks[10], (4 * F_, 4 * F_, 7), 4 * F_ * 7)
    p["dconv1_b"] = uni(ks[11], (4 * F_,), 4 * F_ * 7)
    p["dconv2_w"] = uni(ks[12], (4 * F_, 2 * F_, 7), 4 * F_ * 7)
    p["dconv2_b"] = uni(ks[13], (2 * F_,), 4 * F_ * 7)
    p["dconv3_w"] = uni(ks[14], (2 * F_, F_, 7), 2 * F_ * 7)
    p["dconv3_b"] = uni(ks[15], (F_,), 2 * F_ * 7)
    p["dconv4_w"] = uni(ks[16], (F_, 1, 1), F_ * 1)
    p["dconv4_b"] = uni(ks[17], (1,), F_ * 1)
    return p


# ----------------------------------------------------------------------------
if __name__ == "__main__":
    filters, latent_dim = 4, 8
    batch = 2
    # Input length dictated by the architecture: three stride-4 k=7 convs must
    # end at length 27 so the 4*filters*27 flatten works -> L = 1791.
    length = 1791

    key = jax.random.PRNGKey(0)
    params = init_params(key, filters, latent_dim)
    kparams = prepare_params(params, filters, latent_dim)   # one-time repack
    x_blue = jax.random.normal(jax.random.fold_in(key, 123),
                               (batch, 1, length), jnp.float32)

    fwd = jax.jit(ae_forward)
    y = jax.block_until_ready(fwd(kparams, x_blue))

    assert y.shape == (batch, 1, length), y.shape
    assert y.dtype == jnp.float32
    assert bool(jnp.all(jnp.isfinite(y)))
    print("KERNEL_OK")
</pallas_src>

<mosaic_0001>
module attributes {stable_mosaic.version = 11 : i64} {
  func.func @_ae_fused_kernel(%arg0: i32, %arg1: memref<1x16x128xf32, #tpu.memory_space<vmem>>, %arg2: memref<128x128xbf16, #tpu.memory_space<vmem>>, %arg3: memref<128x128xbf16, #tpu.memory_space<vmem>>, %arg4: memref<1x128xf32, #tpu.memory_space<vmem>>, %arg5: memref<128x64xbf16, #tpu.memory_space<vmem>>, %arg6: memref<128x64xbf16, #tpu.memory_space<vmem>>, %arg7: memref<1x64xf32, #tpu.memory_space<vmem>>, %arg8: memref<64x32xbf16, #tpu.memory_space<vmem>>, %arg9: memref<64x32xbf16, #tpu.memory_space<vmem>>, %arg10: memref<1x32xf32, #tpu.memory_space<vmem>>, %arg11: memref<32x112xf32, #tpu.memory_space<vmem>>, %arg12: memref<14x112xf32, #tpu.memory_space<vmem>>, %arg13: memref<112x8xf32, #tpu.memory_space<vmem>>, %arg14: memref<1x8xf32, #tpu.memory_space<vmem>>, %arg15: memref<8x112xf32, #tpu.memory_space<vmem>>, %arg16: memref<112x32xf32, #tpu.memory_space<vmem>>, %arg17: memref<14x32xf32, #tpu.memory_space<vmem>>, %arg18: memref<32x128xbf16, #tpu.memory_space<vmem>>, %arg19: memref<32x128xbf16, #tpu.memory_space<vmem>>, %arg20: memref<1x128xf32, #tpu.memory_space<vmem>>, %arg21: memref<128x256xbf16, #tpu.memory_space<vmem>>, %arg22: memref<128x256xbf16, #tpu.memory_space<vmem>>, %arg23: memref<1x256xf32, #tpu.memory_space<vmem>>, %arg24: memref<256x512xbf16, #tpu.memory_space<vmem>>, %arg25: memref<256x512xbf16, #tpu.memory_space<vmem>>, %arg26: memref<1x512xf32, #tpu.memory_space<vmem>>, %arg27: memref<512x128xbf16, #tpu.memory_space<vmem>>, %arg28: memref<1x128xf32, #tpu.memory_space<vmem>>, %arg29: memref<1x14x128xf32, #tpu.memory_space<vmem>>, %arg30: memref<24x128xf32, #tpu.memory_space<vmem>>, %arg31: memref<24x64xf32, #tpu.memory_space<vmem>>, %arg32: memref<24x32xf32, #tpu.memory_space<vmem>>, %arg33: memref<24x128xf32, #tpu.memory_space<vmem>>, %arg34: memref<24x256xf32, #tpu.memory_space<vmem>>) attributes {dimension_semantics = [#tpu.dimension_semantics<parallel>], iteration_bounds = array<i64: 2>, scalar_prefetch = 0 : i64, scratch_operands = 5 : i64, tpu.core_type = #tpu.core_type<tc>, window_params = [{transform_indices = @transform_0, window_bounds = array<i64: 1, 16, 128>}, {pipeline_mode = #tpu.pipeline_mode<synchronous>, transform_indices = @transform_1, window_bounds = array<i64: 128, 128>}, {pipeline_mode = #tpu.pipeline_mode<synchronous>, transform_indices = @transform_2, window_bounds = array<i64: 128, 128>}, {pipeline_mode = #tpu.pipeline_mode<synchronous>, transform_indices = @transform_3, window_bounds = array<i64: 1, 128>}, {pipeline_mode = #tpu.pipeline_mode<synchronous>, transform_indices = @transform_4, window_bounds = array<i64: 128, 64>}, {pipeline_mode = #tpu.pipeline_mode<synchronous>, transform_indices = @transform_5, window_bounds = array<i64: 128, 64>}, {pipeline_mode = #tpu.pipeline_mode<synchronous>, transform_indices = @transform_6, window_bounds = array<i64: 1, 64>}, {pipeline_mode = #tpu.pipeline_mode<synchronous>, transform_indices = @transform_7, window_bounds = array<i64: 64, 32>}, {pipeline_mode = #tpu.pipeline_mode<synchronous>, transform_indices = @transform_8, window_bounds = array<i64: 64, 32>}, {pipeline_mode = #tpu.pipeline_mode<synchronous>, transform_indices = @transform_9, window_bounds = array<i64: 1, 32>}, {pipeline_mode = #tpu.pipeline_mode<synchronous>, transform_indices = @transform_10, window_bounds = array<i64: 32, 112>}, {pipeline_mode = #tpu.pipeline_mode<synchronous>, transform_indices = @transform_11, window_bounds = array<i64: 14, 112>}, {pipeline_mode = #tpu.pipeline_mode<synchronous>, transform_indices = @transform_12, window_bounds = array<i64: 112, 8>}, {pipeline_mode = #tpu.pipeline_mode<synchronous>, transform_indices = @transform_13, window_bounds = array<i64: 1, 8>}, {pipeline_mode = #tpu.pipeline_mode<synchronous>, transform_indices = @transform_14, window_bounds = array<i64: 8, 112>}, {pipeline_mode = #tpu.pipeline_mode<synchronous>, transform_indices = @transform_15, window_bounds = array<i64: 112, 32>}, {pipeline_mode = #tpu.pipeline_mode<synchronous>, transform_indices = @transform_16, window_bounds = array<i64: 14, 32>}, {pipeline_mode = #tpu.pipeline_mode<synchronous>, transform_indices = @transform_17, window_bounds = array<i64: 32, 128>}, {pipeline_mode = #tpu.pipeline_mode<synchronous>, transform_indices = @transform_18, window_bounds = array<i64: 32, 128>}, {pipeline_mode = #tpu.pipeline_mode<synchronous>, transform_indices = @transform_19, window_bounds = array<i64: 1, 128>}, {pipeline_mode = #tpu.pipeline_mode<synchronous>, transform_indices = @transform_20, window_bounds = array<i64: 128, 256>}, {pipeline_mode = #tpu.pipeline_mode<synchronous>, transform_indices = @transform_21, window_bounds = array<i64: 128, 256>}, {pipeline_mode = #tpu.pipeline_mode<synchronous>, transform_indices = @transform_22, window_bounds = array<i64: 1, 256>}, {pipeline_mode = #tpu.pipeline_mode<synchronous>, transform_indices = @transform_23, window_bounds = array<i64: 256, 512>}, {pipeline_mode = #tpu.pipeline_mode<synchronous>, transform_indices = @transform_24, window_bounds = array<i64: 256, 512>}, {pipeline_mode = #tpu.pipeline_mode<synchronous>, transform_indices = @transform_25, window_bounds = array<i64: 1, 512>}, {pipeline_mode = #tpu.pipeline_mode<synchronous>, transform_indices = @transform_26, window_bounds = array<i64: 512, 128>}, {pipeline_mode = #tpu.pipeline_mode<synchronous>, transform_indices = @transform_27, window_bounds = array<i64: 1, 128>}, {transform_indices = @transform_28, window_bounds = array<i64: 1, 14, 128>}]} {
    %c0 = arith.constant 0 : index
    %c0_0 = arith.constant 0 : index
    %c0_1 = arith.constant 0 : index
    %0 = vector.load %arg1[%c0, %c0_0, %c0_1] : memref<1x16x128xf32, #tpu.memory_space<vmem>>, vector<1x14x128xf32>
    %1 = vector.shape_cast %0 : vector<1x14x128xf32> to vector<14x128xf32>
    %2 = arith.truncf %1 : vector<14x128xf32> to vector<14x128xbf16>
    %c0_2 = arith.constant 0 : index
    %c1 = arith.constant 1 : index
    %c0_3 = arith.constant 0 : index
    %3 = vector.load %arg1[%c0_2, %c1, %c0_3] : memref<1x16x128xf32, #tpu.memory_space<vmem>>, vector<1x14x128xf32>
    %4 = vector.shape_cast %3 : vector<1x14x128xf32> to vector<14x128xf32>
    %5 = arith.truncf %4 : vector<14x128xf32> to vector<14x128xbf16>
    %c0_4 = arith.constant 0 : index
    %c0_5 = arith.constant 0 : index
    %6 = vector.load %arg2[%c0_4, %c0_5] : memref<128x128xbf16, #tpu.memory_space<vmem>>, vector<128x128xbf16>
    %cst = arith.constant dense<0.000000e+00> : vector<14x128xf32>
    %7 = tpu.matmul %2, %6, %cst {dimension_numbers = #tpu.dot_dimension_numbers<[1], [0], [0], [1], [0, 0, 1, 1], [], []>} : vector<14x128xbf16>, vector<128x128xbf16>, vector<14x128xf32> -> vector<14x128xf32>
    %c0_6 = arith.constant 0 : index
    %c0_7 = arith.constant 0 : index
    %8 = vector.load %arg3[%c0_6, %c0_7] : memref<128x128xbf16, #tpu.memory_space<vmem>>, vector<128x128xbf16>
    %cst_8 = arith.constant dense<0.000000e+00> : vector<14x128xf32>
    %9 = tpu.matmul %5, %8, %cst_8 {dimension_numbers = #tpu.dot_dimension_numbers<[1], [0], [0], [1], [0, 0, 1, 1], [], []>} : vector<14x128xbf16>, vector<128x128xbf16>, vector<14x128xf32> -> vector<14x128xf32>
    %10 = arith.addf %7, %9 : vector<14x128xf32>
    %c0_9 = arith.constant 0 : index
    %c0_10 = arith.constant 0 : index
    %11 = vector.load %arg4[%c0_9, %c0_10] : memref<1x128xf32, #tpu.memory_space<vmem>>, vector<1x128xf32>
    %12 = vector.broadcast %11 : vector<1x128xf32> to vector<14x128xf32>
    %13 = arith.addf %10, %12 : vector<14x128xf32>
    %cst_11 = arith.constant 0.000000e+00 : f32
    %14 = vector.broadcast %cst_11 : f32 to vector<14x128xf32>
    %15 = arith.maximumf %13, %14 : vector<14x128xf32>
    %cst_12 = arith.constant 0.000000e+00 : f32
    %16 = vector.broadcast %cst_12 : f32 to vector<8x128xf32>
    %c0_13 = arith.constant 0 : index
    %c0_14 = arith.constant 0 : index
    %17 = vector.load %arg30[%c0_13, %c0_14] : memref<24x128xf32, #tpu.memory_space<vmem>>, vector<8x128xf32>
    tpu.vector_store %arg30[%c0_13, %c0_14], %16 {strides = array<i32>} : memref<24x128xf32, #tpu.memory_space<vmem>>, vector<8x128xf32>,
    %c16 = arith.constant 16 : index
    %c0_15 = arith.constant 0 : index
    %18 = vector.load %arg30[%c16, %c0_15] : memref<24x128xf32, #tpu.memory_space<vmem>>, vector<8x128xf32>
    tpu.vector_store %arg30[%c16, %c0_15], %16 {strides = array<i32>} : memref<24x128xf32, #tpu.memory_space<vmem>>, vector<8x128xf32>,
    %c8 = arith.constant 8 : index
    %c0_16 = arith.constant 0 : index
    %19 = vector.load %arg30[%c8, %c0_16] : memref<24x128xf32, #tpu.memory_space<vmem>>, vector<14x128xf32>
    tpu.vector_store %arg30[%c8, %c0_16], %15 {strides = array<i32>} : memref<24x128xf32, #tpu.memory_space<vmem>>, vector<14x128xf32>,
    %c8_17 = arith.constant 8 : index
    %c0_18 = arith.constant 0 : index
    %20 = vector.load %arg30[%c8_17, %c0_18] : memref<24x128xf32, #tpu.memory_space<vmem>>, vector<14x128xf32>
    %21 = arith.truncf %20 : vector<14x128xf32> to vector<14x128xbf16>
    %c9 = arith.constant 9 : index
    %c0_19 = arith.constant 0 : index
    %22 = vector.load %arg30[%c9, %c0_19] : memref<24x128xf32, #tpu.memory_space<vmem>>, vector<14x128xf32>
    %23 = arith.truncf %22 : vector<14x128xf32> to vector<14x128xbf16>
    %c0_20 = arith.constant 0 : index
    %c0_21 = arith.constant 0 : index
    %24 = vector.load %arg5[%c0_20, %c0_21] : memref<128x64xbf16, #tpu.memory_space<vmem>>, vector<128x64xbf16>
    %cst_22 = arith.constant dense<0.000000e+00> : vector<14x64xf32>
    %25 = tpu.matmul %21, %24, %cst_22 {dimension_numbers = #tpu.dot_dimension_numbers<[1], [0], [0], [1], [0, 0, 1, 1], [], []>} : vector<14x128xbf16>, vector<128x64xbf16>, vector<14x64xf32> -> vector<14x64xf32>
    %c0_23 = arith.constant 0 : index
    %c0_24 = arith.constant 0 : index
    %26 = vector.load %arg6[%c0_23, %c0_24] : memref<128x64xbf16, #tpu.memory_space<vmem>>, vector<128x64xbf16>
    %cst_25 = arith.constant dense<0.000000e+00> : vector<14x64xf32>
    %27 = tpu.matmul %23, %26, %cst_25 {dimension_numbers = #tpu.dot_dimension_numbers<[1], [0], [0], [1], [0, 0, 1, 1], [], []>} : vector<14x128xbf16>, vector<128x64xbf16>, vector<14x64xf32> -> vector<14x64xf32>
    %28 = arith.addf %25, %27 : vector<14x64xf32>
    %c0_26 = arith.constant 0 : index
    %c0_27 = arith.constant 0 : index
    %29 = vector.load %arg7[%c0_26, %c0_27] : memref<1x64xf32, #tpu.memory_space<vmem>>, vector<1x64xf32>
    %30 = vector.broadcast %29 : vector<1x64xf32> to vector<14x64xf32>
    %31 = arith.addf %28, %30 : vector<14x64xf32>
    %cst_28 = arith.constant 0.000000e+00 : f32
    %32 = vector.broadcast %cst_28 : f32 to vector<14x64xf32>
    %33 = arith.maximumf %31, %32 : vector<14x64xf32>
    %cst_29 = arith.constant 0.000000e+00 : f32
    %34 = vector.broadcast %cst_29 : f32 to vector<8x64xf32>
    %c0_30 = arith.constant 0 : index
    %c0_31 = arith.constant 0 : index
    %35 = vector.load %arg31[%c0_30, %c0_31] : memref<24x64xf32, #tpu.memory_space<vmem>>, vector<8x64xf32>
    tpu.vector_store %arg31[%c0_30, %c0_31], %34 {strides = array<i32>} : memref<24x64xf32, #tpu.memory_space<vmem>>, vector<8x64xf32>,
    %c16_32 = arith.constant 16 : index
    %c0_33 = arith.constant 0 : index
    %36 = vector.load %arg31[%c16_32, %c0_33] : memref<24x64xf32, #tpu.memory_space<vmem>>, vector<8x64xf32>
    tpu.vector_store %arg31[%c16_32, %c0_33], %34 {strides = array<i32>} : memref<24x64xf32, #tpu.memory_space<vmem>>, vector<8x64xf32>,
    %c8_34 = arith.constant 8 : index
    %c0_35 = arith.constant 0 : index
    %37 = vector.load %arg31[%c8_34, %c0_35] : memref<24x64xf32, #tpu.memory_space<vmem>>, vector<14x64xf32>
    tpu.vector_store %arg31[%c8_34, %c0_35], %33 {strides = array<i32>} : memref<24x64xf32, #tpu.memory_space<vmem>>, vector<14x64xf32>,
    %c8_36 = arith.constant 8 : index
    %c0_37 = arith.constant 0 : index
    %38 = vector.load %arg31[%c8_36, %c0_37] : memref<24x64xf32, #tpu.memory_space<vmem>>, vector<14x64xf32>
    %39 = arith.truncf %38 : vector<14x64xf32> to vector<14x64xbf16>
    %c9_38 = arith.constant 9 : index
    %c0_39 = arith.constant 0 : index
    %40 = vector.load %arg31[%c9_38, %c0_39] : memref<24x64xf32, #tpu.memory_space<vmem>>, vector<14x64xf32>
    %41 = arith.truncf %40 : vector<14x64xf32> to vector<14x64xbf16>
    %c0_40 = arith.constant 0 : index
    %c0_41 = arith.constant 0 : index
    %42 = vector.load %arg8[%c0_40, %c0_41] : memref<64x32xbf16, #tpu.memory_space<vmem>>, vector<64x32xbf16>
    %cst_42 = arith.constant dense<0.000000e+00> : vector<14x32xf32>
    %43 = tpu.matmul %39, %42, %cst_42 {dimension_numbers = #tpu.dot_dimension_numbers<[1], [0], [0], [1], [0, 0, 1, 1], [], []>} : vector<14x64xbf16>, vector<64x32xbf16>, vector<14x32xf32> -> vector<14x32xf32>
    %c0_43 = arith.constant 0 : index
    %c0_44 = arith.constant 0 : index
    %44 = vector.load %arg9[%c0_43, %c0_44] : memref<64x32xbf16, #tpu.memory_space<vmem>>, vector<64x32xbf16>
    %cst_45 = arith.constant dense<0.000000e+00> : vector<14x32xf32>
    %45 = tpu.matmul %41, %44, %cst_45 {dimension_numbers = #tpu.dot_dimension_numbers<[1], [0], [0], [1], [0, 0, 1, 1], [], []>} : vector<14x64xbf16>, vector<64x32xbf16>, vector<14x32xf32> -> vector<14x32xf32>
    %46 = arith.addf %43, %45 : vector<14x32xf32>
    %c0_46 = arith.constant 0 : index
    %c0_47 = arith.constant 0 : index
    %47 = vector.load %arg10[%c0_46, %c0_47] : memref<1x32xf32, #tpu.memory_space<vmem>>, vector<1x32xf32>
    %48 = vector.broadcast %47 : vector<1x32xf32> to vector<14x32xf32>
    %49 = arith.addf %46, %48 : vector<14x32xf32>
    %cst_48 = arith.constant 0.000000e+00 : f32
    %50 = vector.broadcast %cst_48 : f32 to vector<14x32xf32>
    %51 = arith.maximumf %49, %50 : vector<14x32xf32>
    %c0_49 = arith.constant 0 : index
    %c0_50 = arith.constant 0 : index
    %52 = vector.load %arg11[%c0_49, %c0_50] : memref<32x112xf32, #tpu.memory_space<vmem>>, vector<32x112xf32>
    %cst_51 = arith.constant dense<0.000000e+00> : vector<14x112xf32>
    %53 = tpu.matmul %51, %52, %cst_51 {dimension_numbers = #tpu.dot_dimension_numbers<[1], [0], [0], [1], [0, 0, 1, 1], [], []>} : vector<14x32xf32>, vector<32x112xf32>, vector<14x112xf32> -> vector<14x112xf32>
    %c0_52 = arith.constant 0 : index
    %c0_53 = arith.constant 0 : index
    %54 = vector.load %arg12[%c0_52, %c0_53] : memref<14x112xf32, #tpu.memory_space<vmem>>, vector<14x112xf32>
    %55 = arith.mulf %53, %54 : vector<14x112xf32>
    %cst_54 = arith.constant 1.000000e+00 : f32
    %56 = vector.broadcast %cst_54 : f32 to vector<1x14xf32>
    %cst_55 = arith.constant dense<0.000000e+00> : vector<1x112xf32>
    %57 = tpu.matmul %56, %55, %cst_55 {dimension_numbers = #tpu.dot_dimension_numbers<[1], [0], [0], [1], [0, 0, 1, 1], [], []>} : vector<1x14xf32>, vector<14x112xf32>, vector<1x112xf32> -> vector<1x112xf32>
    %c0_56 = arith.constant 0 : index
    %c0_57 = arith.constant 0 : index
    %58 = vector.load %arg13[%c0_56, %c0_57] : memref<112x8xf32, #tpu.memory_space<vmem>>, vector<112x8xf32>
    %cst_58 = arith.constant dense<0.000000e+00> : vector<1x8xf32>
    %59 = tpu.matmul %57, %58, %cst_58 {dimension_numbers = #tpu.dot_dimension_numbers<[1], [0], [0], [1], [0, 0, 1, 1], [], []>} : vector<1x112xf32>, vector<112x8xf32>, vector<1x8xf32> -> vector<1x8xf32>
    %c0_59 = arith.constant 0 : index
    %c0_60 = arith.constant 0 : index
    %60 = vector.load %arg14[%c0_59, %c0_60] : memref<1x8xf32, #tpu.memory_space<vmem>>, vector<1x8xf32>
    %61 = arith.addf %59, %60 : vector<1x8xf32>
    %62 = vector.shape_cast %61 : vector<1x8xf32> to vector<1x8xf32>
    %63 = vector.broadcast %62 : vector<1x8xf32> to vector<14x8xf32>
    %c0_61 = arith.constant 0 : index
    %c0_62 = arith.constant 0 : index
    %64 = vector.load %arg15[%c0_61, %c0_62] : memref<8x112xf32, #tpu.memory_space<vmem>>, vector<8x112xf32>
    %cst_63 = arith.constant dense<0.000000e+00> : vector<14x112xf32>
    %65 = tpu.matmul %63, %64, %cst_63 {dimension_numbers = #tpu.dot_dimension_numbers<[1], [0], [0], [1], [0, 0, 1, 1], [], []>} : vector<14x8xf32>, vector<8x112xf32>, vector<14x112xf32> -> vector<14x112xf32>
    %c0_64 = arith.constant 0 : index
    %c0_65 = arith.constant 0 : index
    %66 = vector.load %arg12[%c0_64, %c0_65] : memref<14x112xf32, #tpu.memory_space<vmem>>, vector<14x112xf32>
    %67 = arith.mulf %65, %66 : vector<14x112xf32>
    %c0_66 = arith.constant 0 : index
    %c0_67 = arith.constant 0 : index
    %68 = vector.load %arg16[%c0_66, %c0_67] : memref<112x32xf32, #tpu.memory_space<vmem>>, vector<112x32xf32>
    %cst_68 = arith.constant dense<0.000000e+00> : vector<14x32xf32>
    %69 = tpu.matmul %67, %68, %cst_68 {dimension_numbers = #tpu.dot_dimension_numbers<[1], [0], [0], [1], [0, 0, 1, 1], [], []>} : vector<14x112xf32>, vector<112x32xf32>, vector<14x32xf32> -> vector<14x32xf32>
    %c0_69 = arith.constant 0 : index
    %c0_70 = arith.constant 0 : index
    %70 = vector.load %arg17[%c0_69, %c0_70] : memref<14x32xf32, #tpu.memory_space<vmem>>, vector<14x32xf32>
    %71 = arith.addf %69, %70 : vector<14x32xf32>
    %cst_71 = arith.constant 0.000000e+00 : f32
    %72 = vector.broadcast %cst_71 : f32 to vector<8x32xf32>
    %c0_72 = arith.constant 0 : index
    %c0_73 = arith.constant 0 : index
    %73 = vector.load %arg32[%c0_72, %c0_73] : memref<24x32xf32, #tpu.memory_space<vmem>>, vector<8x32xf32>
    tpu.vector_store %arg32[%c0_72, %c0_73], %72 {strides = array<i32>} : memref<24x32xf32, #tpu.memory_space<vmem>>, vector<8x32xf32>,
    %c16_74 = arith.constant 16 : index
    %c0_75 = arith.constant 0 : index
    %74 = vector.load %arg32[%c16_74, %c0_75] : memref<24x32xf32, #tpu.memory_space<vmem>>, vector<8x32xf32>
    tpu.vector_store %arg32[%c16_74, %c0_75], %72 {strides = array<i32>} : memref<24x32xf32, #tpu.memory_space<vmem>>, vector<8x32xf32>,
    %c8_76 = arith.constant 8 : index
    %c0_77 = arith.constant 0 : index
    %75 = vector.load %arg32[%c8_76, %c0_77] : memref<24x32xf32, #tpu.memory_space<vmem>>, vector<14x32xf32>
    tpu.vector_store %arg32[%c8_76, %c0_77], %71 {strides = array<i32>} : memref<24x32xf32, #tpu.memory_space<vmem>>, vector<14x32xf32>,
    %c8_78 = arith.constant 8 : index
    %c0_79 = arith.constant 0 : index
    %76 = vector.load %arg32[%c8_78, %c0_79] : memref<24x32xf32, #tpu.memory_space<vmem>>, vector<14x32xf32>
    %77 = arith.truncf %76 : vector<14x32xf32> to vector<14x32xbf16>
    %c7 = arith.constant 7 : index
    %c0_80 = arith.constant 0 : index
    %78 = vector.load %arg32[%c7, %c0_80] : memref<24x32xf32, #tpu.memory_space<vmem>>, vector<14x32xf32>
    %79 = arith.truncf %78 : vector<14x32xf32> to vector<14x32xbf16>
    %c0_81 = arith.constant 0 : index
    %c0_82 = arith.constant 0 : index
    %80 = vector.load %arg18[%c0_81, %c0_82] : memref<32x128xbf16, #tpu.memory_space<vmem>>, vector<32x128xbf16>
    %cst_83 = arith.constant dense<0.000000e+00> : vector<14x128xf32>
    %81 = tpu.matmul %77, %80, %cst_83 {dimension_numbers = #tpu.dot_dimension_numbers<[1], [0], [0], [1], [0, 0, 1, 1], [], []>} : vector<14x32xbf16>, vector<32x128xbf16>, vector<14x128xf32> -> vector<14x128xf32>
    %c0_84 = arith.constant 0 : index
    %c0_85 = arith.constant 0 : index
    %82 = vector.load %arg19[%c0_84, %c0_85] : memref<32x128xbf16, #tpu.memory_space<vmem>>, vector<32x128xbf16>
    %cst_86 = arith.constant dense<0.000000e+00> : vector<14x128xf32>
    %83 = tpu.matmul %79, %82, %cst_86 {dimension_numbers = #tpu.dot_dimension_numbers<[1], [0], [0], [1], [0, 0, 1, 1], [], []>} : vector<14x32xbf16>, vector<32x128xbf16>, vector<14x128xf32> -> vector<14x128xf32>
    %84 = arith.addf %81, %83 : vector<14x128xf32>
    %c0_87 = arith.constant 0 : index
    %c0_88 = arith.constant 0 : index
    %85 = vector.load %arg20[%c0_87, %c0_88] : memref<1x128xf32, #tpu.memory_space<vmem>>, vector<1x128xf32>
    %86 = vector.broadcast %85 : vector<1x128xf32> to vector<14x128xf32>
    %87 = arith.addf %84, %86 : vector<14x128xf32>
    %cst_89 = arith.constant 0.000000e+00 : f32
    %88 = vector.broadcast %cst_89 : f32 to vector<14x128xf32>
    %89 = arith.maximumf %87, %88 : vector<14x128xf32>
    %90 = tpu.iota {dimensions = array<i32: 0>} : vector<14x128xi32>
    %91 = tpu.iota {dimensions = array<i32: 1>} : vector<14x128xi32>
    %c13_i32 = arith.constant 13 : i32
    %92 = vector.broadcast %c13_i32 : i32 to vector<14x128xi32>
    %93 = arith.cmpi eq, %90, %92 : vector<14x128xi32>
    %c112_i32 = arith.constant 112 : i32
    %94 = vector.broadcast %c112_i32 : i32 to vector<14x128xi32>
    %95 = arith.cmpi sge, %91, %94 : vector<14x128xi32>
    %96 = arith.andi %93, %95 : vector<14x128xi1>
    %cst_90 = arith.constant 0.000000e+00 : f32
    %97 = vector.broadcast %cst_90 : f32 to vector<14x128xf32>
    %98 = arith.select %96, %97, %89 : vector<14x128xi1>, vector<14x128xf32>
    %cst_91 = arith.constant 0.000000e+00 : f32
    %99 = vector.broadcast %cst_91 : f32 to vector<8x128xf32>
    %c0_92 = arith.constant 0 : index
    %c0_93 = arith.constant 0 : index
    %100 = vector.load %arg33[%c0_92, %c0_93] : memref<24x128xf32, #tpu.memory_space<vmem>>, vector<8x128xf32>
    tpu.vector_store %arg33[%c0_92, %c0_93], %99 {strides = array<i32>} : memref<24x128xf32, #tpu.memory_space<vmem>>, vector<8x128xf32>,
    %c16_94 = arith.constant 16 : index
    %c0_95 = arith.constant 0 : index
    %101 = vector.load %arg33[%c16_94, %c0_95] : memref<24x128xf32, #tpu.memory_space<vmem>>, vector<8x128xf32>
    tpu.vector_store %arg33[%c16_94, %c0_95], %99 {strides = array<i32>} : memref<24x128xf32, #tpu.memory_space<vmem>>, vector<8x128xf32>,
    %c8_96 = arith.constant 8 : index
    %c0_97 = arith.constant 0 : index
    %102 = vector.load %arg33[%c8_96, %c0_97] : memref<24x128xf32, #tpu.memory_space<vmem>>, vector<14x128xf32>
    tpu.vector_store %arg33[%c8_96, %c0_97], %98 {strides = array<i32>} : memref<24x128xf32, #tpu.memory_space<vmem>>, vector<14x128xf32>,
    %c8_98 = arith.constant 8 : index
    %c0_99 = arith.constant 0 : index
    %103 = vector.load %arg33[%c8_98, %c0_99] : memref<24x128xf32, #tpu.memory_space<vmem>>, vector<14x128xf32>
    %104 = arith.truncf %103 : vector<14x128xf32> to vector<14x128xbf16>
    %c7_100 = arith.constant 7 : index
    %c0_101 = arith.constant 0 : index
    %105 = vector.load %arg33[%c7_100, %c0_101] : memref<24x128xf32, #tpu.memory_space<vmem>>, vector<14x128xf32>
    %106 = arith.truncf %105 : vector<14x128xf32> to vector<14x128xbf16>
    %c0_102 = arith.constant 0 : index
    %c0_103 = arith.constant 0 : index
    %107 = vector.load %arg21[%c0_102, %c0_103] : memref<128x256xbf16, #tpu.memory_space<vmem>>, vector<128x256xbf16>
    %cst_104 = arith.constant dense<0.000000e+00> : vector<14x256xf32>
    %108 = tpu.matmul %104, %107, %cst_104 {dimension_numbers = #tpu.dot_dimension_numbers<[1], [0], [0], [1], [0, 0, 1, 1], [], []>} : vector<14x128xbf16>, vector<128x256xbf16>, vector<14x256xf32> -> vector<14x256xf32>
    %c0_105 = arith.constant 0 : index
    %c0_106 = arith.constant 0 : index
    %109 = vector.load %arg22[%c0_105, %c0_106] : memref<128x256xbf16, #tpu.memory_space<vmem>>, vector<128x256xbf16>
    %cst_107 = arith.constant dense<0.000000e+00> : vector<14x256xf32>
    %110 = tpu.matmul %106, %109, %cst_107 {dimension_numbers = #tpu.dot_dimension_numbers<[1], [0], [0], [1], [0, 0, 1, 1], [], []>} : vector<14x128xbf16>, vector<128x256xbf16>, vector<14x256xf32> -> vector<14x256xf32>
    %111 = arith.addf %108, %110 : vector<14x256xf32>
    %c0_108 = arith.constant 0 : index
    %c0_109 = arith.constant 0 : index
    %112 = vector.load %arg23[%c0_108, %c0_109] : memref<1x256xf32, #tpu.memory_space<vmem>>, vector<1x256xf32>
    %113 = vector.broadcast %112 : vector<1x256xf32> to vector<14x256xf32>
    %114 = arith.addf %111, %113 : vector<14x256xf32>
    %cst_110 = arith.constant 0.000000e+00 : f32
    %115 = vector.broadcast %cst_110 : f32 to vector<14x256xf32>
    %116 = arith.maximumf %114, %115 : vector<14x256xf32>
    %117 = tpu.iota {dimensions = array<i32: 0>} : vector<14x256xi32>
    %118 = tpu.iota {dimensions = array<i32: 1>} : vector<14x256xi32>
    %c13_i32_111 = arith.constant 13 : i32
    %119 = vector.broadcast %c13_i32_111 : i32 to vector<14x256xi32>
    %120 = arith.cmpi eq, %117, %119 : vector<14x256xi32>
    %c248_i32 = arith.constant 248 : i32
    %121 = vector.broadcast %c248_i32 : i32 to vector<14x256xi32>
    %122 = arith.cmpi sge, %118, %121 : vector<14x256xi32>
    %123 = arith.andi %120, %122 : vector<14x256xi1>
    %cst_112 = arith.constant 0.000000e+00 : f32
    %124 = vector.broadcast %cst_112 : f32 to vector<14x256xf32>
    %125 = arith.select %123, %124, %116 : vector<14x256xi1>, vector<14x256xf32>
    %cst_113 = arith.constant 0.000000e+00 : f32
    %126 = vector.broadcast %cst_113 : f32 to vector<8x256xf32>
    %c0_114 = arith.constant 0 : index
    %c0_115 = arith.constant 0 : index
    %127 = vector.load %arg34[%c0_114, %c0_115] : memref<24x256xf32, #tpu.memory_space<vmem>>, vector<8x256xf32>
    tpu.vector_store %arg34[%c0_114, %c0_115], %126 {strides = array<i32>} : memref<24x256xf32, #tpu.memory_space<vmem>>, vector<8x256xf32>,
    %c16_116 = arith.constant 16 : index
    %c0_117 = arith.constant 0 : index
    %128 = vector.load %arg34[%c16_116, %c0_117] : memref<24x256xf32, #tpu.memory_space<vmem>>, vector<8x256xf32>
    tpu.vector_store %arg34[%c16_116, %c0_117], %126 {strides = array<i32>} : memref<24x256xf32, #tpu.memory_space<vmem>>, vector<8x256xf32>,
    %c8_118 = arith.constant 8 : index
    %c0_119 = arith.constant 0 : index
    %129 = vector.load %arg34[%c8_118, %c0_119] : memref<24x256xf32, #tpu.memory_space<vmem>>, vector<14x256xf32>
    tpu.vector_store %arg34[%c8_118, %c0_119], %125 {strides = array<i32>} : memref<24x256xf32, #tpu.memory_space<vmem>>, vector<14x256xf32>,
    %c8_120 = arith.constant 8 : index
    %c0_121 = arith.constant 0 : index
    %130 = vector.load %arg34[%c8_120, %c0_121] : memref<24x256xf32, #tpu.memory_space<vmem>>, vector<14x256xf32>
    %131 = arith.truncf %130 : vector<14x256xf32> to vector<14x256xbf16>
    %c7_122 = arith.constant 7 : index
    %c0_123 = arith.constant 0 : index
    %132 = vector.load %arg34[%c7_122, %c0_123] : memref<24x256xf32, #tpu.memory_space<vmem>>, vector<14x256xf32>
    %133 = arith.truncf %132 : vector<14x256xf32> to vector<14x256xbf16>
    %c0_124 = arith.constant 0 : index
    %c0_125 = arith.constant 0 : index
    %134 = vector.load %arg24[%c0_124, %c0_125] : memref<256x512xbf16, #tpu.memory_space<vmem>>, vector<256x512xbf16>
    %cst_126 = arith.constant dense<0.000000e+00> : vector<14x512xf32>
    %135 = tpu.matmul %131, %134, %cst_126 {dimension_numbers = #tpu.dot_dimension_numbers<[1], [0], [0], [1], [0, 0, 1, 1], [], []>} : vector<14x256xbf16>, vector<256x512xbf16>, vector<14x512xf32> -> vector<14x512xf32>
    %c0_127 = arith.constant 0 : index
    %c0_128 = arith.constant 0 : index
    %136 = vector.load %arg25[%c0_127, %c0_128] : memref<256x512xbf16, #tpu.memory_space<vmem>>, vector<256x512xbf16>
    %cst_129 = arith.constant dense<0.000000e+00> : vector<14x512xf32>
    %137 = tpu.matmul %133, %136, %cst_129 {dimension_numbers = #tpu.dot_dimension_numbers<[1], [0], [0], [1], [0, 0, 1, 1], [], []>} : vector<14x256xbf16>, vector<256x512xbf16>, vector<14x512xf32> -> vector<14x512xf32>
    %138 = arith.addf %135, %137 : vector<14x512xf32>
    %c0_130 = arith.constant 0 : index
    %c0_131 = arith.constant 0 : index
    %139 = vector.load %arg26[%c0_130, %c0_131] : memref<1x512xf32, #tpu.memory_space<vmem>>, vector<1x512xf32>
    %140 = vector.broadcast %139 : vector<1x512xf32> to vector<14x512xf32>
    %141 = arith.addf %138, %140 : vector<14x512xf32>
    %cst_132 = arith.constant 0.000000e+00 : f32
    %142 = vector.broadcast %cst_132 : f32 to vector<14x512xf32>
    %143 = arith.maximumf %141, %142 : vector<14x512xf32>
    %144 = arith.truncf %143 : vector<14x512xf32> to vector<14x512xbf16>
    %c0_133 = arith.constant 0 : index
    %c0_134 = arith.constant 0 : index
    %145 = vector.load %arg27[%c0_133, %c0_134] : memref<512x128xbf16, #tpu.memory_space<vmem>>, vector<512x128xbf16>
    %cst_135 = arith.constant dense<0.000000e+00> : vector<14x128xf32>
    %146 = tpu.matmul %144, %145, %cst_135 {dimension_numbers = #tpu.dot_dimension_numbers<[1], [0], [0], [1], [0, 0, 1, 1], [], []>} : vector<14x512xbf16>, vector<512x128xbf16>, vector<14x128xf32> -> vector<14x128xf32>
    %c0_136 = arith.constant 0 : index
    %c0_137 = arith.constant 0 : index
    %147 = vector.load %arg28[%c0_136, %c0_137] : memref<1x128xf32, #tpu.memory_space<vmem>>, vector<1x128xf32>
    %148 = vector.broadcast %147 : vector<1x128xf32> to vector<14x128xf32>
    %149 = arith.addf %146, %148 : vector<14x128xf32>
    %c0_138 = arith.constant 0 : index
    %c0_139 = arith.constant 0 : index
    %c0_140 = arith.constant 0 : index
    %150 = vector.load %arg29[%c0_138, %c0_139, %c0_140] : memref<1x14x128xf32, #tpu.memory_space<vmem>>, vector<1x14x128xf32>
    %151 = vector.shape_cast %150 : vector<1x14x128xf32> to vector<14x128xf32>
    %152 = vector.shape_cast %149 : vector<14x128xf32> to vector<1x14x128xf32>
    tpu.vector_store %arg29[%c0_138, %c0_139, %c0_140], %152 {strides = array<i32>} : memref<1x14x128xf32, #tpu.memory_space<vmem>>, vector<1x14x128xf32>,
    return
  }
  func.func @transform_0(%arg0: i32) -> (i32, i32, i32) {
    %c0_i32 = arith.constant 0 : i32
    %c0_i32_0 = arith.constant 0 : i32
    %c0_i32_1 = arith.constant 0 : i32
    return %arg0, %c0_i32, %c0_i32_0 : i32, i32, i32
  }
  func.func @transform_1(%arg0: i32) -> (i32, i32) {
    %c0_i32 = arith.constant 0 : i32
    %c0_i32_0 = arith.constant 0 : i32
    %c0_i32_1 = arith.constant 0 : i32
    return %c0_i32, %c0_i32_0 : i32, i32
  }
  func.func @transform_2(%arg0: i32) -> (i32, i32) {
    %c0_i32 = arith.constant 0 : i32
    %c0_i32_0 = arith.constant 0 : i32
    %c0_i32_1 = arith.constant 0 : i32
    return %c0_i32, %c0_i32_0 : i32, i32
  }
  func.func @transform_3(%arg0: i32) -> (i32, i32) {
    %c0_i32 = arith.constant 0 : i32
    %c0_i32_0 = arith.constant 0 : i32
    %c0_i32_1 = arith.constant 0 : i32
    return %c0_i32, %c0_i32_0 : i32, i32
  }
  func.func @transform_4(%arg0: i32) -> (i32, i32) {
    %c0_i32 = arith.constant 0 : i32
    %c0_i32_0 = arith.constant 0 : i32
    %c0_i32_1 = arith.constant 0 : i32
    return %c0_i32, %c0_i32_0 : i32, i32
  }
  func.func @transform_5(%arg0: i32) -> (i32, i32) {
    %c0_i32 = arith.constant 0 : i32
    %c0_i32_0 = arith.constant 0 : i32
    %c0_i32_1 = arith.constant 0 : i32
    return %c0_i32, %c0_i32_0 : i32, i32
  }
  func.func @transform_6(%arg0: i32) -> (i32, i32) {
    %c0_i32 = arith.constant 0 : i32
    %c0_i32_0 = arith.constant 0 : i32
    %c0_i32_1 = arith.constant 0 : i32
    return %c0_i32, %c0_i32_0 : i32, i32
  }
  func.func @transform_7(%arg0: i32) -> (i32, i32) {
    %c0_i32 = arith.constant 0 : i32
    %c0_i32_0 = arith.constant 0 : i32
    %c0_i32_1 = arith.constant 0 : i32
    return %c0_i32, %c0_i32_0 : i32, i32
  }
  func.func @transform_8(%arg0: i32) -> (i32, i32) {
    %c0_i32 = arith.constant 0 : i32
    %c0_i32_0 = arith.constant 0 : i32
    %c0_i32_1 = arith.constant 0 : i32
    return %c0_i32, %c0_i32_0 : i32, i32
  }
  func.func @transform_9(%arg0: i32) -> (i32, i32) {
    %c0_i32 = arith.constant 0 : i32
    %c0_i32_0 = arith.constant 0 : i32
    %c0_i32_1 = arith.constant 0 : i32
    return %c0_i32, %c0_i32_0 : i32, i32
  }
  func.func @transform_10(%arg0: i32) -> (i32, i32) {
    %c0_i32 = arith.constant 0 : i32
    %c0_i32_0 = arith.constant 0 : i32
    %c0_i32_1 = arith.constant 0 : i32
    return %c0_i32, %c0_i32_0 : i32, i32
  }
  func.func @transform_11(%arg0: i32) -> (i32, i32) {
    %c0_i32 = arith.constant 0 : i32
    %c0_i32_0 = arith.constant 0 : i32
    %c0_i32_1 = arith.constant 0 : i32
    return %c0_i32, %c0_i32_0 : i32, i32
  }
  func.func @transform_12(%arg0: i32) -> (i32, i32) {
    %c0_i32 = arith.constant 0 : i32
    %c0_i32_0 = arith.constant 0 : i32
    %c0_i32_1 = arith.constant 0 : i32
    return %c0_i32, %c0_i32_0 : i32, i32
  }
  func.func @transform_13(%arg0: i32) -> (i32, i32) {
    %c0_i32 = arith.constant 0 : i32
    %c0_i32_0 = arith.constant 0 : i32
    %c0_i32_1 = arith.constant 0 : i32
    return %c0_i32, %c0_i32_0 : i32, i32
  }
  func.func @transform_14(%arg0: i32) -> (i32, i32) {
    %c0_i32 = arith.constant 0 : i32
    %c0_i32_0 = arith.constant 0 : i32
    %c0_i32_1 = arith.constant 0 : i32
    return %c0_i32, %c0_i32_0 : i32, i32
  }
  func.func @transform_15(%arg0: i32) -> (i32, i32) {
    %c0_i32 = arith.constant 0 : i32
    %c0_i32_0 = arith.constant 0 : i32
    %c0_i32_1 = arith.constant 0 : i32
    return %c0_i32, %c0_i32_0 : i32, i32
  }
  func.func @transform_16(%arg0: i32) -> (i32, i32) {
    %c0_i32 = arith.constant 0 : i32
    %c0_i32_0 = arith.constant 0 : i32
    %c0_i32_1 = arith.constant 0 : i32
    return %c0_i32, %c0_i32_0 : i32, i32
  }
  func.func @transform_17(%arg0: i32) -> (i32, i32) {
    %c0_i32 = arith.constant 0 : i32
    %c0_i32_0 = arith.constant 0 : i32
    %c0_i32_1 = arith.constant 0 : i32
    return %c0_i32, %c0_i32_0 : i32, i32
  }
  func.func @transform_18(%arg0: i32) -> (i32, i32) {
    %c0_i32 = arith.constant 0 : i32
    %c0_i32_0 = arith.constant 0 : i32
    %c0_i32_1 = arith.constant 0 : i32
    return %c0_i32, %c0_i32_0 : i32, i32
  }
  func.func @transform_19(%arg0: i32) -> (i32, i32) {
    %c0_i32 = arith.constant 0 : i32
    %c0_i32_0 = arith.constant 0 : i32
    %c0_i32_1 = arith.constant 0 : i32
    return %c0_i32, %c0_i32_0 : i32, i32
  }
  func.func @transform_20(%arg0: i32) -> (i32, i32) {
    %c0_i32 = arith.constant 0 : i32
    %c0_i32_0 = arith.constant 0 : i32
    %c0_i32_1 = arith.constant 0 : i32
    return %c0_i32, %c0_i32_0 : i32, i32
  }
  func.func @transform_21(%arg0: i32) -> (i32, i32) {
    %c0_i32 = arith.constant 0 : i32
    %c0_i32_0 = arith.constant 0 : i32
    %c0_i32_1 = arith.constant 0 : i32
    return %c0_i32, %c0_i32_0 : i32, i32
  }
  func.func @transform_22(%arg0: i32) -> (i32, i32) {
    %c0_i32 = arith.constant 0 : i32
    %c0_i32_0 = arith.constant 0 : i32
    %c0_i32_1 = arith.constant 0 : i32
    return %c0_i32, %c0_i32_0 : i32, i32
  }
  func.func @transform_23(%arg0: i32) -> (i32, i32) {
    %c0_i32 = arith.constant 0 : i32
    %c0_i32_0 = arith.constant 0 : i32
    %c0_i32_1 = arith.constant 0 : i32
    return %c0_i32, %c0_i32_0 : i32, i32
  }
  func.func @transform_24(%arg0: i32) -> (i32, i32) {
    %c0_i32 = arith.constant 0 : i32
    %c0_i32_0 = arith.constant 0 : i32
    %c0_i32_1 = arith.constant 0 : i32
    return %c0_i32, %c0_i32_0 : i32, i32
  }
  func.func @transform_25(%arg0: i32) -> (i32, i32) {
    %c0_i32 = arith.constant 0 : i32
    %c0_i32_0 = arith.constant 0 : i32
    %c0_i32_1 = arith.constant 0 : i32
    return %c0_i32, %c0_i32_0 : i32, i32
  }
  func.func @transform_26(%arg0: i32) -> (i32, i32) {
    %c0_i32 = arith.constant 0 : i32
    %c0_i32_0 = arith.constant 0 : i32
    %c0_i32_1 = arith.constant 0 : i32
    return %c0_i32, %c0_i32_0 : i32, i32
  }
  func.func @transform_27(%arg0: i32) -> (i32, i32) {
    %c0_i32 = arith.constant 0 : i32
    %c0_i32_0 = arith.constant 0 : i32
    %c0_i32_1 = arith.constant 0 : i32
    return %c0_i32, %c0_i32_0 : i32, i32
  }
  func.func @transform_28(%arg0: i32) -> (i32, i32, i32) {
    %c0_i32 = arith.constant 0 : i32
    %c0_i32_0 = arith.constant 0 : i32
    %c0_i32_1 = arith.constant 0 : i32
    return %arg0, %c0_i32, %c0_i32_0 : i32, i32, i32
  }
}

</mosaic_0001>

<bundles_post_ra>
// kernel: ae_forward.1
= control target key start
LH: loop header
LB: loop body
LE: loop exit
PB: predicated region body
PF: predicated region fallthrough
CT: control target
= control target key end

     0   :  { %s7227_s0 = inlined_call_operand.vmem [shape: f32[2,16,128], index: 0, kind: input, shape index: {}]   ;;  %s7228_s1 = inlined_call_operand.hbm [shape: bf16[128,128], index: 1, kind: input, shape index: {}]   ;;  %s7229_s2 = inlined_call_operand.hbm [shape: bf16[128,128], index: 2, kind: input, shape index: {}]   ;;  %s7230_s3 = inlined_call_operand.hbm [shape: f32[1,128], index: 3, kind: input, shape index: {}]   ;;  %s7231_s4 = inlined_call_operand.vmem [shape: bf16[128,64], index: 4, kind: input, shape index: {}]   ;;  %s7232_s5 = inlined_call_operand.vmem [shape: bf16[128,64], index: 5, kind: input, shape index: {}]   ;;  %s7233_s6 = inlined_call_operand.hbm [shape: f32[1,64], index: 6, kind: input, shape index: {}]   ;;  %s7234_s7 = inlined_call_operand.vmem [shape: bf16[64,32], index: 7, kind: input, shape index: {}]   ;;  %s7235_s8 = inlined_call_operand.vmem [shape: bf16[64,32], index: 8, kind: input, shape index: {}]   ;;  %s7236_s9 = inlined_call_operand.hbm [shape: f32[1,32], index: 9, kind: input, shape index: {}]   ;;  %s7237_s10 = inlined_call_operand.vmem [shape: f32[32,112], index: 10, kind: input, shape index: {}]   ;;  %s7238_s11 = inlined_call_operand.hbm [shape: f32[14,112], index: 11, kind: input, shape index: {}]   ;;  %s7239_s12 = inlined_call_operand.vmem [shape: f32[112,8], index: 12, kind: input, shape index: {}]   ;;  %s7240_s13 = inlined_call_operand.hbm [shape: f32[1,8], index: 13, kind: input, shape index: {}]   ;;  %s7241_s14 = inlined_call_operand.hbm [shape: f32[8,112], index: 14, kind: input, shape index: {}]   ;;  %s7242_s15 = inlined_call_operand.vmem [shape: f32[112,32], index: 15, kind: input, shape index: {}]   ;;  %s7243_s16 = inlined_call_operand.hbm [shape: f32[14,32], index: 16, kind: input, shape index: {}]   ;;  %s7244_s17 = inlined_call_operand.hbm [shape: bf16[32,128], index: 17, kind: input, shape index: {}]   ;;  %s7245_s18 = inlined_call_operand.hbm [shape: bf16[32,128], index: 18, kind: input, shape index: {}]   ;;  %s7246_s19 = inlined_call_operand.hbm [shape: f32[1,128], index: 19, kind: input, shape index: {}]   ;;  %s7247_s20 = inlined_call_operand.hbm [shape: bf16[128,256], index: 20, kind: input, shape index: {}]   ;;  %s7248_s21 = inlined_call_operand.hbm [shape: bf16[128,256], index: 21, kind: input, shape index: {}]   ;;  %s7249_s22 = inlined_call_operand.vmem [shape: f32[1,256], index: 22, kind: input, shape index: {}]   ;;  %s7250_s23 = inlined_call_operand.vmem [shape: bf16[256,512], index: 23, kind: input, shape index: {}]   ;;  %s7251_s24 = inlined_call_operand.hbm [shape: bf16[256,512], index: 24, kind: input, shape index: {}]   ;;  %s7252_s25 = inlined_call_operand.hbm [shape: f32[1,512], index: 25, kind: input, shape index: {}]   ;;  %s7253_s26 = inlined_call_operand.vmem [shape: bf16[512,128], index: 26, kind: input, shape index: {}]   ;;  %s7254_s27 = inlined_call_operand.hbm [shape: f32[1,128], index: 27, kind: input, shape index: {}]   ;;  %s7255_s28 = inlined_call_operand.vmem [shape: f32[2,14,128], index: 28, kind: output, shape index: {}]  }
   0x1   :  { %7286 = sst [smem:[#allocation43_spill]] %s7227_s0 }
   0x2   :  { %7287 = sst [smem:[#allocation44_spill]] %s7228_s1 }
   0x3   :  { %7288 = sst [smem:[#allocation45_spill]] %s7229_s2 }
   0x4   :  { %7289 = sst [smem:[#allocation46_spill]] %s7230_s3 }
   0x5   :  { %7290 = sst [smem:[#allocation47_spill]] %s7231_s4 }
   0x6   :  { %7291 = sst [smem:[#allocation48_spill]] %s7232_s5 }
   0x7   :  { %7292 = sst [smem:[#allocation49_spill]] %s7233_s6 }
   0x8   :  { %7293 = sst [smem:[#allocation50_spill]] %s7234_s7 }
   0x9   :  { %7294 = sst [smem:[#allocation51_spill]] %s7235_s8 }
   0xa   :  { %7295 = sst [smem:[#allocation52_spill]] %s7236_s9 }
   0xb   :  { %7296 = sst [smem:[#allocation53_spill]] %s7237_s10 }
   0xc   :  { %7297 = sst [smem:[#allocation54_spill]] %s7238_s11 }
   0xd   :  { %7298 = sst [smem:[#allocation55_spill]] %s7239_s12 }
   0xe   :  { %7299 = sst [smem:[#allocation56_spill]] %s7241_s14 }
   0xf   :  { %7300 = sst [smem:[#allocation57_spill]] %s7242_s15 }
  0x10   :  { %7301 = sst [smem:[#allocation58_spill]] %s7244_s17 }
  0x11   :  { %7302 = sst [smem:[#allocation59_spill]] %s7246_s19 }
  0x12   :  { %7303 = sst [smem:[#allocation60_spill]] %s7249_s22 }
  0x13   :  { %7304 = sst [smem:[#allocation61_spill]] %s7250_s23 }
  0x14   :  { %7305 = sst [smem:[#allocation62_spill]] %s7253_s26 }
  0x15   :  { %7306 = sst [smem:[#allocation63_spill]] %s7255_s28 }
  0x16   :  { %33 = vsyncpa [#allocation8], 0 }
  0x17   :  { %34 = vsyncpa [#allocation10], 0 }
  0x18   :  { %35 = vsyncpa [#allocation13], 0 }
  0x19   :  { %36 = vsyncpa [#allocation16], 0 }
  0x1a   :  { %37 = vsyncpa [#allocation19], 0 }
  0x1b   :  { %38 = vsyncpa [#allocation22], 0 }
  0x1c   :  { %39 = vsyncpa [#allocation25], 0 }
  0x1d   :  { %40 = vsyncpa [#allocation28], 0 }
  0x1e   :  { %41 = vsyncpa [#allocation31], 0  ;;  %s6151_s8 = smov 0  }
  0x1f LB: > { %7307 = sst [smem:[#allocation42_spill]] %s5975_s8  ;;  %s6157_s5 = sadd.s32 4294967295, %s5975_s8   ;;  %s5975_s8 = sphi %s6151_s8, %s47_s8  }
  0x20   : > { %p4233_p0 = scmp.ge.s32.totalorder %s5975_s8, 1  ;;  %p671_p1 = scmp.lt.s32.totalorder %s5975_s8, 3 }
  0x21   : > { %p7277_p2 = scmp.eq.s32.totalorder %s6157_s5, 0  ;;  %s5977_s30 = smov [#allocation9]  }
  0x22   : > { %p6162_p3 = pnand %p4233_p0, %p671_p1  ;;  %s696_s3 = sshll.u32 %s5977_s30, 4  ;;  %s6166_s3 = int_to_ptr.vmem [resolvable:$true] %s696_s3 }
  0x23   : > { %s5978_s6 = smov [#allocation12]   ;;  %s5979_s11 = smov [#allocation15]  }
  0x24   : > { %s7308_s9 = scalar_select %p6162_p3, 1, 0 }
  0x25   : > { %p5017_p4 = pneg %p6162_p3  ;;  %s727_s10 = sshll.u32 %s5978_s6, 4  ;;  %s6170_s10 = int_to_ptr.vmem [resolvable:$true] %s727_s10 }
  0x26   : > { %s757_s29 = sshll.u32 %s5979_s11, 4  ;;  %s7310_s12 = sld [smem:[#allocation45_spill]]  ;;  %s6178_s29 = int_to_ptr.vmem [resolvable:$true] %s757_s29 }
  0x27   : > { %p6174_p5 = pnand %p7277_p2, %p5017_p4 }
  0x29   : > { %p6188_p7 = pneg %p6174_p5 }
  0x2c   : > { %s5457_s1 = scalar_lea.hbm %s7310_s12, 1024 }
  0x2d   : > { %p5458_p6 = scmp.ne.s32.totalorder %s7310_s12, %s5457_s1  ;;  %p5464_p10 = scmp.lt.u32.totalorder %s5457_s1, %s7310_s12 }
  0x2f   : > { %p5460_p8 = pnand %p6188_p7, %p5458_p6 }
  0x31   : > { %p5461_p9 = pneg %p5460_p8 }
  0x33   : > { %p5466_p11 = pnand %p5464_p10, %p5461_p9 }
  0x35   : > { %5469 = shalt.err (!%p5466_p11)
}
  0x36   : > { %s5470_s2 = scalar_lea.vmem %s6166_s3, 1024  ;;  %p5478_p1 = scmp.lt.s32.totalorder %s6166_s3, %s6166_s3 }
  0x37   : > { %p5471_p12 = scmp.ne.s32.totalorder %s6166_s3, %s5470_s2  ;;  %p5479_p4 = scmp.lt.s32.totalorder %s5470_s2, %s5470_s2 }
  0x39   : > { %p5473_p13 = pnand %p5471_p12, %p6188_p7  ;;  %p5480_p6 = por %p5479_p4, %p5478_p1 }
  0x3b   : > { %p5474_p0 = pneg %p5473_p13 }
  0x3d   : > { %p5481_p8 = pnand %p5480_p6, %p5474_p0 }
  0x3f   : > { %5484 = shalt.err (!%p5481_p8)
}
  0x40   : > { %s7272_s7 = smov 64   ;;  %s7274_s8 = smov 4  }
  0x41   : > { %5023 = dma.hbm_to_vmem [thread:$0]  (!%p6174_p5), %s7310_s12, 1024, %s6166_s3, [#allocation10], %s7272_s7, %s7272_s7, %s7274_s8  }
  0x42   : > { %s7312_s28 = sld [smem:[#allocation49_spill]] }
  0x48   : > { %s5485_s2 = scalar_lea.hbm %s7312_s28, 16 }
  0x49   : > { %p5486_p9 = scmp.ne.s32.totalorder %s7312_s28, %s5485_s2  ;;  %p5492_p12 = scmp.lt.u32.totalorder %s5485_s2, %s7312_s28 }
  0x4b   : > { %p5488_p10 = pnand %p5486_p9, %p6188_p7 }
  0x4d   : > { %p5489_p11 = pneg %p5488_p10 }
  0x4f   : > { %p5494_p13 = pnand %p5492_p12, %p5489_p11 }
  0x51   : > { %5497 = shalt.err (!%p5494_p13)
}
  0x52   : > { %s5498_s3 = scalar_lea.vmem %s6170_s10, 16  ;;  %s5505_s22 = scalar_lea.vmem %s6170_s10, 32 }
  0x53   : > { %p5499_p0 = scmp.ne.s32.totalorder %s6170_s10, %s5498_s3  ;;  %p5506_p6 = scmp.lt.s32.totalorder %s6170_s10, %s6170_s10 }
  0x54   : > { %p5507_p8 = scmp.lt.s32.totalorder %s5505_s22, %s5498_s3 }
  0x55   : > { %p5501_p1 = pnand %p5499_p0, %p6188_p7 }
  0x56   : > { %p5508_p9 = por %p5507_p8, %p5506_p6 }
  0x57   : > { %p5502_p4 = pneg %p5501_p1 }
  0x59   : > { %p5509_p10 = pnand %p5508_p9, %p5502_p4 }
  0x5b   : > { %5512 = shalt.err (!%p5509_p10)
}
  0x5c   : > { %5029 = dma.hbm_to_vmem [thread:$0]  (!%p6174_p5), %s7312_s28, 16, %s6170_s10, [#allocation13]  }
  0x5d   : > { %s7313_s4 = sld [smem:[#allocation54_spill]] }
  0x63   : > { %s5513_s30 = scalar_lea.hbm %s7313_s4, 256 }
  0x64   : > { %p5514_p11 = scmp.ne.s32.totalorder %s7313_s4, %s5513_s30  ;;  %p5520_p0 = scmp.lt.u32.totalorder %s5513_s30, %s7313_s4 }
  0x66   : > { %p5516_p12 = pnand %p5514_p11, %p6188_p7 }
  0x68   : > { %p5517_p13 = pneg %p5516_p12 }
  0x6a   : > { %p5522_p1 = pnand %p5520_p0, %p5517_p13 }
  0x6c   : > { %5525 = shalt.err (!%p5522_p1)
}
  0x6d   : > { %s5526_s10 = scalar_lea.vmem %s6178_s29, 256  ;;  %p5534_p9 = scmp.lt.s32.totalorder %s6178_s29, %s6178_s29 }
  0x6e   : > { %p5527_p4 = scmp.ne.s32.totalorder %s6178_s29, %s5526_s10  ;;  %p5535_p10 = scmp.lt.s32.totalorder %s5526_s10, %s5526_s10 }
  0x70   : > { %p5529_p6 = pnand %p5527_p4, %p6188_p7  ;;  %p5536_p11 = por %p5535_p10, %p5534_p9 }
  0x72   : > { %p5530_p8 = pneg %p5529_p6 }
  0x74   : > { %p5537_p12 = pnand %p5536_p11, %p5530_p8 }
  0x76   : > { %5540 = shalt.err (!%p5537_p12)
}
  0x77   : > { %s7279_s15 = smov 128   ;;  %s7281_s23 = smov 8  }
  0x78   : > { %5035 = dma.hbm_to_vmem [thread:$0]  (!%p6174_p5), %s7313_s4, 256, %s6178_s29, [#allocation16], %s7279_s15, %s7279_s15, %s7281_s23  }
  0x79   : > { %s5984_s30 = smov [#allocation18]   ;;  %s5985_s2 = smov [#allocation21]  }
  0x7a   : > { %s785_s11 = sshll.u32 %s5984_s30, 4  ;;  %s811_s3 = sshll.u32 %s5985_s2, 4  ;;  %s786_s11 = int_to_ptr.vmem [resolvable:$true] %s785_s11  ;;  %s6262_s3 = int_to_ptr.vmem [resolvable:$true] %s811_s3 }
  0x7b   : > { %s7314_s14 = sld [smem:[#allocation56_spill]] }
  0x81   : > { %s5541_s7 = scalar_lea.hbm %s7314_s14, 128 }
  0x82   : > { %p5542_p13 = scmp.ne.s32.totalorder %s7314_s14, %s5541_s7  ;;  %p5548_p4 = scmp.lt.u32.totalorder %s5541_s7, %s7314_s14 }
  0x84   : > { %p5544_p0 = pnand %p5542_p13, %p6188_p7 }
  0x86   : > { %p5545_p1 = pneg %p5544_p0 }
  0x88   : > { %p5550_p6 = pnand %p5548_p4, %p5545_p1 }
  0x8a   : > { %5553 = shalt.err (!%p5550_p6)
}
  0x8b   : > { %s5554_s1 = scalar_lea.vmem %s786_s11, 128  ;;  %p5562_p11 = scmp.lt.s32.totalorder %s786_s11, %s786_s11 }
  0x8c   : > { %p5555_p8 = scmp.ne.s32.totalorder %s786_s11, %s5554_s1  ;;  %p5563_p12 = scmp.lt.s32.totalorder %s5554_s1, %s5554_s1 }
  0x8e   : > { %p5557_p9 = pnand %p5555_p8, %p6188_p7  ;;  %p5564_p2 = por %p5563_p12, %p5562_p11 }
  0x90   : > { %p5558_p10 = pneg %p5557_p9 }
  0x92   : > { %p5565_p3 = pnand %p5564_p2, %p5558_p10 }
  0x94   : > { %5568 = shalt.err (!%p5565_p3)
}
  0x95   : > { %5041 = dma.hbm_to_vmem [thread:$0]  (!%p6174_p5), %s7314_s14, 128, %s786_s11, [#allocation19]  }
  0x96   : > { %s7315_s17 = sld [smem:[#allocation58_spill]] }
  0x9c   : > { %s5569_s2 = scalar_lea.hbm %s7315_s17, 256 }
  0x9d   : > { %p5570_p13 = scmp.ne.s32.totalorder %s7315_s17, %s5569_s2  ;;  %p5576_p2 = scmp.lt.u32.totalorder %s5569_s2, %s7315_s17 }
  0x9f   : > { %p5572_p0 = pnand %p5570_p13, %p6188_p7 }
  0xa1   : > { %p5573_p1 = pneg %p5572_p0 }
  0xa3   : > { %p5578_p3 = pnand %p5576_p2, %p5573_p1 }
  0xa5   : > { %5581 = shalt.err (!%p5578_p3)
}
  0xa6   : > { %s5582_s11 = scalar_lea.vmem %s6262_s3, 256  ;;  %p5590_p9 = scmp.lt.s32.totalorder %s6262_s3, %s6262_s3 }
  0xa7   : > { %p5583_p4 = scmp.ne.s32.totalorder %s6262_s3, %s5582_s11  ;;  %p5591_p10 = scmp.lt.s32.totalorder %s5582_s11, %s5582_s11 }
  0xa9   : > { %p5585_p6 = pnand %p5583_p4, %p6188_p7  ;;  %p5592_p11 = por %p5591_p10, %p5590_p9 }
  0xab   : > { %p5586_p8 = pneg %p5585_p6 }
  0xad   : > { %p5593_p12 = pnand %p5592_p11, %p5586_p8 }
  0xaf   : > { %5596 = shalt.err (!%p5593_p12)
}
  0xb0   : > { %s7316_s1 = smov 4   ;;  %s7317_s12 = smov 64  }
  0xb1   : > { %5047 = dma.hbm_to_vmem [thread:$0]  (!%p6174_p5), %s7315_s17, 256, %s6262_s3, [#allocation22], %s7317_s12, %s7317_s12, %s7316_s1  }
  0xb2   : > { %s5986_s30 = smov [#allocation24]   ;;  %s5987_s22 = smov [#allocation27]  }
  0xb3   : > { %s838_s2 = sshll.u32 %s5986_s30, 4  ;;  %s861_s10 = sshll.u32 %s5987_s22, 4  ;;  %s839_s2 = int_to_ptr.vmem [resolvable:$true] %s838_s2  ;;  %s6308_s10 = int_to_ptr.vmem [resolvable:$true] %s861_s10 }
  0xb4   : > { %s7318_s19 = sld [smem:[#allocation59_spill]] }
  0xba   : > { %s5597_s11 = scalar_lea.hbm %s7318_s19, 16 }
  0xbb   : > { %p5598_p13 = scmp.ne.s32.totalorder %s7318_s19, %s5597_s11  ;;  %p5604_p2 = scmp.lt.u32.totalorder %s5597_s11, %s7318_s19 }
  0xbd   : > { %p5600_p0 = pnand %p5598_p13, %p6188_p7 }
  0xbf   : > { %p5601_p1 = pneg %p5600_p0 }
  0xc1   : > { %p5606_p3 = pnand %p5604_p2, %p5601_p1 }
  0xc3   : > { %5609 = shalt.err (!%p5606_p3)
}
  0xc4   : > { %s5610_s7 = scalar_lea.vmem %s839_s2, 16  ;;  %s5617_s30 = scalar_lea.vmem %s839_s2, 32 }
  0xc5   : > { %p5611_p4 = scmp.ne.s32.totalorder %s839_s2, %s5610_s7  ;;  %p5618_p9 = scmp.lt.s32.totalorder %s839_s2, %s839_s2 }
  0xc6   : > { %p5619_p10 = scmp.lt.s32.totalorder %s5617_s30, %s5610_s7 }
  0xc7   : > { %p5613_p6 = pnand %p5611_p4, %p6188_p7 }
  0xc8   : > { %p5620_p11 = por %p5619_p10, %p5618_p9 }
  0xc9   : > { %p5614_p8 = pneg %p5613_p6 }
  0xcb   : > { %p5621_p12 = pnand %p5620_p11, %p5614_p8 }
  0xcd   : > { %5624 = shalt.err (!%p5621_p12)
}
  0xce   : > { %5053 = dma.hbm_to_vmem [thread:$0]  (!%p6174_p5), %s7318_s19, 16, %s839_s2, [#allocation25]  }
  0xcf   : > { %s5625_s29 = scalar_lea.hbm %s7248_s21, 2048 }
  0xd0   : > { %p5626_p13 = scmp.ne.s32.totalorder %s7248_s21, %s5625_s29  ;;  %p5632_p2 = scmp.lt.u32.totalorder %s5625_s29, %s7248_s21 }
  0xd2   : > { %p5628_p0 = pnand %p5626_p13, %p6188_p7 }
  0xd4   : > { %p5629_p1 = pneg %p5628_p0 }
  0xd6   : > { %p5634_p3 = pnand %p5632_p2, %p5629_p1 }
  0xd8   : > { %5637 = shalt.err (!%p5634_p3)
}
  0xd9   : > { %s5638_s2 = scalar_lea.vmem %s6308_s10, 2048  ;;  %p5646_p9 = scmp.lt.s32.totalorder %s6308_s10, %s6308_s10 }
  0xda   : > { %p5639_p4 = scmp.ne.s32.totalorder %s6308_s10, %s5638_s2  ;;  %p5647_p10 = scmp.lt.s32.totalorder %s5638_s2, %s5638_s2 }
  0xdc   : > { %p5641_p6 = pnand %p5639_p4, %p6188_p7  ;;  %p5648_p11 = por %p5647_p10, %p5646_p9 }
  0xde   : > { %p5642_p8 = pneg %p5641_p6 }
  0xe0   : > { %p5649_p12 = pnand %p5648_p11, %p5642_p8 }
  0xe2   : > { %5652 = shalt.err (!%p5649_p12)
}
  0xe3   : > { %s7319_s30 = smov 8   ;;  %s7320_s15 = smov 128  }
  0xe4   : > { %5059 = dma.hbm_to_vmem [thread:$0]  (!%p6174_p5), %s7248_s21, 2048, %s6308_s10, [#allocation28], %s7320_s15, %s7320_s15, %s7319_s30  }
  0xe5   : > { %s5988_s26 = smov [#allocation30]   ;;  %s5989_s11 = smov [#allocation7]  }
  0xe6   : > { %s894_s29 = sshll.u32 %s5988_s26, 4  ;;  %s683_s8 = sshll.u32 %s5989_s11, 4  ;;  %s895_s29 = int_to_ptr.vmem [resolvable:$true] %s894_s29  ;;  %s6354_s8 = int_to_ptr.vmem [resolvable:$true] %s683_s8 }
  0xe7   : > { %s5653_s2 = scalar_lea.hbm %s7252_s25, 64 }
  0xe8   : > { %p5654_p13 = scmp.ne.s32.totalorder %s7252_s25, %s5653_s2  ;;  %p5660_p2 = scmp.lt.u32.totalorder %s5653_s2, %s7252_s25 }
  0xea   : > { %p5656_p0 = pnand %p5654_p13, %p6188_p7 }
  0xec   : > { %p5657_p1 = pneg %p5656_p0 }
  0xee   : > { %p5662_p3 = pnand %p5660_p2, %p5657_p1 }
  0xf0   : > { %5665 = shalt.err (!%p5662_p3)
}
  0xf1   : > { %s5666_s22 = scalar_lea.vmem %s895_s29, 64  ;;  %p5674_p9 = scmp.lt.s32.totalorder %s895_s29, %s895_s29 }
  0xf2   : > { %p5667_p4 = scmp.ne.s32.totalorder %s895_s29, %s5666_s22  ;;  %p5675_p10 = scmp.lt.s32.totalorder %s5666_s22, %s5666_s22 }
  0xf4   : > { %p5669_p6 = pnand %p5667_p4, %p6188_p7  ;;  %p5676_p11 = por %p5675_p10, %p5674_p9 }
  0xf6   : > { %p5670_p8 = pneg %p5669_p6 }
  0xf8   : > { %p5677_p12 = pnand %p5676_p11, %p5670_p8 }
  0xfa   : > { %5680 = shalt.err (!%p5677_p12)
}
  0xfb   : > { %5065 = dma.hbm_to_vmem [thread:$0]  (!%p6174_p5), %s7252_s25, 64, %s895_s29, [#allocation31]  }
  0xfc   : > { %s7321_s3 = sld [smem:[#allocation44_spill]] }
 0x102   : > { %s5681_s7 = scalar_lea.hbm %s7321_s3, 1024 }
 0x103   : > { %p5682_p13 = scmp.ne.s32.totalorder %s7321_s3, %s5681_s7  ;;  %p5688_p2 = scmp.lt.u32.totalorder %s5681_s7, %s7321_s3 }
 0x105   : > { %p5684_p0 = pnand %p5682_p13, %p6188_p7 }
 0x107   : > { %p5685_p1 = pneg %p5684_p0 }
 0x109   : > { %p5690_p3 = pnand %p5688_p2, %p5685_p1 }
 0x10b   : > { %5693 = shalt.err (!%p5690_p3)
}
 0x10c   : > { %s5694_s29 = scalar_lea.vmem %s6354_s8, 1024  ;;  %p5702_p9 = scmp.lt.s32.totalorder %s6354_s8, %s6354_s8 }
 0x10d   : > { %p5695_p4 = scmp.ne.s32.totalorder %s6354_s8, %s5694_s29  ;;  %p5703_p10 = scmp.lt.s32.totalorder %s5694_s29, %s5694_s29 }
 0x10f   : > { %p5697_p6 = pnand %p5695_p4, %p6188_p7  ;;  %p5704_p11 = por %p5703_p10, %p5702_p9 }
 0x111   : > { %p5698_p8 = pneg %p5697_p6 }
 0x113   : > { %p5705_p12 = pnand %p5704_p11, %p5698_p8 }
 0x115   : > { %5708 = shalt.err (!%p5705_p12)
}
 0x116   : > { %5020 = dma.hbm_to_vmem [thread:$0]  (!%p6174_p5), %s7321_s3, 1024, %s6354_s8, [#allocation8], %s7317_s12, %s7317_s12, %s7316_s1  }
 0x117   : > { %s5990_s26 = smov [#allocation11]   ;;  %s5991_s7 = smov [#allocation14]  }
 0x118   : > { %s710_s11 = sshll.u32 %s5990_s26, 4  ;;  %s744_s2 = sshll.u32 %s5991_s7, 4  ;;  %s711_s11 = int_to_ptr.vmem [resolvable:$true] %s710_s11  ;;  %s6400_s2 = int_to_ptr.vmem [resolvable:$true] %s744_s2 }
 0x119   : > { %s7322_s22 = sld [smem:[#allocation46_spill]] }
 0x11f   : > { %s5709_s29 = scalar_lea.hbm %s7322_s22, 16 }
 0x120   : > { %p5710_p13 = scmp.ne.s32.totalorder %s7322_s22, %s5709_s29  ;;  %p5716_p2 = scmp.lt.u32.totalorder %s5709_s29, %s7322_s22 }
 0x122   : > { %p5712_p0 = pnand %p5710_p13, %p6188_p7 }
 0x124   : > { %p5713_p1 = pneg %p5712_p0 }
 0x126   : > { %p5718_p3 = pnand %p5716_p2, %p5713_p1 }
 0x128   : > { %5721 = shalt.err (!%p5718_p3)
}
 0x129   : > { %s5722_s4 = scalar_lea.vmem %s711_s11, 16  ;;  %s5729_s26 = scalar_lea.vmem %s711_s11, 32 }
 0x12a   : > { %p5723_p4 = scmp.ne.s32.totalorder %s711_s11, %s5722_s4  ;;  %p5730_p9 = scmp.lt.s32.totalorder %s711_s11, %s711_s11 }
 0x12b   : > { %p5731_p10 = scmp.lt.s32.totalorder %s5729_s26, %s5722_s4 }
 0x12c   : > { %p5725_p6 = pnand %p5723_p4, %p6188_p7 }
 0x12d   : > { %p5732_p11 = por %p5731_p10, %p5730_p9 }
 0x12e   : > { %p5726_p8 = pneg %p5725_p6 }
 0x130   : > { %p5733_p12 = pnand %p5732_p11, %p5726_p8 }
 0x132   : > { %5736 = shalt.err (!%p5733_p12)
}
 0x133   : > { %5026 = dma.hbm_to_vmem [thread:$0]  (!%p6174_p5), %s7322_s22, 16, %s711_s11, [#allocation10]  }
 0x134   : > { %s7323_s10 = sld [smem:[#allocation52_spill]] }
 0x13a   : > { %s5737_s29 = scalar_lea.hbm %s7323_s10, 16 }
 0x13b   : > { %p5738_p13 = scmp.ne.s32.totalorder %s7323_s10, %s5737_s29  ;;  %p5744_p2 = scmp.lt.u32.totalorder %s5737_s29, %s7323_s10 }
 0x13d   : > { %p5740_p0 = pnand %p5738_p13, %p6188_p7 }
 0x13f   : > { %p5741_p1 = pneg %p5740_p0 }
 0x141   : > { %p5746_p3 = pnand %p5744_p2, %p5741_p1 }
 0x143   : > { %5749 = shalt.err (!%p5746_p3)
}
 0x144   : > { %s5750_s11 = scalar_lea.vmem %s6400_s2, 16  ;;  %s5757_s17 = scalar_lea.vmem %s6400_s2, 32 }
 0x145   : > { %p5751_p4 = scmp.ne.s32.totalorder %s6400_s2, %s5750_s11  ;;  %p5758_p9 = scmp.lt.s32.totalorder %s6400_s2, %s6400_s2 }
 0x146   : > { %p5759_p10 = scmp.lt.s32.totalorder %s5757_s17, %s5750_s11 }
 0x147   : > { %p5753_p6 = pnand %p5751_p4, %p6188_p7 }
 0x148   : > { %p5760_p11 = por %p5759_p10, %p5758_p9 }
 0x149   : > { %p5754_p8 = pneg %p5753_p6 }
 0x14b   : > { %p5761_p12 = pnand %p5760_p11, %p5754_p8 }
 0x14d   : > { %5764 = shalt.err (!%p5761_p12)
}
 0x14e   : > { %5032 = dma.hbm_to_vmem [thread:$0]  (!%p6174_p5), %s7323_s10, 16, %s6400_s2, [#allocation13]  }
 0x14f   : > { %s5992_s23 = smov [#allocation17]   ;;  %s5993_s14 = smov [#allocation20]  }
 0x150   : > { %s774_s29 = sshll.u32 %s5992_s23, 4  ;;  %s798_s8 = sshll.u32 %s5993_s14, 4  ;;  %s775_s29 = int_to_ptr.vmem [resolvable:$true] %s774_s29  ;;  %s6444_s8 = int_to_ptr.vmem [resolvable:$true] %s798_s8 }
 0x151   : > { %s5765_s11 = scalar_lea.hbm %s7240_s13, 16 }
 0x152   : > { %p5766_p13 = scmp.ne.s32.totalorder %s7240_s13, %s5765_s11  ;;  %p5772_p2 = scmp.lt.u32.totalorder %s5765_s11, %s7240_s13 }
 0x154   : > { %p5768_p0 = pnand %p5766_p13, %p6188_p7 }
 0x156   : > { %p5769_p1 = pneg %p5768_p0 }
 0x158   : > { %p5774_p3 = pnand %p5772_p2, %p5769_p1 }
 0x15a   : > { %5777 = shalt.err (!%p5774_p3)
}
 0x15b   : > { %s5778_s7 = scalar_lea.vmem %s775_s29, 16  ;;  %s5785_s23 = scalar_lea.vmem %s775_s29, 32 }
 0x15c   : > { %p5779_p4 = scmp.ne.s32.totalorder %s775_s29, %s5778_s7  ;;  %p5786_p9 = scmp.lt.s32.totalorder %s775_s29, %s775_s29 }
 0x15d   : > { %p5787_p10 = scmp.lt.s32.totalorder %s5785_s23, %s5778_s7 }
 0x15e   : > { %p5781_p6 = pnand %p5779_p4, %p6188_p7 }
 0x15f   : > { %p5788_p11 = por %p5787_p10, %p5786_p9 }
 0x160   : > { %p5782_p8 = pneg %p5781_p6 }
 0x162   : > { %p5789_p12 = pnand %p5788_p11, %p5782_p8 }
 0x164   : > { %5792 = shalt.err (!%p5789_p12)
}
 0x165   : > { %5038 = dma.hbm_to_vmem [thread:$0]  (!%p6174_p5), %s7240_s13, 16, %s775_s29, [#allocation16]  }
 0x166   : > { %s5793_s11 = scalar_lea.hbm %s7243_s16, 256 }
 0x167   : > { %p5794_p13 = scmp.ne.s32.totalorder %s7243_s16, %s5793_s11  ;;  %p5800_p2 = scmp.lt.u32.totalorder %s5793_s11, %s7243_s16 }
 0x169   : > { %p5796_p0 = pnand %p5794_p13, %p6188_p7 }
 0x16b   : > { %p5797_p1 = pneg %p5796_p0 }
 0x16d   : > { %p5802_p3 = pnand %p5800_p2, %p5797_p1 }
 0x16f   : > { %5805 = shalt.err (!%p5802_p3)
}
 0x170   : > { %s5806_s29 = scalar_lea.vmem %s6444_s8, 256  ;;  %p5814_p9 = scmp.lt.s32.totalorder %s6444_s8, %s6444_s8 }
 0x171   : > { %p5807_p4 = scmp.ne.s32.totalorder %s6444_s8, %s5806_s29  ;;  %p5815_p10 = scmp.lt.s32.totalorder %s5806_s29, %s5806_s29 }
 0x173   : > { %p5809_p6 = pnand %p5807_p4, %p6188_p7  ;;  %p5816_p11 = por %p5815_p10, %p5814_p9 }
 0x175   : > { %p5810_p8 = pneg %p5809_p6 }
 0x177   : > { %p5817_p12 = pnand %p5816_p11, %p5810_p8 }
 0x179   : > { %5820 = shalt.err (!%p5817_p12)
}
 0x17a   : > { %5044 = dma.hbm_to_vmem [thread:$0]  (!%p6174_p5), %s7243_s16, 256, %s6444_s8, [#allocation19], %s7320_s15, %s7320_s15, %s7319_s30  }
 0x17b   : > { %s5994_s14 = smov [#allocation23]   ;;  %s5995_s26 = smov [#allocation26]  }
 0x17c   : > { %s824_s4 = sshll.u32 %s5994_s14, 4  ;;  %s848_s11 = sshll.u32 %s5995_s26, 4  ;;  %s825_s4 = int_to_ptr.vmem [resolvable:$true] %s824_s4  ;;  %s6490_s11 = int_to_ptr.vmem [resolvable:$true] %s848_s11 }
 0x17d   : > { %s5821_s2 = scalar_lea.hbm %s7245_s18, 256 }
 0x17e   : > { %p5822_p13 = scmp.ne.s32.totalorder %s7245_s18, %s5821_s2  ;;  %p5828_p2 = scmp.lt.u32.totalorder %s5821_s2, %s7245_s18 }
 0x180   : > { %p5824_p0 = pnand %p5822_p13, %p6188_p7 }
 0x182   : > { %p5825_p1 = pneg %p5824_p0 }
 0x184   : > { %p5830_p3 = pnand %p5828_p2, %p5825_p1 }
 0x186   : > { %5833 = shalt.err (!%p5830_p3)
}
 0x187   : > { %s5834_s3 = scalar_lea.vmem %s825_s4, 256  ;;  %p5842_p9 = scmp.lt.s32.totalorder %s825_s4, %s825_s4 }
 0x188   : > { %p5835_p4 = scmp.ne.s32.totalorder %s825_s4, %s5834_s3  ;;  %p5843_p10 = scmp.lt.s32.totalorder %s5834_s3, %s5834_s3 }
 0x18a   : > { %p5837_p6 = pnand %p5835_p4, %p6188_p7  ;;  %p5844_p11 = por %p5843_p10, %p5842_p9 }
 0x18c   : > { %p5838_p8 = pneg %p5837_p6 }
 0x18e   : > { %p5845_p12 = pnand %p5844_p11, %p5838_p8 }
 0x190   : > { %5848 = shalt.err (!%p5845_p12)
}
 0x191   : > { %5050 = dma.hbm_to_vmem [thread:$0]  (!%p6174_p5), %s7245_s18, 256, %s825_s4, [#allocation22], %s7317_s12, %s7317_s12, %s7316_s1  }
 0x192   : > { %s5849_s2 = scalar_lea.hbm %s7247_s20, 2048 }
 0x193   : > { %p5850_p13 = scmp.ne.s32.totalorder %s7247_s20, %s5849_s2  ;;  %p5856_p2 = scmp.lt.u32.totalorder %s5849_s2, %s7247_s20 }
 0x195   : > { %p5852_p0 = pnand %p5850_p13, %p6188_p7 }
 0x197   : > { %p5853_p1 = pneg %p5852_p0 }
 0x199   : > { %p5858_p3 = pnand %p5856_p2, %p5853_p1 }
 0x19b   : > { %5861 = shalt.err (!%p5858_p3)
}
 0x19c   : > { %s5862_s1 = scalar_lea.vmem %s6490_s11, 2048  ;;  %p5870_p9 = scmp.lt.s32.totalorder %s6490_s11, %s6490_s11 }
 0x19d   : > { %p5863_p4 = scmp.ne.s32.totalorder %s6490_s11, %s5862_s1  ;;  %p5871_p10 = scmp.lt.s32.totalorder %s5862_s1, %s5862_s1 }
 0x19f   : > { %p5865_p6 = pnand %p5863_p4, %p6188_p7  ;;  %p5872_p11 = por %p5871_p10, %p5870_p9 }
 0x1a1   : > { %p5866_p8 = pneg %p5865_p6 }
 0x1a3   : > { %p5873_p12 = pnand %p5872_p11, %p5866_p8 }
 0x1a5   : > { %5876 = shalt.err (!%p5873_p12)
}
 0x1a6   : > { %5056 = dma.hbm_to_vmem [thread:$0]  (!%p6174_p5), %s7247_s20, 2048, %s6490_s11, [#allocation25], %s7320_s15, %s7320_s15, %s7319_s30  }
 0x1a7   : > { %s5996_s3 = smov [#allocation29]   ;;  %s5877_s19 = scalar_lea.hbm %s7251_s24, 8192 }
 0x1a8   : > { %s880_s14 = sshll.u32 %s5996_s3, 4  ;;  %p5878_p13 = scmp.ne.s32.totalorder %s7251_s24, %s5877_s19  ;;  %s881_s14 = int_to_ptr.vmem [resolvable:$true] %s880_s14 }
 0x1a9   : > { %p5884_p2 = scmp.lt.u32.totalorder %s5877_s19, %s7251_s24 }
 0x1aa   : > { %p5880_p0 = pnand %p5878_p13, %p6188_p7 }
 0x1ac   : > { %p5881_p1 = pneg %p5880_p0 }
 0x1ae   : > { %p5886_p3 = pnand %p5884_p2, %p5881_p1 }
 0x1b0   : > { %5889 = shalt.err (!%p5886_p3)
}
 0x1b1   : > { %s5890_s30 = scalar_lea.vmem %s881_s14, 8192  ;;  %p5898_p9 = scmp.lt.s32.totalorder %s881_s14, %s881_s14 }
 0x1b2   : > { %p5891_p4 = scmp.ne.s32.totalorder %s881_s14, %s5890_s30  ;;  %p5899_p10 = scmp.lt.s32.totalorder %s5890_s30, %s5890_s30 }
 0x1b4   : > { %p5893_p6 = pnand %p5891_p4, %p6188_p7  ;;  %p5900_p11 = por %p5899_p10, %p5898_p9 }
 0x1b6   : > { %p5894_p8 = pneg %p5893_p6 }
 0x1b8   : > { %p5901_p12 = pnand %p5900_p11, %p5894_p8 }
 0x1ba   : > { %5904 = shalt.err (!%p5901_p12)
}
 0x1bb   : > { %s5997_s15 = smov 256   ;;  %s5998_s11 = smov 16  }
 0x1bc   : > { %5062 = dma.hbm_to_vmem [thread:$0]  (!%p6174_p5), %s7251_s24, 8192, %s881_s14, [#allocation28], %s5997_s15, %s5997_s15, %s5998_s11  }
 0x1bd   : > { %s5999_s12 = smov [#allocation32]   ;;  %s5905_s17 = scalar_lea.hbm %s7254_s27, 16 }
 0x1be   : > { %s908_s4 = sshll.u32 %s5999_s12, 4  ;;  %p5906_p13 = scmp.ne.s32.totalorder %s7254_s27, %s5905_s17  ;;  %s909_s4 = int_to_ptr.vmem [resolvable:$true] %s908_s4 }
 0x1bf   : > { %p5912_p2 = scmp.lt.u32.totalorder %s5905_s17, %s7254_s27 }
 0x1c0   : > { %p5908_p0 = pnand %p5906_p13, %p6188_p7 }
 0x1c2   : > { %p5909_p1 = pneg %p5908_p0 }
 0x1c4   : > { %p5914_p3 = pnand %p5912_p2, %p5909_p1 }
 0x1c6   : > { %5917 = shalt.err (!%p5914_p3)
}
 0x1c7   : > { %s5918_s14 = scalar_lea.vmem %s909_s4, 16  ;;  %s5925_s23 = scalar_lea.vmem %s909_s4, 32 }
 0x1c8   : > { %p5919_p4 = scmp.ne.s32.totalorder %s909_s4, %s5918_s14  ;;  %p5926_p9 = scmp.lt.s32.totalorder %s909_s4, %s909_s4 }
 0x1c9   : > { %p5927_p10 = scmp.lt.s32.totalorder %s5925_s23, %s5918_s14 }
 0x1ca   : > { %p5921_p6 = pnand %p5919_p4, %p6188_p7 }
 0x1cb   : > { %p5928_p11 = por %p5927_p10, %p5926_p9 }
 0x1cc   : > { %p5922_p8 = pneg %p5921_p6 }
 0x1ce   : > { %p5929_p12 = pnand %p5928_p11, %p5922_p8 }
 0x1d0   : > { %5932 = shalt.err (!%p5929_p12)
}
 0x1d1   : > { %5068 = dma.hbm_to_vmem [thread:$0]  (!%p6174_p5), %s7254_s27, 16, %s909_s4, [#allocation31]  }
 0x1d2   : > { %p7324_p13 = scmp.ne.s32.totalorder %s7308_s9, 0 }
 0x1d3   : > { %p7325_p0 = scmp.eq.s32.totalorder (!%p7324_p13), %s6157_s5, 0 }
 0x1d4   : > { %929 = sbr.rel (%p7324_p13) target bundleno = 3346 (0xd12), region = 132 }
 0x1db   : > { %5938 = dma.done.wait (%p7325_p0), [#allocation8], 1024   ;;  %p7326_p7 = pmov %p7325_p0 }
 0x1dc   : > { %p7327_p1 = pmov %p7325_p0 }
 0x1dd   : > { %5940 = vsyncadd (%p7326_p7), [#allocation8], 4294966272 }
 0x1de   : > { %5942 = dma.done.wait (%p7327_p1), [#allocation10], 1040   ;;  %p7328_p2 = pmov %p7325_p0 }
 0x1df   : > { %p7329_p3 = pmov %p7325_p0 }
 0x1e0   : > { %5944 = vsyncadd (%p7328_p2), [#allocation10], 4294966256 }
 0x1e1   : > { %5946 = dma.done.wait (%p7329_p3), [#allocation13], 32   ;;  %p7330_p5 = pmov %p7325_p0 }
 0x1e2   : > { %p7331_p4 = pmov %p7325_p0 }
 0x1e3   : > { %5948 = vsyncadd (%p7330_p5), [#allocation13], 4294967264 }
 0x1e4   : > { %5950 = dma.done.wait (%p7331_p4), [#allocation16], 272   ;;  %p7332_p6 = pmov %p7325_p0 }
 0x1e5   : > { %p7333_p8 = pmov %p7325_p0 }
 0x1e6   : > { %5952 = vsyncadd (%p7332_p6), [#allocation16], 4294967024 }
 0x1e7   : > { %5954 = dma.done.wait (%p7333_p8), [#allocation19], 384   ;;  %p7334_p9 = pmov %p7325_p0 }
 0x1e8   : > { %p7335_p10 = pmov %p7325_p0 }
 0x1e9   : > { %5956 = vsyncadd (%p7334_p9), [#allocation19], 4294966912 }
 0x1ea   : > { %5958 = dma.done.wait (%p7335_p10), [#allocation22], 512   ;;  %p7336_p11 = pmov %p7325_p0 }
 0x1eb   : > { %p7337_p12 = pmov %p7325_p0 }
 0x1ec   : > { %5960 = vsyncadd (%p7336_p11), [#allocation22], 4294966784 }
 0x1ed   : > { %5962 = dma.done.wait (%p7337_p12), [#allocation25], 2064   ;;  %p7338_p13 = pmov %p7325_p0 }
 0x1ef   : > { %5964 = vsyncadd (%p7338_p13), [#allocation25], 4294965232 }
 0x1f0   : > { %5966 = dma.done.wait (%p7325_p0), [#allocation28], 10240   ;;  %p7339_p7 = pmov %p7325_p0 }
 0x1f1   : > { %p7340_p1 = pmov %p7325_p0 }
 0x1f2   : > { %5968 = vsyncadd (%p7339_p7), [#allocation28], 4294957056 }
 0x1f3   : > { %5970 = dma.done.wait (%p7340_p1), [#allocation31], 80   ;;  %p7341_p2 = pmov %p7325_p0 }
 0x1f4   : > { %v6000_v0 = vmov 0.0   ;;  %vm6001_vm0 = vmmov 0   ;;  %v5140_v1 = vld [vmem:[#allocation9] sm:$0xff]   ;;  %v5142_v3 = vld [vmem:[#allocation9 + $0x8] sm:$0xff]   ;;  %v5144_v5 = vld [vmem:[#allocation9 + $0x10] sm:$0xff]   ;;  %p1067_p3 = scmp.lt.s32.totalorder %s6157_s5, 1 }
 0x1f5   : > { %5972 = vsyncadd (%p7341_p2), [#allocation31], 4294967216  ;;  %1305 = vst [vmem:[#allocation2] sm:$0xff] %v6000_v0  ;;  %4671 = vmatprep.subr.bf16.mxu0 %v6000_v0  ;;  %4691 = vmatprep.subr.bf16.mxu1 %v6000_v0  ;;  %v5141_v2 = vld [vmem:[#allocation7] sm:$0xff]   ;;  %v5143_v4 = vld [vmem:[#allocation7 + $0x8] sm:$0xff]   ;;  %s7342_s11 = sld [smem:[#allocation43_spill]] }
 0x1f6   : > { %1306 = vst [vmem:[#allocation2 + $0x10] sm:$0xff] %v6000_v0  ;;  %2305 = vst [vmem:[#allocation5] sm:$0xff] %v6000_v0  ;;  %4687 = vmatprep.mubr.msk.bf16.mxu0 %vm6001_vm0, %v6000_v0  ;;  %4707 = vmatprep.mubr.msk.bf16.mxu1 %vm6001_vm0, %v6000_v0  ;;  %v5145_v6 = vld [vmem:[#allocation7 + $0x10] sm:$0xff]   ;;  %v5146_v7 = vld [vmem:[#allocation9 + $0x18] sm:$0xff]   ;;  %s7359_s5 = smov (!%p1067_p3, %s6157_s5), 1  ;;  %s7343_s4 = sld [smem:[#allocation48_spill]] }
 0x1f7   : > { %2306 = vst [vmem:[#allocation5 + $0x10] sm:$0xff] %v6000_v0  ;;  %2624 = vst [vmem:[#allocation6] sm:$0xff] %v6000_v0  ;;  %4672 = vmatpush3.bf16.msra.mxu0 %v5140_v1  ;;  %4692 = vmatpush3.bf16.msra.mxu1 %v5141_v2  ;;  %v5147_v8 = vld [vmem:[#allocation7 + $0x18] sm:$0xff]   ;;  %v5148_v9 = vld [vmem:[#allocation9 + $0x20] sm:$0xff]   ;;  %s7285_s9 = sshll.u32 %s7359_s5, 4  ;;  %s7344_s17 = sld [smem:[#allocation47_spill]] }
 0x1f8   : > { %2625 = vst [vmem:[#allocation6 + $0x8] sm:$0xff] %v6000_v0  ;;  %2626 = vst [vmem:[#allocation6 + $0x20] sm:$0xff] %v6000_v0  ;;  %4673 = vmatprep.subr.bf16.mxu0 %v6000_v0  ;;  %4693 = vmatprep.subr.bf16.mxu1 %v6000_v0  ;;  %v5149_v10 = vld [vmem:[#allocation7 + $0x20] sm:$0xff]   ;;  %v5150_v11 = vld [vmem:[#allocation9 + $0x28] sm:$0xff]   ;;  %s7345_s3 = sld [smem:[#allocation51_spill]]  ;;  %s7346_s2 = sld [smem:[#allocation50_spill]] }
 0x1f9   : > { %2627 = vst [vmem:[#allocation6 + $0x28] sm:$0xff] %v6000_v0  ;;  %v5151_v12 = vld [vmem:[#allocation7 + $0x28] sm:$0xff]   ;;  %v5152_v13 = vld [vmem:[#allocation9 + $0x30] sm:$0xff]   ;;  %v5154_v15 = vld [vmem:[#allocation9 + $0x38] sm:$0xff]   ;;  %vm1536_vm1 = vcmask 523264   ;;  %vm1540_vm2 = vcmask 521216  }
 0x1fa   : > { %v5153_v14 = vld [vmem:[#allocation7 + $0x30] sm:$0xff]   ;;  %v5155_v18 = vld [vmem:[#allocation7 + $0x38] sm:$0xff]   ;;  %v4290_v41 = vld [vmem:[#allocation11] ss:$0 sm:$0xff]  ;;  %1538 = vst.msk [vmem:[#allocation3 + $0x10] sm:$0xff] %vm1536_vm1, %v6000_v0  ;;  %s7347_s7 = sld [smem:[#allocation53_spill]] }
 0x1fb   : > { %4674 = vmatpush3.bf16.msra.mxu0 %v5142_v3  ;;  %4694 = vmatpush3.bf16.msra.mxu1 %v5143_v4  ;;  %s1071_s8 = scalar_lea.vmem %s7342_s11, %s7285_s9  ;;  %vm1715_vm3 = vcmask 261120   ;;  %vm1805_vm4 = vcmask 1045504   ;;  %vm6003_vm5 = vmmov 1   ;;  %vm1801_vm7 = vcmask 113664   ;;  %s7350_s14 = sld [smem:[#allocation57_spill]] }
 0x1fc   : > { %4675 = vmatprep.subr.bf16.mxu0 %v6000_v0  ;;  %4695 = vmatprep.subr.bf16.mxu1 %v6000_v0  ;;  %v1081_v16 = vld [vmem:[%s1071_s8 + $0x1] sm:$0xff]  ;;  %v1082_v17 = vld [vmem:[%s1071_s8 + $0x9] sm:$0x3f]  ;;  %v5160_v27 = vld [vmem:[%s7343_s4 + $0x10] sm:$0xff]   ;;  %vm1894_vm8 = vcmask 916480   ;;  %vm1974_vm9 = vcmask 64512  }
 0x1fd   : > { %v1078_v19 = vld [vmem:[%s1071_s8] sm:$0xff]  ;;  %v1079_v20 = vld [vmem:[%s1071_s8 + $0x8] sm:$0x3f]  ;;  %v1083_v22 = vpack.c.bf16 %v1082_v17, %v1081_v16  ;;  %v5161_v28 = vld [vmem:[%s7344_s17 + $0x10] sm:$0xff]   ;;  %s7348_s8 = sld [smem:[#allocation55_spill]]  ;;  %vm2154_vm10 = vcmask 259072  }
 0x1fe   : > { %v5156_v21 = vld [vmem:[%s7343_s4] sm:$0xff]   ;;  %v1080_v24 = vpack.c.bf16 %v1079_v20, %v1078_v19  ;;  %v5158_v25 = vld [vmem:[%s7343_s4 + $0x8] sm:$0xff]   ;;  %v5162_v29 = vld [vmem:[%s7343_s4 + $0x18] sm:$0xff]   ;;  %s7353_s30 = sld [smem:[#allocation60_spill]]  ;;  %s7354_s19 = sld [smem:[#allocation62_spill]] }
 0x1ff   : > { %4676 = vmatpush3.bf16.msra.mxu0 %v5144_v5  ;;  %4696 = vmatpush3.bf16.msra.mxu1 %v5145_v6  ;;  %v5157_v23 = vld [vmem:[%s7344_s17] sm:$0xff]   ;;  %v5159_v26 = vld [vmem:[%s7344_s17 + $0x8] sm:$0xff]   ;;  %v5163_v30 = vld [vmem:[%s7344_s17 + $0x18] sm:$0xff]   ;;  %s7355_s9 = sshll.u32 %s7359_s5, 4  ;;  %s7356_s6 = sld [smem:[#allocation63_spill]] }
 0x200   : > { %4677 = vmatprep.subr.bf16.mxu0 %v6000_v0  ;;  %4697 = vmatprep.subr.bf16.mxu1 %v6000_v0  ;;  %v5164_v31 = vld [vmem:[%s7343_s4 + $0x20] sm:$0xff]   ;;  %v5166_v33 = vld [vmem:[%s7343_s4 + $0x28] sm:$0xff]   ;;  %v5168_v35 = vld [vmem:[%s7343_s4 + $0x30] sm:$0xff]  }
 0x201   : > { %v5165_v32 = vld [vmem:[%s7344_s17 + $0x20] sm:$0xff]   ;;  %v5167_v34 = vld [vmem:[%s7344_s17 + $0x28] sm:$0xff]   ;;  %v5169_v36 = vld [vmem:[%s7344_s17 + $0x30] sm:$0xff]  }
 0x202   : > { %v5170_v37 = vld [vmem:[%s7343_s4 + $0x38] sm:$0xff]   ;;  %v5172_v59 = vld [vmem:[%s7345_s3] sm:$0xff]   ;;  %v5174_v61 = vld [vmem:[%s7345_s3 + $0x8] sm:$0xff]  }
 0x203   : > { %4678 = vmatpush3.bf16.msra.mxu0 %v5146_v7  ;;  %4698 = vmatpush3.bf16.msra.mxu1 %v5147_v8  ;;  %v5171_v38 = vld [vmem:[%s7344_s17 + $0x38] sm:$0xff]   ;;  %v5173_v60 = vld [vmem:[%s7346_s2] sm:$0xff]   ;;  %v5175_v62 = vld [vmem:[%s7346_s2 + $0x8] sm:$0xff]   ;;  %s7349_s1 = smov %s7348_s8 }
 0x204   : > { %4679 = vmatprep.subr.bf16.mxu0 %v6000_v0  ;;  %4699 = vmatprep.subr.bf16.mxu1 %v6000_v0  ;;  %v5176_v63 = vld [vmem:[%s7345_s3 + $0x10] sm:$0xff]   ;;  %v5178_v2 = vld [vmem:[%s7345_s3 + $0x18] sm:$0xff]   ;;  %vm4886_vm6 = vmpackc.low %vm1805_vm4, %vm6003_vm5 }
 0x205   : > { %v5177_v1 = vld [vmem:[%s7346_s2 + $0x10] sm:$0xff]   ;;  %v5179_v3 = vld [vmem:[%s7346_s2 + $0x18] sm:$0xff]   ;;  %s1076_s11 = scalar_lea.vmem %s7356_s6, %s7355_s9 }
 0x206   : > { %v4307_v6 = vld [vmem:[#allocation12] ss:$0 sm:$0xff] }
 0x207   : > { %4680 = vmatpush3.bf16.msra.mxu0 %v5148_v9  ;;  %4700 = vmatpush3.bf16.msra.mxu1 %v5149_v10 }
 0x208   : > { %4681 = vmatprep.subr.bf16.mxu0 %v6000_v0  ;;  %4701 = vmatprep.subr.bf16.mxu1 %v6000_v0 }
 0x20b   : > { %4682 = vmatpush3.bf16.msra.mxu0 %v5150_v11  ;;  %4702 = vmatpush3.bf16.msra.mxu1 %v5151_v12 }
 0x20c   : > { %4683 = vmatprep.subr.bf16.mxu0 %v6000_v0  ;;  %4703 = vmatprep.subr.bf16.mxu1 %v6000_v0 }
 0x20f   : > { %4684 = vmatpush3.bf16.msra.mxu0 %v5152_v13  ;;  %4704 = vmatpush3.bf16.msra.mxu1 %v5153_v14 }
 0x210   : > { %4685 = vmatprep.subr.bf16.mxu0 %v6000_v0  ;;  %4705 = vmatprep.subr.bf16.mxu1 %v6000_v0 }
 0x213   : > { %4686 = vmatpush3.bf16.msra.mxu0 %v5154_v15  ;;  %4706 = vmatpush3.bf16.msra.mxu1 %v5155_v18 }
 0x214   : > { %4711 = vmatprep.subr.bf16.mxu0 %v6000_v0  ;;  %4731 = vmatprep.subr.bf16.mxu1 %v6000_v0 }
 0x216   : > { %4688 = vmatmul.mubr.bf16.vlgmr.msra.gmra.mrb[0].mxu0 %v1083_v22  ;;  %4708 = vmatmul.mubr.bf16.vlgmr.msra.gmra.mrb[0].mxu1 %v1080_v24 }
 0x217   : > { %4712 = vmatpush3.bf16.msra.mxu0 %v5156_v21  ;;  %4732 = vmatpush3.bf16.msra.mxu1 %v5157_v23 }
 0x218   : > { %4713 = vmatprep.subr.bf16.mxu0 %v6000_v0  ;;  %4733 = vmatprep.subr.bf16.mxu1 %v6000_v0 }
 0x219   : > { %4727 = vmatprep.mubr.msk.bf16.mxu0 %vm6001_vm0, %v6000_v0  ;;  %4747 = vmatprep.mubr.msk.bf16.mxu1 %vm6001_vm0, %v6000_v0 }
 0x21b   : > { %4714 = vmatpush3.bf16.msra.mxu0 %v5158_v25  ;;  %4734 = vmatpush3.bf16.msra.mxu1 %v5159_v26  ;;  %v1711_v25 = vld [vmem:[%s7347_s7] sm:$0xff]  ;;  %v1712_v26 = vld [vmem:[%s7347_s7 + $0x8] sm:$0xff] }
 0x21c   : > { %4715 = vmatprep.subr.bf16.mxu0 %v6000_v0  ;;  %4735 = vmatprep.subr.bf16.mxu1 %v6000_v0 }
 0x21f   : > { %4716 = vmatpush3.bf16.msra.mxu0 %v5160_v27  ;;  %4736 = vmatpush3.bf16.msra.mxu1 %v5161_v28  ;;  %v4876_v27 = vpack.c.bf16 %v1712_v26, %v1711_v25  ;;  %v1713_v28 = vld [vmem:[%s7347_s7 + $0x10] sm:$0xff] }
 0x220   : > { %4717 = vmatprep.subr.bf16.mxu0 %v6000_v0  ;;  %4737 = vmatprep.subr.bf16.mxu1 %v6000_v0  ;;  %v2056_v26 = vld [vmem:[%s7350_s14 + $0x10] sm:$0xff] }
 0x223   : > { %4718 = vmatpush3.bf16.msra.mxu0 %v5162_v29  ;;  %4738 = vmatpush3.bf16.msra.mxu1 %v5163_v30  ;;  %v1714_v29 = vld [vmem:[%s7347_s7 + $0x18] sm:$0xff]  ;;  %v6774_v30 = vld [vmem:[#allocation2] sm:$0xff] }
 0x224   : > { %4719 = vmatprep.subr.bf16.mxu0 %v6000_v0  ;;  %4739 = vmatprep.subr.bf16.mxu1 %v6000_v0  ;;  %2151 = vst.msk [vmem:[#allocation4] sm:$0xff] %vm1715_vm3, %v6774_v30  ;;  %2152 = vst.msk [vmem:[#allocation4 + $0x10] sm:$0xff] %vm1715_vm3, %v6774_v30 }
 0x227   : > { %4720 = vmatpush3.bf16.msra.mxu0 %v5164_v31  ;;  %4740 = vmatpush3.bf16.msra.mxu1 %v5165_v32 }
 0x228   : > { %4721 = vmatprep.subr.bf16.mxu0 %v6000_v0  ;;  %4741 = vmatprep.subr.bf16.mxu1 %v6000_v0 }
 0x22b   : > { %4722 = vmatpush3.bf16.msra.mxu0 %v5166_v33  ;;  %4742 = vmatpush3.bf16.msra.mxu1 %v5167_v34  ;;  %v4318_v33 = vld [vmem:[#allocation14] ss:$0 sm:$0xff] }
 0x22c   : > { %4723 = vmatprep.subr.bf16.mxu0 %v6000_v0  ;;  %4743 = vmatprep.subr.bf16.mxu1 %v6000_v0 }
 0x22f   : > { %4724 = vmatpush3.bf16.msra.mxu0 %v5168_v35  ;;  %4744 = vmatpush3.bf16.msra.mxu1 %v5169_v36 }
 0x230   : > { %4725 = vmatprep.subr.bf16.mxu0 %v6000_v0  ;;  %4745 = vmatprep.subr.bf16.mxu1 %v6000_v0 }
 0x233   : > { %4726 = vmatpush3.bf16.msra.mxu0 %v5170_v37  ;;  %4746 = vmatpush3.bf16.msra.mxu1 %v5171_v38 }
 0x234   : > { %4751 = vmatprep.subr.bf16.mxu0 %v6000_v0  ;;  %4763 = vmatprep.subr.bf16.mxu1 %v6000_v0 }
 0x2e9   : > { %v1198_v39 = vpop.f32.mrb[0].mxu0  ;;  %v1287_v40 = vpop.f32.mrb[0].mxu1 }
 0x2ea   : > { %v4689_v42 = vpop.f32.mrb[1].mxu0  ;;  %v1288_v43 = vadd.f32 %v1287_v40, %v1198_v39  ;;  %v4709_v44 = vpop.f32.mrb[1].mxu1 }
 0x2eb   : > { %v1201_v45 = vpop.f32.mrb[2].mxu0  ;;  %v1290_v46 = vpop.f32.mrb[2].mxu1 }
 0x2ec   : > { %v4690_v47 = vpop.f32.mrb[3].mxu0  ;;  %v1301_v48 = vadd.f32 %v4290_v41, %v1288_v43  ;;  %v1291_v49 = vadd.f32 %v1290_v46, %v1201_v45  ;;  %v4710_v50 = vpop.f32.mrb[3].mxu1  ;;  %v6002_v46 = vmov 0.0|0.0  }
 0x2ed   : > { %v1879_v47 = vld [vmem:[%s7348_s8] sm:$0xff]  ;;  %s7351_s8 = sld [smem:[#allocation61_spill]] }
 0x2ee   : > { %v1303_v51 = vmax.f32 %v1301_v48, 0.0  ;;  %v1302_v52 = vadd.f32 %v4290_v41, %v1291_v49  ;;  %v1880_v48 = vld [vmem:[%s7349_s1 + $0x8] sm:$0xff]  ;;  %v1881_v49 = vld [vmem:[%s7349_s1 + $0x10] sm:$0xff] }
 0x2ef   : > { %v4889_v50 = vpack.c.bf16 %v1880_v48, %v1879_v47 }
 0x2f0   : > { %1307 = vst [vmem:[#allocation2 + $0x8] sm:$0xff] %v1303_v51  ;;  %v1304_v53 = vmax.f32 %v1302_v52, 0.0 }
 0x2f2   : > { %1308 = vst [vmem:[#allocation2 + $0x10] sm:$0x3f] %v1304_v53  ;;  %v1883_v53 = vld [vmem:[%s7349_s1 + $0x20] sm:$0xff] }
 0x2f3   : > { %s7352_s12 = smov %s7351_s8 }
 0x2f9   : > { %v1312_v54 = vld [vmem:[#allocation2 + $0x9] sm:$0xff]  ;;  %v1313_v55 = vld [vmem:[#allocation2 + $0x11] sm:$0x3f] }
 0x2fa   : > { %v1310_v56 = vld [vmem:[#allocation2 + $0x10] sm:$0x3f]  ;;  %v1314_v57 = vpack.c.bf16 %v1313_v55, %v1312_v54  ;;  %v1884_v54 = vld [vmem:[%s7349_s1 + $0x28] sm:$0xff] }
 0x2fb   : > { %v1311_v58 = vpack.c.bf16 %v1310_v56, %v1303_v51  ;;  %v1882_v51 = vld [vmem:[%s7349_s1 + $0x18] sm:$0xff]  ;;  %v4895_v55 = vpack.c.bf16 %v1884_v54, %v1883_v53  ;;  %v1885_v56 = vld [vmem:[%s7349_s1 + $0x30] sm:$0xff] }
 0x2fc   : > { %4728 = vmatmul.mubr.bf16.vlgmr.msra.gmra.mrb[4].mxu0 %v1314_v57  ;;  %v4892_v52 = vpack.c.bf16 %v1882_v51, %v1881_v49  ;;  %v1886_v57 = vld [vmem:[%s7349_s1 + $0x38] sm:$0xff]  ;;  %v5180_v49 = vld [vmem:[#allocation23] sm:$0xff]  }
 0x2fd   : > { %4748 = vmatmul.mubr.bf16.vlgmr.msra.gmra.mrb[4].mxu1 %v1311_v58  ;;  %4759 = vmatprep.mubr.msk.bf16.mxu0 %vm6001_vm0, %v6000_v0  ;;  %v4898_v58 = vpack.c.bf16 %v1886_v57, %v1885_v56  ;;  %v5182_v51 = vld [vmem:[#allocation23 + $0x8] sm:$0xff]   ;;  %v5186_v53 = vld [vmem:[#allocation27 + $0x4] ss:$8 sps:$4 sm:$0xff]  }
 0x2fe   : > { %4771 = vmatprep.mubr.msk.bf16.mxu1 %vm6001_vm0, %v6000_v0  ;;  %4752 = vmatpush3.bf16.msra.mxu0 %v5172_v59  ;;  %v1887_v59 = vld [vmem:[%s7349_s1 + $0x40] sm:$0xff]  ;;  %v2069_v54 = vld [vmem:[#allocation20 + $0x8] sm:$0x3f] }
 0x2ff   : > { %4764 = vmatpush3.bf16.msra.mxu1 %v5173_v60  ;;  %4753 = vmatprep.subr.bf16.mxu0 %v6000_v0  ;;  %v1888_v60 = vld [vmem:[%s7349_s1 + $0x48] sm:$0xff] }
 0x300   : > { %4765 = vmatprep.subr.bf16.mxu1 %v6000_v0 }
 0x302   : > { %4754 = vmatpush3.bf16.msra.mxu0 %v5174_v61  ;;  %v4901_v61 = vpack.c.bf16 %v1888_v60, %v1887_v59 }
 0x303   : > { %4766 = vmatpush3.bf16.msra.mxu1 %v5175_v62  ;;  %4755 = vmatprep.subr.bf16.mxu0 %v6000_v0  ;;  %v1889_v62 = vld [vmem:[%s7349_s1 + $0x50] sm:$0xff] }
 0x304   : > { %4767 = vmatprep.subr.bf16.mxu1 %v6000_v0 }
 0x306   : > { %4756 = vmatpush3.bf16.msra.mxu0 %v5176_v63  ;;  %v1890_v63 = vld [vmem:[%s7349_s1 + $0x58] sm:$0xff] }
 0x307   : > { %4768 = vmatpush3.bf16.msra.mxu1 %v5177_v1  ;;  %4757 = vmatprep.subr.bf16.mxu0 %v6000_v0  ;;  %v4904_v1 = vpack.c.bf16 %v1890_v63, %v1889_v62 }
 0x308   : > { %4769 = vmatprep.subr.bf16.mxu1 %v6000_v0 }
 0x30a   : > { %4758 = vmatpush3.bf16.msra.mxu0 %v5178_v2  ;;  %v1891_v2 = vld [vmem:[%s7349_s1 + $0x60] sm:$0xff] }
 0x30b   : > { %4770 = vmatpush3.bf16.msra.mxu1 %v5179_v3  ;;  %4877 = vmatprep.subr.bf16.mxu0 %v4876_v27  ;;  %v1892_v3 = vld [vmem:[%s7349_s1 + $0x68] sm:$0xff] }
 0x30c   : > { %4884 = vmatprep.subr.bf16.mxu1 %v6002_v46 }
 0x3cf   : > { %v1429_v4 = vpop.f32.mrb[4].mxu0 }
 0x3d0   : > { %v1518_v5 = vpop.f32.mrb[4].mxu1  ;;  %v4729_v8 = vpop.f32.mrb[5].mxu0 }
 0x3d1   : > { %v1519_v7 = vadd.f32 %v1518_v5, %v1429_v4  ;;  %v4749_v9 = vpop.f32.mrb[5].mxu1  ;;  %v1432_v10 = vpop.f32.mrb[6].mxu0  ;;  %v4907_v4 = vpack.c.bf16 %v1892_v3, %v1891_v2  ;;  %v6827_v5 = vld [vmem:[#allocation15 + $0x8] sm:$0x3f] }
 0x3d2   : > { %v1521_v11 = vpop.f32.mrb[6].mxu1  ;;  %v4730_v14 = vpop.f32.mrb[7].mxu0  ;;  %v5189_v3 = vld [vmem:[#allocation27 + $0x14] ss:$8 sps:$4 sm:$0xff]  }
 0x3d3   : > { %v1532_v12 = vadd.f32 %v4307_v6, %v1519_v7  ;;  %v1522_v13 = vadd.f32 %v1521_v11, %v1432_v10  ;;  %v4750_v15 = vpop.f32.mrb[7].mxu1 }
 0x3d4   : > { %v1972_v15 = vld [vmem:[#allocation18] sm:$0xff] }
 0x3d5   : > { %v1534_v16 = vmax.f32 %v1532_v12, 0.0  ;;  %v1533_v17 = vadd.f32 %v4307_v6, %v1522_v13  ;;  %v6829_v6 = vld [vmem:[#allocation15] sm:$0xff]  ;;  %v6004_v12 = vmov 1.0  }
 0x3d7   : > { %v1535_v18 = vmax.f32 %v1533_v17, 0.0  ;;  %1539 = vst.msk [vmem:[#allocation3 + $0x8] sm:$0xff] %vm1536_vm1, %v1534_v16  ;;  %v2054_v16 = vld [vmem:[%s7350_s14] sm:$0xff]  ;;  %v2055_v17 = vld [vmem:[%s7350_s14 + $0x8] sm:$0xff] }
 0x3d9   : > { %1541 = vst.msk [vmem:[#allocation3 + $0x10] sm:$0x3f] %vm1540_vm2, %v1535_v18  ;;  %v4909_v18 = vpack.c.bf16 %v2055_v17, %v2054_v16  ;;  %v5205_v16 = vld [vmem:[#allocation27 + $0x70] ss:$8 sps:$4 sm:$0xff]   ;;  %v6005_v17 = vmov 0  }
 0x3de   : > { %v1542_v19 = vld [vmem:[#allocation3 + $0x8] sm:$0xff] }
 0x3e0   : > { %v1545_v20 = vld [vmem:[#allocation3 + $0x9] sm:$0xff]  ;;  %v1546_v21 = vld [vmem:[#allocation3 + $0x11] sm:$0x3f] }
 0x3e1   : > { %v1543_v22 = vld [vmem:[#allocation3 + $0x10] sm:$0x3f]  ;;  %v1547_v23 = vpack.c.bf16 %v1546_v21, %v1545_v20  ;;  %v1893_v21 = vld [vmem:[#allocation17] sm:$0x1] }
 0x3e2   : > { %v1544_v24 = vpack.c.bf16 %v1543_v22, %v1542_v19  ;;  %v1968_v19 = vlaneseq }
 0x3e3   : > { %4760 = vmatmul.mubr.msk.bf16.vlgmr.msra.gmra.mrb[8].mxu0 %vm1536_vm1, %v1547_v23 }
 0x3e4   : > { %4772 = vmatmul.mubr.msk.bf16.vlgmr.msra.gmra.mrb[8].mxu1 %vm1536_vm1, %v1544_v24  ;;  %4879 = vmatpush3.bf16.msra.mxu0 %v4876_v27  ;;  %v6843_v20 = vshrl.u32 %v1968_v19, 7  ;;  %v2057_v27 = vld [vmem:[%s7350_s14 + $0x18] sm:$0xff] }
 0x3e5   : > { %4790 = vmatprep.mubr.msk.f32.mxu1 %vm6001_vm0, %v6000_v0  ;;  %v4880_v0 = vpack.c.bf16 %v1714_v29, %v1713_v28  ;;  %v4913_v29 = vpack.c.bf16 %v2057_v27, %v2056_v26  ;;  %v5246_v26 = vld [vmem:[#allocation29 + $0x44] ss:$16 sps:$4 sm:$0xff]   ;;  %v5244_v27 = vld [vmem:[#allocation29 + $0x40] ss:$16 sps:$4 sm:$0xff]  }
 0x3e6   : > { %v6846_v22 = vsub.s32 0, %v6843_v20 }
 0x3e7   : > { %4881 = vmatprep.subr.bf16.mxu0 %v4880_v0 }
 0x3e8   : > { %4883 = vmatpush3.bf16.msra.mxu0 %v4880_v0  ;;  %v2058_v0 = vld [vmem:[%s7350_s14 + $0x20] sm:$0xff] }
 0x3e9   : > { %4888 = vmatprep.subr.bf16.mxu0 %v6002_v46 }
 0x4b6   : > { %v1625_v31 = vpop.f32.mrb[8].mxu0 }
 0x4b7   : > { %v1693_v32 = vpop.f32.mrb[8].mxu1  ;;  %v4761_v35 = vpop.f32.mrb[9].mxu0 }
 0x4b8   : > { %v1694_v34 = vadd.f32 %v1693_v32, %v1625_v31  ;;  %v4773_v36 = vpop.f32.mrb[9].mxu1  ;;  %v1628_v37 = vpop.f32.mrb[10].mxu0  ;;  %v2059_v31 = vld [vmem:[%s7350_s14 + $0x28] sm:$0xff] }
 0x4b9   : > { %v1696_v38 = vpop.f32.mrb[10].mxu1  ;;  %v4762_v41 = vpop.f32.mrb[11].mxu0  ;;  %v4917_v32 = vpack.c.bf16 %v2059_v31, %v2058_v0  ;;  %v2062_v36 = vld [vmem:[%s7350_s14 + $0x40] sm:$0xff] }
 0x4ba   : > { %v1707_v39 = vadd.f32 %v4318_v33, %v1694_v34  ;;  %v1697_v40 = vadd.f32 %v1696_v38, %v1628_v37  ;;  %v4774_v42 = vpop.f32.mrb[11].mxu1  ;;  %v2061_v34 = vld [vmem:[%s7350_s14 + $0x38] sm:$0xff]  ;;  %v2063_v37 = vld [vmem:[%s7350_s14 + $0x48] sm:$0xff]  ;;  %v5256_v31 = vld [vmem:[#allocation29 + $0x80] ss:$16 sps:$4 sm:$0xff]  }
 0x4bb   : > { %v4925_v38 = vpack.c.bf16 %v2063_v37, %v2062_v36  ;;  %v2066_v42 = vld [vmem:[%s7350_s14 + $0x60] sm:$0xff] }
 0x4bc   : > { %v1709_v43 = vmax.f32 %v1707_v39, 0.0  ;;  %v1708_v44 = vadd.f32 %v4318_v33, %v1697_v40  ;;  %v2060_v33 = vld [vmem:[%s7350_s14 + $0x30] sm:$0xff]  ;;  %v2065_v40 = vld [vmem:[%s7350_s14 + $0x58] sm:$0xff] }
 0x4bd   : > { %v4921_v35 = vpack.c.bf16 %v2061_v34, %v2060_v33  ;;  %v2064_v39 = vld [vmem:[%s7350_s14 + $0x50] sm:$0xff] }
 0x4be   : > { %v1710_v45 = vmax.f32 %v1708_v44, 0.0  ;;  %4783 = vmatprep.mubr.msk.f32.mxu0 %vm1715_vm3, %v1709_v43  ;;  %v4929_v41 = vpack.c.bf16 %v2065_v40, %v2064_v39  ;;  %v2067_v43 = vld [vmem:[%s7350_s14 + $0x68] sm:$0xff]  ;;  %v5262_v33 = vld [vmem:[#allocation29 + $0xa0] ss:$16 sps:$4 sm:$0xff]  }
 0x4bf   : > { %v4933_v44 = vpack.c.bf16 %v2067_v43, %v2066_v42  ;;  %v5258_v0 = vld [vmem:[#allocation29 + $0x84] ss:$16 sps:$4 sm:$0xff]   ;;  %v5274_v37 = vld [vmem:[#allocation29 + $0xe0] ss:$16 sps:$4 sm:$0xff]   ;;  %v6899_v42 = vadd.s32 8, %v6843_v20  ;;  %v6902_v43 = vand.u32 127, %v1968_v19 }
 0x4c0   : > { %4784 = vmatmul.mubr.msk.f32.vlgmr.msra.gmra.mrb[12].mxu0 %vm1715_vm3, %v1710_v45  ;;  %v5270_v34 = vld [vmem:[#allocation29 + $0xc4] ss:$16 sps:$4 sm:$0xff]   ;;  %v5280_v39 = vld [vmem:[#allocation29 + $0x100] ss:$16 sps:$4 sm:$0xff]  }
 0x4c1   : > { %4821 = vmatprep.mubr.msk.f32.mxu0 %vm6001_vm0, %v6774_v30  ;;  %4890 = vmatpush3.bf16.msra.mxu0 %v4889_v50  ;;  %v5181_v50 = vld [vmem:[#allocation21] sm:$0xff]   ;;  %vm2299_vm11 = vcmp.eq.s32.totalorder %v6899_v42, 13  ;;  %vm2300_vm12 = vcmp.ge.s32.totalorder %v6902_v43, 112 }
 0x4c2   : > { %4891 = vmatprep.subr.bf16.mxu0 %v6002_v46  ;;  %v5276_v36 = vld [vmem:[#allocation29 + $0xe4] ss:$16 sps:$4 sm:$0xff]   ;;  %vm2302_vm13 = vmand %vm2299_vm11, %vm2300_vm12 }
 0x4c3   : > { %v5288_v40 = vld [vmem:[#allocation29 + $0x124] ss:$16 sps:$4 sm:$0xff]  }
 0x4c5   : > { %4893 = vmatpush3.bf16.msra.mxu0 %v4892_v52  ;;  %v5183_v52 = vld [vmem:[#allocation21 + $0x8] sm:$0xff]  }
 0x4c6   : > { %4894 = vmatprep.subr.bf16.mxu0 %v6002_v46 }
 0x4c9   : > { %4896 = vmatpush3.bf16.msra.mxu0 %v4895_v55  ;;  %v2068_v55 = vld [vmem:[#allocation20] sm:$0xff] }
 0x4ca   : > { %4897 = vmatprep.subr.bf16.mxu0 %v6002_v46 }
 0x4cd   : > { %4899 = vmatpush3.bf16.msra.mxu0 %v4898_v58 }
 0x4ce   : > { %4900 = vmatprep.subr.bf16.mxu0 %v6002_v46 }
 0x4d1   : > { %4902 = vmatpush3.bf16.msra.mxu0 %v4901_v61  ;;  %v5184_v61 = vld [vmem:[#allocation27] ss:$8 sps:$4 sm:$0xff]  }
 0x4d2   : > { %4903 = vmatprep.subr.bf16.mxu0 %v6002_v46 }
 0x4d5   : > { %4905 = vmatpush3.bf16.msra.mxu0 %v4904_v1 }
 0x4d6   : > { %4906 = vmatprep.subr.bf16.mxu0 %v6002_v46 }
 0x4d9   : > { %4908 = vmatpush3.bf16.msra.mxu0 %v4907_v4  ;;  %v5187_v4 = vld [vmem:[#allocation27 + $0x10] ss:$8 sps:$4 sm:$0xff]  }
 0x4da   : > { %4860 = vmatprep.subr.bf16.mxu0 %v6774_v30 }
 0x593   : > { %v4785_v7 = vpop.f32.mrb[12].mxu0 }
 0x594   : > { %v1800_v8 = vmul.f32 %v4785_v7, %v6827_v5  ;;  %v1788_v9 = vpop.f32.mrb[13].mxu0  ;;  %v5195_v7 = vld [vmem:[#allocation27 + $0x34] ss:$8 sps:$4 sm:$0xff]  }
 0x595   : > { %v1799_v10 = vmul.f32 %v6829_v6, %v1788_v9  ;;  %v5198_v9 = vld [vmem:[#allocation27 + $0x44] ss:$8 sps:$4 sm:$0xff]  }
 0x597   : > { %v4885_v11 = vpack.c.bf16 %v1800_v8, %v1799_v10  ;;  %v5193_v8 = vld [vmem:[#allocation27 + $0x30] ss:$8 sps:$4 sm:$0xff]   ;;  %v5196_v10 = vld [vmem:[#allocation27 + $0x40] ss:$8 sps:$4 sm:$0xff]  }
 0x599   : > { %4887 = vmatpush3.bf16.msk.msra.mxu1 %vm4886_vm6, %v4885_v11  ;;  %v5201_v11 = vld [vmem:[#allocation27 + $0x54] ss:$8 sps:$4 sm:$0xff]  }
 0x59a   : > { %4824 = vmatprep.subr.mxu1 %v1972_v15 }
 0x59c   : > { %4791 = vmatmul.mubr.msk.f32.vlgmr.msra.gmra.mrb[12].mxu1 %vm1801_vm7, %v6004_v12  ;;  %v5199_v12 = vld [vmem:[#allocation27 + $0x50] ss:$8 sps:$4 sm:$0xff]  }
 0x59d   : > { %4825 = vmatpush3.msra.mxu1 %v1972_v15  ;;  %v5207_v15 = vld [vmem:[#allocation27 + $0x74] ss:$8 sps:$4 sm:$0xff]  }
 0x59e   : > { %4910 = vmatprep.subr.bf16.mxu1 %v4909_v18 }
 0x66f   : > { %v1875_v13 = vpop.f32.mrb[12].mxu1 }
 0x670   : > { %4822 = vmatmul.mubr.msk.f32.vlgmr.msra.gmra.mrb[14].mxu0 %vm1894_vm8, %v1875_v13  ;;  %v4792_v14 = vpop.f32.mrb[13].mxu1  ;;  %v5204_v13 = vld [vmem:[#allocation27 + $0x64] ss:$8 sps:$4 sm:$0xff]  }
 0x671   : > { %4864 = vmatprep.mubr.msk.bf16.mxu0 %vm6001_vm0, %v6774_v30  ;;  %4861 = vmatpush3.bf16.msra.mxu0 %v5180_v49  ;;  %v5202_v14 = vld [vmem:[#allocation27 + $0x60] ss:$8 sps:$4 sm:$0xff]  }
 0x672   : > { %4862 = vmatprep.subr.bf16.mxu0 %v6774_v30 }
 0x675   : > { %4863 = vmatpush3.bf16.msra.mxu0 %v5182_v51 }
 0x676   : > { %2427 = vmatprep.subr.bf16.mxu0 %v5186_v53 }
 0x743   : > { %v1964_v23 = vpop.f32.mrb[14].mxu0 }
 0x744   : > { %v1965_v24 = vadd.f32 %v1964_v23, %v1893_v21  ;;  %v4823_v25 = vpop.f32.mrb[15].mxu0  ;;  %v5232_v21 = vld [vmem:[#allocation29] ss:$16 sps:$4 sm:$0xff]   ;;  %v5234_v23 = vld [vmem:[#allocation29 + $0x4] ss:$16 sps:$4 sm:$0xff]  }
 0x745   : > { %v5238_v25 = vld [vmem:[#allocation29 + $0x20] ss:$16 sps:$4 sm:$0xff]  }
 0x746   : > { %v1971_v28 = vrot.slane %v1965_v24, %v6846_v22  ;;  %v5240_v24 = vld [vmem:[#allocation29 + $0x24] ss:$16 sps:$4 sm:$0xff]  }
 0x748   : > { %4826 = vmatprep.mubr.msk.f32.mxu1 %vm1974_vm9, %v1971_v28 }
 0x749   : > { %4827 = vmatmul.mubr.msk.f32.vlgmr.msra.gmra.mrb[14].mxu1 %vm1974_vm9, %v1971_v28  ;;  %v5252_v28 = vld [vmem:[#allocation29 + $0x64] ss:$16 sps:$4 sm:$0xff]  }
 0x74a   : > { %4912 = vmatpush3.bf16.msra.mxu1 %v4909_v18  ;;  %v5210_v18 = vld [vmem:[#allocation26 + $0x4] ss:$8 sps:$4 sm:$0xff]  }
 0x74b   : > { %4914 = vmatprep.subr.bf16.mxu1 %v4913_v29 }
 0x74e   : > { %4916 = vmatpush3.bf16.msra.mxu1 %v4913_v29  ;;  %v5250_v29 = vld [vmem:[#allocation29 + $0x60] ss:$16 sps:$4 sm:$0xff]  }
 0x74f   : > { %4918 = vmatprep.subr.bf16.mxu1 %v4917_v32 }
 0x752   : > { %4920 = vmatpush3.bf16.msra.mxu1 %v4917_v32  ;;  %v5264_v32 = vld [vmem:[#allocation29 + $0xa4] ss:$16 sps:$4 sm:$0xff]  }
 0x753   : > { %4922 = vmatprep.subr.bf16.mxu1 %v4921_v35 }
 0x756   : > { %4924 = vmatpush3.bf16.msra.mxu1 %v4921_v35  ;;  %v5268_v35 = vld [vmem:[#allocation29 + $0xc0] ss:$16 sps:$4 sm:$0xff]  }
 0x757   : > { %4926 = vmatprep.subr.bf16.mxu1 %v4925_v38 }
 0x75a   : > { %4928 = vmatpush3.bf16.msra.mxu1 %v4925_v38  ;;  %v5282_v38 = vld [vmem:[#allocation29 + $0x104] ss:$16 sps:$4 sm:$0xff]  }
 0x75b   : > { %4930 = vmatprep.subr.bf16.mxu1 %v4929_v41 }
 0x75e   : > { %4932 = vmatpush3.bf16.msra.mxu1 %v4929_v41  ;;  %v5286_v41 = vld [vmem:[#allocation29 + $0x120] ss:$16 sps:$4 sm:$0xff]  }
 0x75f   : > { %4934 = vmatprep.subr.bf16.mxu1 %v4933_v44 }
 0x762   : > { %4936 = vmatpush3.bf16.msra.mxu1 %v4933_v44 }
 0x763   : > { %4868 = vmatprep.subr.bf16.mxu1 %v6774_v30 }
 0x81c   : > { %v4828_v45 = vpop.f32.mrb[14].mxu1 }
 0x81d   : > { %v2043_v46 = vpop.f32.mrb[15].mxu1  ;;  %v2053_v48 = vmul.f32 %v4828_v45, %v6827_v5  ;;  %v5192_v5 = vld [vmem:[#allocation27 + $0x24] ss:$8 sps:$4 sm:$0xff]  }
 0x81e   : > { %v2052_v47 = vmul.f32 %v2043_v46, %v6829_v6  ;;  %v5190_v6 = vld [vmem:[#allocation27 + $0x20] ss:$8 sps:$4 sm:$0xff]   ;;  %v4334_v46 = vld [vmem:[#allocation24] ss:$0 sm:$0xff] }
 0x820   : > { %4857 = vmatprep.mubr.msk.f32.mxu1 %vm1894_vm8, %v2052_v47 }
 0x821   : > { %4858 = vmatmul.mubr.msk.f32.vlgmr.msra.gmra.mrb[16].mxu1 %vm1894_vm8, %v2053_v48 }
 0x822   : > { %4872 = vmatprep.mubr.msk.bf16.mxu1 %vm6001_vm0, %v6774_v30  ;;  %4869 = vmatpush3.bf16.msra.mxu1 %v5181_v50  ;;  %vm2774_vm0 = vsmask.f32 4352 }
 0x823   : > { %4870 = vmatprep.subr.bf16.mxu1 %v6774_v30 }
 0x826   : > { %4871 = vmatpush3.bf16.msra.mxu1 %v5183_v52 }
 0x827   : > { %3131 = vmatprep.subr.bf16.mxu1 %v5234_v23  ;;  %v5247_v23 = vld [vmem:[#allocation29 + $0x48] ss:$16 sps:$4 sm:$0xff]  }
 0x8f4   : > { %v4859_v56 = vpop.f32.mrb[16].mxu1 }
 0x8f5   : > { %v2148_v57 = vadd.f32 %v4859_v56, %v2069_v54  ;;  %v2142_v58 = vpop.f32.mrb[17].mxu1 }
 0x8f6   : > { %v2143_v59 = vadd.f32 %v2142_v58, %v2068_v55 }
 0x8f7   : > { %2155 = vst.msk [vmem:[#allocation4 + $0x10] sm:$0x3f] %vm2154_vm10, %v2148_v57 }
 0x8f8   : > { %2153 = vst.msk [vmem:[#allocation4 + $0x8] sm:$0xff] %vm1715_vm3, %v2143_v59  ;;  %v5208_v59 = vld [vmem:[#allocation26] ss:$8 sps:$4 sm:$0xff]  }
 0x8fe   : > { %v2157_v60 = vld [vmem:[#allocation4 + $0x10] sm:$0x3f] }
 0x8ff   : > { %v2159_v62 = vld [vmem:[#allocation4 + $0x7] sm:$0xff]  ;;  %v2160_v63 = vld [vmem:[#allocation4 + $0xf] sm:$0x3f] }
 0x900   : > { %v2156_v1 = vld [vmem:[#allocation4 + $0x8] sm:$0xff]  ;;  %v2161_v30 = vpack.c.bf16 %v2160_v63, %v2159_v62 }
 0x901   : > { %v2158_v2 = vpack.c.bf16 %v2157_v60, %v2156_v1  ;;  %v5213_v63 = vld [vmem:[#allocation26 + $0x14] ss:$8 sps:$4 sm:$0xff]   ;;  %v5211_v1 = vld [vmem:[#allocation26 + $0x10] ss:$8 sps:$4 sm:$0xff]  }
 0x902   : > { %4865 = vmatmul.mubr.msk.bf16.vlgmr.msra.gmra.mrb[16].mxu0 %vm1715_vm3, %v2161_v30  ;;  %v5216_v30 = vld [vmem:[#allocation26 + $0x24] ss:$8 sps:$4 sm:$0xff]  }
 0x903   : > { %4873 = vmatmul.mubr.msk.bf16.vlgmr.msra.gmra.mrb[20].mxu1 %vm1715_vm3, %v2158_v2  ;;  %2428 = vmatpush1.bf16.msra.mxu0 %v5184_v61  ;;  %v5214_v2 = vld [vmem:[#allocation26 + $0x20] ss:$8 sps:$4 sm:$0xff]  }
 0x904   : > { %2429 = vmatprep.subr.bf16.mxu0 %v5189_v3  ;;  %2459 = vmatprep.mubr.bf16.mxu0 %v6005_v17  ;;  %v5219_v3 = vld [vmem:[#allocation26 + $0x34] ss:$8 sps:$4 sm:$0xff]  }
 0x905   : > { %3132 = vmatpush1.bf16.msra.mxu1 %v5232_v21  ;;  %v5249_v21 = vld [vmem:[#allocation29 + $0x4c] ss:$16 sps:$4 sm:$0xff]  }
 0x906   : > { %3133 = vmatprep.subr.bf16.mxu1 %v5240_v24  ;;  %v5255_v24 = vld [vmem:[#allocation29 + $0x6c] ss:$16 sps:$4 sm:$0xff]  }
 0x907   : > { %2430 = vmatpush1.bf16.msra.mxu0 %v5187_v4  ;;  %v5217_v4 = vld [vmem:[#allocation26 + $0x30] ss:$8 sps:$4 sm:$0xff]  }
 0x908   : > { %2431 = vmatprep.subr.bf16.mxu0 %v5192_v5  ;;  %v5222_v5 = vld [vmem:[#allocation26 + $0x44] ss:$8 sps:$4 sm:$0xff]  }
 0x909   : > { %3134 = vmatpush1.bf16.msra.mxu1 %v5238_v25  ;;  %v5253_v25 = vld [vmem:[#allocation29 + $0x68] ss:$16 sps:$4 sm:$0xff]  }
 0x90a   : > { %3135 = vmatprep.subr.bf16.mxu1 %v5246_v26  ;;  %v5261_v26 = vld [vmem:[#allocation29 + $0x8c] ss:$16 sps:$4 sm:$0xff]  }
 0x90b   : > { %2432 = vmatpush1.bf16.msra.mxu0 %v5190_v6  ;;  %v5220_v6 = vld [vmem:[#allocation26 + $0x40] ss:$8 sps:$4 sm:$0xff]  }
 0x90c   : > { %2433 = vmatprep.subr.bf16.mxu0 %v5195_v7  ;;  %v5225_v7 = vld [vmem:[#allocation26 + $0x54] ss:$8 sps:$4 sm:$0xff]  }
 0x90d   : > { %3136 = vmatpush1.bf16.msra.mxu1 %v5244_v27  ;;  %v5259_v27 = vld [vmem:[#allocation29 + $0x88] ss:$16 sps:$4 sm:$0xff]  }
 0x90e   : > { %3137 = vmatprep.subr.bf16.mxu1 %v5252_v28  ;;  %v5267_v28 = vld [vmem:[#allocation29 + $0xac] ss:$16 sps:$4 sm:$0xff]  }
 0x90f   : > { %2434 = vmatpush1.bf16.msra.mxu0 %v5193_v8  ;;  %v5223_v8 = vld [vmem:[#allocation26 + $0x50] ss:$8 sps:$4 sm:$0xff]  }
 0x910   : > { %2435 = vmatprep.subr.bf16.mxu0 %v5198_v9  ;;  %v5228_v9 = vld [vmem:[#allocation26 + $0x64] ss:$8 sps:$4 sm:$0xff]  }
 0x911   : > { %3138 = vmatpush1.bf16.msra.mxu1 %v5250_v29  ;;  %v5265_v29 = vld [vmem:[#allocation29 + $0xa8] ss:$16 sps:$4 sm:$0xff]  }
 0x912   : > { %3139 = vmatprep.subr.bf16.mxu1 %v5258_v0  ;;  %v5273_v0 = vld [vmem:[#allocation29 + $0xcc] ss:$16 sps:$4 sm:$0xff]  }
 0x913   : > { %2436 = vmatpush1.bf16.msra.mxu0 %v5196_v10  ;;  %v5226_v10 = vld [vmem:[#allocation26 + $0x60] ss:$8 sps:$4 sm:$0xff]  }
 0x914   : > { %2437 = vmatprep.subr.bf16.mxu0 %v5201_v11  ;;  %v5231_v11 = vld [vmem:[#allocation26 + $0x74] ss:$8 sps:$4 sm:$0xff]  }
 0x915   : > { %3140 = vmatpush1.bf16.msra.mxu1 %v5256_v31  ;;  %v5271_v31 = vld [vmem:[#allocation29 + $0xc8] ss:$16 sps:$4 sm:$0xff]  }
 0x916   : > { %3141 = vmatprep.subr.bf16.mxu1 %v5264_v32  ;;  %v5279_v32 = vld [vmem:[#allocation29 + $0xec] ss:$16 sps:$4 sm:$0xff]  }
 0x917   : > { %2438 = vmatpush1.bf16.msra.mxu0 %v5199_v12  ;;  %v5229_v12 = vld [vmem:[#allocation26 + $0x70] ss:$8 sps:$4 sm:$0xff]  }
 0x918   : > { %2439 = vmatprep.subr.bf16.mxu0 %v5204_v13  ;;  %v5237_v13 = vld [vmem:[#allocation29 + $0xc] ss:$16 sps:$4 sm:$0xff]  }
 0x919   : > { %3142 = vmatpush1.bf16.msra.mxu1 %v5262_v33  ;;  %v5277_v33 = vld [vmem:[#allocation29 + $0xe8] ss:$16 sps:$4 sm:$0xff]  }
 0x91a   : > { %3143 = vmatprep.subr.bf16.mxu1 %v5270_v34  ;;  %v5285_v34 = vld [vmem:[#allocation29 + $0x10c] ss:$16 sps:$4 sm:$0xff]  }
 0x91b   : > { %2440 = vmatpush1.bf16.msra.mxu0 %v5202_v14 }
 0x91c   : > { %2441 = vmatprep.subr.bf16.mxu0 %v5207_v15  ;;  %v5235_v15 = vld [vmem:[#allocation29 + $0x8] ss:$16 sps:$4 sm:$0xff]  }
 0x91d   : > { %3144 = vmatpush1.bf16.msra.mxu1 %v5268_v35  ;;  %v5283_v35 = vld [vmem:[#allocation29 + $0x108] ss:$16 sps:$4 sm:$0xff]  }
 0x91e   : > { %3145 = vmatprep.subr.bf16.mxu1 %v5276_v36  ;;  %v5291_v36 = vld [vmem:[#allocation29 + $0x12c] ss:$16 sps:$4 sm:$0xff]  }
 0x91f   : > { %2442 = vmatpush1.bf16.msra.mxu0 %v5205_v16 }
 0x920   : > { %2550 = vmatprep.subr.bf16.mxu0 %v5210_v18  ;;  %v5241_v18 = vld [vmem:[#allocation29 + $0x28] ss:$16 sps:$4 sm:$0xff]  }
 0x921   : > { %3146 = vmatpush1.bf16.msra.mxu1 %v5274_v37  ;;  %v5289_v37 = vld [vmem:[#allocation29 + $0x128] ss:$16 sps:$4 sm:$0xff]  }
 0x922   : > { %3147 = vmatprep.subr.bf16.mxu1 %v5282_v38  ;;  %v5294_v38 = vld [vmem:[#allocation29 + $0x144] ss:$16 sps:$4 sm:$0xff]  }
 0x925   : > { %3148 = vmatpush1.bf16.msra.mxu1 %v5280_v39  ;;  %v5297_v39 = vld [vmem:[#allocation29 + $0x14c] ss:$16 sps:$4 sm:$0xff]  }
 0x926   : > { %3149 = vmatprep.subr.bf16.mxu1 %v5288_v40  ;;  %v5292_v40 = vld [vmem:[#allocation29 + $0x140] ss:$16 sps:$4 sm:$0xff]  }
 0x929   : > { %3150 = vmatpush1.bf16.msra.mxu1 %v5286_v41  ;;  %v5295_v41 = vld [vmem:[#allocation29 + $0x148] ss:$16 sps:$4 sm:$0xff]  }
 0x92a   : > { %3151 = vmatprep.subr.bf16.mxu1 %v5294_v38 }
 0x92d   : > { %3152 = vmatpush1.bf16.msra.mxu1 %v5292_v40 }
 0x9d5   : > { %v2219_v44 = vpop.f32.mrb[16].mxu0 }
 0x9d6   : > { %v2275_v45 = vpop.f32.mrb[20].mxu1  ;;  %v4866_v48 = vpop.f32.mrb[17].mxu0 }
 0x9d7   : > { %v2276_v47 = vadd.f32 %v2275_v45, %v2219_v44  ;;  %v4874_v49 = vpop.f32.mrb[21].mxu1  ;;  %v2222_v50 = vpop.f32.mrb[18].mxu0  ;;  %v5300_v44 = vld [vmem:[#allocation29 + $0x164] ss:$16 sps:$4 sm:$0xff]   ;;  %v5303_v45 = vld [vmem:[#allocation29 + $0x16c] ss:$16 sps:$4 sm:$0xff]  }
 0x9d8   : > { %v2278_v51 = vpop.f32.mrb[22].mxu1  ;;  %v4867_v54 = vpop.f32.mrb[19].mxu0  ;;  %3153 = vmatprep.subr.bf16.mxu1 %v5300_v44  ;;  %v5306_v48 = vld [vmem:[#allocation29 + $0x184] ss:$16 sps:$4 sm:$0xff]   ;;  %v5309_v49 = vld [vmem:[#allocation29 + $0x18c] ss:$16 sps:$4 sm:$0xff]  }
 0x9d9   : > { %v2289_v52 = vadd.f32 %v4334_v46, %v2276_v47  ;;  %v2279_v53 = vadd.f32 %v2278_v51, %v2222_v50  ;;  %v4875_v55 = vpop.f32.mrb[23].mxu1  ;;  %v5301_v47 = vld [vmem:[#allocation29 + $0x168] ss:$16 sps:$4 sm:$0xff]   ;;  %v5304_v50 = vld [vmem:[#allocation29 + $0x180] ss:$16 sps:$4 sm:$0xff]  }
 0x9da   : > { %v5307_v51 = vld [vmem:[#allocation29 + $0x188] ss:$16 sps:$4 sm:$0xff]   ;;  %v5310_v54 = vld [vmem:[#allocation29 + $0x1a0] ss:$16 sps:$4 sm:$0xff]  }
 0x9db   : > { %v2291_v56 = vmax.f32 %v2289_v52, 0.0  ;;  %v2290_v57 = vadd.f32 %v4334_v46, %v2279_v53  ;;  %v5298_v46 = vld [vmem:[#allocation29 + $0x160] ss:$16 sps:$4 sm:$0xff]   ;;  %v5312_v52 = vld [vmem:[#allocation29 + $0x1a4] ss:$16 sps:$4 sm:$0xff]  }
 0x9dc   : > { %3154 = vmatpush1.bf16.msra.mxu1 %v5298_v46  ;;  %v5315_v53 = vld [vmem:[#allocation29 + $0x1ac] ss:$16 sps:$4 sm:$0xff]   ;;  %v5313_v55 = vld [vmem:[#allocation29 + $0x1a8] ss:$16 sps:$4 sm:$0xff]  }
 0x9dd   : > { %2307 = vst [vmem:[#allocation5 + $0x8] sm:$0xff] %v2291_v56  ;;  %v2292_v19 = vmax.f32 %v2290_v57, 0.0  ;;  %3155 = vmatprep.subr.bf16.mxu1 %v5306_v48  ;;  %v5321_v57 = vld [vmem:[#allocation29 + $0x1cc] ss:$16 sps:$4 sm:$0xff]  }
 0x9df   : > { %v2304_v58 = vsel %vm2302_vm13, 0.0, %v2292_v19  ;;  %v5316_v19 = vld [vmem:[#allocation29 + $0x1c0] ss:$16 sps:$4 sm:$0xff]  }
 0x9e0   : > { %2308 = vst [vmem:[#allocation5 + $0x10] sm:$0x3f] %v2304_v58  ;;  %3156 = vmatpush1.bf16.msra.mxu1 %v5304_v50  ;;  %v5319_v58 = vld [vmem:[#allocation29 + $0x1c8] ss:$16 sps:$4 sm:$0xff]  }
 0x9e1   : > { %3157 = vmatprep.subr.bf16.mxu1 %v5312_v52  ;;  %v5331_v50 = vld [vmem:[%s7352_s12 + $0x8] ss:$16 sps:$4 sm:$0xff]  }
 0x9e4   : > { %v2312_v60 = vld [vmem:[#allocation5 + $0x7] sm:$0xff]  ;;  %3158 = vmatpush1.bf16.msra.mxu1 %v5310_v54 }
 0x9e7   : > { %v2313_v61 = vld [vmem:[#allocation5 + $0xf] sm:$0x3f] }
 0x9e8   : > { %v2314_v62 = vpack.c.bf16 %v2313_v61, %v2312_v60  ;;  %v2310_v14 = vld [vmem:[#allocation5 + $0x10] sm:$0x3f]  ;;  %v5327_v60 = vld [vmem:[#allocation29 + $0x1ec] ss:$16 sps:$4 sm:$0xff]   ;;  %v5322_v61 = vld [vmem:[#allocation29 + $0x1e0] ss:$16 sps:$4 sm:$0xff]  }
 0x9e9   : > { %v2311_v16 = vpack.c.bf16 %v2310_v14, %v2291_v56  ;;  %v5318_v56 = vld [vmem:[#allocation29 + $0x1c4] ss:$16 sps:$4 sm:$0xff]  }
 0x9ea   : > { %2460 = vmatmul.mubr.bf16.vlgmr.msra.gmra.mrb[20].mxu0 %v2314_v62  ;;  %3159 = vmatprep.subr.bf16.mxu1 %v5318_v56  ;;  %v5325_v62 = vld [vmem:[#allocation29 + $0x1e8] ss:$16 sps:$4 sm:$0xff]  }
 0x9eb   : > { %2551 = vmatpush1.bf16.msra.mxu0 %v5208_v59  ;;  %2582 = vmatprep.mubr.bf16.mxu0 %v6005_v17  ;;  %v5243_v17 = vld [vmem:[#allocation29 + $0x2c] ss:$16 sps:$4 sm:$0xff]   ;;  %v5324_v59 = vld [vmem:[#allocation29 + $0x1e4] ss:$16 sps:$4 sm:$0xff]  }
 0x9ec   : > { %2552 = vmatprep.subr.bf16.mxu0 %v5213_v63  ;;  %3160 = vmatpush1.bf16.msra.mxu1 %v5316_v19  ;;  %v5330_v63 = vld [vmem:[%s7351_s8 + $0x4] ss:$16 sps:$4 sm:$0xff]   ;;  %v5339_v56 = vld [vmem:[%s7352_s12 + $0x2c] ss:$16 sps:$4 sm:$0xff]   ;;  %v5334_v19 = vld [vmem:[%s7352_s12 + $0x20] ss:$16 sps:$4 sm:$0xff]  }
 0x9ed   : > { %3161 = vmatprep.subr.bf16.mxu1 %v5324_v59  ;;  %v5342_v59 = vld [vmem:[%s7352_s12 + $0x44] ss:$16 sps:$4 sm:$0xff]  }
 0x9ef   : > { %2553 = vmatpush1.bf16.msra.mxu0 %v5211_v1  ;;  %v5333_v1 = vld [vmem:[%s7352_s12 + $0xc] ss:$16 sps:$4 sm:$0xff]  }
 0x9f0   : > { %2554 = vmatprep.subr.bf16.mxu0 %v5216_v30  ;;  %3162 = vmatpush1.bf16.msra.mxu1 %v5322_v61  ;;  %v2593_v30 = vld [vmem:[%s7353_s30] sm:$0x3] }
 0x9f1   : > { %3537 = vmatprep.subr.bf16.mxu1 %v5330_v63  ;;  %v5340_v61 = vld [vmem:[%s7352_s12 + $0x40] ss:$16 sps:$4 sm:$0xff]   ;;  %v5348_v63 = vld [vmem:[%s7352_s12 + $0x64] ss:$16 sps:$4 sm:$0xff]  }
 0x9f3   : > { %2555 = vmatpush1.bf16.msra.mxu0 %v5214_v2  ;;  %v2601_v2 = vsub.s32 1, %v6843_v20 }
 0x9f4   : > { %2556 = vmatprep.subr.bf16.mxu0 %v5219_v3  ;;  %v2598_v3 = vrot.slane %v2593_v30, %v6846_v22 }
 0x9f7   : > { %2557 = vmatpush1.bf16.msra.mxu0 %v5217_v4  ;;  %v2602_v4 = vrot.slane %v2593_v30, %v2601_v2  ;;  %v5346_v30 = vld [vmem:[%s7352_s12 + $0x60] ss:$16 sps:$4 sm:$0xff]  }
 0x9f8   : > { %2558 = vmatprep.subr.bf16.mxu0 %v5222_v5  ;;  %v2613_v5 = vadd.s32 128, %v6902_v43  ;;  %v2639_v43 = vld [vmem:[#allocation6 + $0x8] sm:$0x80] }
 0x9fa   : > { %vm2615_vm14 = vcmp.ge.s32.totalorder %v2613_v5, 248  ;;  %v5357_v5 = vld [vmem:[%s7352_s12 + $0x8c] ss:$16 sps:$4 sm:$0xff]  }
 0x9fb   : > { %2559 = vmatpush1.bf16.msra.mxu0 %v5220_v6  ;;  %vm2619_vm15 = vmand %vm2299_vm11, %vm2615_vm14 }
 0x9fc   : > { %2560 = vmatprep.subr.bf16.mxu0 %v5225_v7 }
 0x9ff   : > { %2561 = vmatpush1.bf16.msra.mxu0 %v5223_v8 }
 0xa00   : > { %2562 = vmatprep.subr.bf16.mxu0 %v5228_v9 }
 0xa03   : > { %2563 = vmatpush1.bf16.msra.mxu0 %v5226_v10 }
 0xa04   : > { %2564 = vmatprep.subr.bf16.mxu0 %v5231_v11 }
 0xa07   : > { %2565 = vmatpush1.bf16.msra.mxu0 %v5229_v12 }
 0xa08   : > { %3174 = vmatprep.subr.bf16.mxu0 %v5237_v13 }
 0xa0a   : > { %2583 = vmatmul.mubr.bf16.vlgmr.msra.gmra.mrb[20].mxu0 %v2311_v16 }
 0xa0b   : > { %3175 = vmatpush1.bf16.msra.mxu0 %v5235_v15 }
 0xa0c   : > { %3176 = vmatprep.subr.bf16.mxu0 %v5243_v17 }
 0xa0f   : > { %3177 = vmatpush1.bf16.msra.mxu0 %v5241_v18 }
 0xa10   : > { %3178 = vmatprep.subr.bf16.mxu0 %v5249_v21  ;;  %v2638_v21 = vld [vmem:[#allocation6] sm:$0x80] }
 0xa13   : > { %3179 = vmatpush1.bf16.msra.mxu0 %v5247_v23 }
 0xa14   : > { %3180 = vmatprep.subr.bf16.mxu0 %v5255_v24 }
 0xa17   : > { %3181 = vmatpush1.bf16.msra.mxu0 %v5253_v25 }
 0xa18   : > { %3182 = vmatprep.subr.bf16.mxu0 %v5261_v26 }
 0xa1b   : > { %3183 = vmatpush1.bf16.msra.mxu0 %v5259_v27 }
 0xa1c   : > { %3184 = vmatprep.subr.bf16.mxu0 %v5267_v28 }
 0xa1f   : > { %3185 = vmatpush1.bf16.msra.mxu0 %v5265_v29 }
 0xa20   : > { %3186 = vmatprep.subr.bf16.mxu0 %v5273_v0 }
 0xa23   : > { %3187 = vmatpush1.bf16.msra.mxu0 %v5271_v31 }
 0xa24   : > { %3188 = vmatprep.subr.bf16.mxu0 %v5279_v32 }
 0xa27   : > { %3189 = vmatpush1.bf16.msra.mxu0 %v5277_v33 }
 0xa28   : > { %3190 = vmatprep.subr.bf16.mxu0 %v5285_v34 }
 0xa2b   : > { %3191 = vmatpush1.bf16.msra.mxu0 %v5283_v35 }
 0xa2c   : > { %3192 = vmatprep.subr.bf16.mxu0 %v5291_v36 }
 0xa2f   : > { %3193 = vmatpush1.bf16.msra.mxu0 %v5289_v37 }
 0xa30   : > { %3194 = vmatprep.subr.bf16.mxu0 %v5297_v39 }
 0xa33   : > { %3195 = vmatpush1.bf16.msra.mxu0 %v5295_v41 }
 0xa34   : > { %3196 = vmatprep.subr.bf16.mxu0 %v5303_v45 }
 0xa37   : > { %3197 = vmatpush1.bf16.msra.mxu0 %v5301_v47 }
 0xa38   : > { %3198 = vmatprep.subr.bf16.mxu0 %v5309_v49  ;;  %v5328_v49 = vld [vmem:[%s7352_s12] ss:$16 sps:$4 sm:$0xff]  }
 0xa3b   : > { %3199 = vmatpush1.bf16.msra.mxu0 %v5307_v51 }
 0xa3c   : > { %3200 = vmatprep.subr.bf16.mxu0 %v5315_v53 }
 0xa3f   : > { %3201 = vmatpush1.bf16.msra.mxu0 %v5313_v55  ;;  %v5336_v55 = vld [vmem:[%s7352_s12 + $0x24] ss:$16 sps:$4 sm:$0xff]  }
 0xa40   : > { %3202 = vmatprep.subr.bf16.mxu0 %v5321_v57 }
 0xa43   : > { %3203 = vmatpush1.bf16.msra.mxu0 %v5319_v58  ;;  %v5337_v58 = vld [vmem:[%s7352_s12 + $0x28] ss:$16 sps:$4 sm:$0xff]  }
 0xa44   : > { %3204 = vmatprep.subr.bf16.mxu0 %v5327_v60  ;;  %v5345_v60 = vld [vmem:[%s7352_s12 + $0x4c] ss:$16 sps:$4 sm:$0xff]  }
 0xa47   : > { %3205 = vmatpush1.bf16.msra.mxu0 %v5325_v62  ;;  %v5343_v62 = vld [vmem:[%s7352_s12 + $0x48] ss:$16 sps:$4 sm:$0xff]  }
 0xa48   : > { %3580 = vmatprep.subr.bf16.mxu0 %v5333_v1  ;;  %v5351_v1 = vld [vmem:[%s7352_s12 + $0x6c] ss:$16 sps:$4 sm:$0xff]  }
 0xadd   : > { %v2584_v6 = vpop.f32.mrb[20].mxu0 }
 0xade   : > { %v6923_v7 = vadd.f32 %v2598_v3, %v2584_v6  ;;  %v2586_v8 = vpop.f32.mrb[21].mxu0  ;;  %v5352_v6 = vld [vmem:[%s7352_s12 + $0x80] ss:$16 sps:$4 sm:$0xff]  }
 0xadf   : > { %v2606_v9 = vadd.f32 %v2602_v4, %v2586_v8  ;;  %v2588_v10 = vpop.f32.mrb[22].mxu0  ;;  %v5355_v8 = vld [vmem:[%s7352_s12 + $0x88] ss:$16 sps:$4 sm:$0xff]  }
 0xae0   : > { %v2609_v11 = vmax.f32 %v6923_v7, 0.0  ;;  %v2607_v12 = vadd.f32 %v2598_v3, %v2588_v10  ;;  %v2590_v13 = vpop.f32.mrb[23].mxu0  ;;  %v5349_v3 = vld [vmem:[%s7352_s12 + $0x68] ss:$16 sps:$4 sm:$0xff]   ;;  %v5363_v10 = vld [vmem:[%s7352_s12 + $0xac] ss:$16 sps:$4 sm:$0xff]  }
 0xae1   : > { %v2610_v14 = vmax.f32 %v2606_v9, 0.0  ;;  %v2608_v15 = vadd.f32 %v2602_v4, %v2590_v13  ;;  %v5354_v4 = vld [vmem:[%s7352_s12 + $0x84] ss:$16 sps:$4 sm:$0xff]   ;;  %v5361_v13 = vld [vmem:[%s7352_s12 + $0xa8] ss:$16 sps:$4 sm:$0xff]  }
 0xae2   : > { %v2611_v16 = vmax.f32 %v2607_v12, 0.0  ;;  %v2642_v24 = vpack.c.bf16 %v2609_v11, %v2638_v21  ;;  %v5360_v9 = vld [vmem:[%s7352_s12 + $0xa4] ss:$16 sps:$4 sm:$0xff]   ;;  %v5358_v12 = vld [vmem:[%s7352_s12 + $0xa0] ss:$16 sps:$4 sm:$0xff]  }
 0xae3   : > { %v2612_v17 = vmax.f32 %v2608_v15, 0.0  ;;  %v2643_v23 = vpack.c.bf16 %v2610_v14, %v2639_v43  ;;  %v5369_v15 = vld [vmem:[%s7352_s12 + $0xcc] ss:$16 sps:$4 sm:$0xff]   ;;  %v5372_v43 = vld [vmem:[%s7352_s12 + $0xe4] ss:$16 sps:$4 sm:$0xff]  }
 0xae4   : > { %2630 = vst [vmem:[#allocation6 + $0x20] sm:$0x3f] %v2611_v16  ;;  %v2776_v0 = vshrl.u32 %v2642_v24, 16  ;;  %v2779_v31 = vshll.u32 %v2642_v24, 16  ;;  %v5364_v16 = vld [vmem:[%s7352_s12 + $0xc0] ss:$16 sps:$4 sm:$0xff]  }
 0xae5   : > { %v2623_v18 = vsel %vm2619_vm15, 0.0, %v2612_v17  ;;  %v2793_v25 = vshrl.u32 %v2643_v23, 16  ;;  %v2796_v26 = vshll.u32 %v2643_v23, 16  ;;  %v5367_v17 = vld [vmem:[%s7352_s12 + $0xc8] ss:$16 sps:$4 sm:$0xff]   ;;  %v5429_v7 = vld [vmem:[%s7354_s19 + $0x10] sm:$0xff]  }
 0xae6   : > { %2631 = vst [vmem:[#allocation6 + $0x28] sm:$0x3f] %v2623_v18  ;;  %v2778_v40 = vrot.slane %v2776_v0, 3  ;;  %v2781_v41 = vrot.slane %v2779_v31, 4  ;;  %v5375_v18 = vld [vmem:[%s7352_s12 + $0xec] ss:$16 sps:$4 sm:$0xff]  }
 0xae7   : > { %v2795_v34 = vrot.slane %v2793_v25, 3  ;;  %v2798_v35 = vrot.slane %v2796_v26, 4  ;;  %v5370_v21 = vld [vmem:[%s7352_s12 + $0xe0] ss:$16 sps:$4 sm:$0xff]   ;;  %v5373_v23 = vld [vmem:[%s7352_s12 + $0xe8] ss:$16 sps:$4 sm:$0xff]  }
 0xae8   : > { %v2782_v51 = vor.u32 %v2781_v41, %v2778_v40  ;;  %v5378_v24 = vld [vmem:[%s7352_s12 + $0x104] ss:$16 sps:$4 sm:$0xff]   ;;  %v5381_v25 = vld [vmem:[%s7352_s12 + $0x10c] ss:$16 sps:$4 sm:$0xff]   ;;  %v5376_v26 = vld [vmem:[%s7352_s12 + $0x100] ss:$16 sps:$4 sm:$0xff]  }
 0xae9   : > { %v2799_v47 = vor.u32 %v2798_v35, %v2795_v34  ;;  %v5382_v0 = vld [vmem:[%s7352_s12 + $0x120] ss:$16 sps:$4 sm:$0xff]   ;;  %v5385_v31 = vld [vmem:[%s7352_s12 + $0x128] ss:$16 sps:$4 sm:$0xff]   ;;  %v5396_v35 = vld [vmem:[%s7352_s12 + $0x164] ss:$16 sps:$4 sm:$0xff]  }
 0xaea   : > { %v5391_v34 = vld [vmem:[%s7352_s12 + $0x148] ss:$16 sps:$4 sm:$0xff]   ;;  %v5405_v40 = vld [vmem:[%s7352_s12 + $0x18c] ss:$16 sps:$4 sm:$0xff]   ;;  %v5400_v41 = vld [vmem:[%s7352_s12 + $0x180] ss:$16 sps:$4 sm:$0xff]  }
 0xaeb   : > { %v2640_v27 = vld [vmem:[#allocation6 + $0x20] sm:$0x1f] }
 0xaec   : > { %v2644_v28 = vpack.c.bf16 %v2640_v27, %v2640_v27  ;;  %v5379_v27 = vld [vmem:[%s7352_s12 + $0x108] ss:$16 sps:$4 sm:$0xff]  }
 0xaed   : > { %v2641_v29 = vld [vmem:[#allocation6 + $0x28] sm:$0x1f] }
 0xaee   : > { %v2645_v32 = vpack.c.bf16 %v2641_v29, %v2641_v29  ;;  %v2784_v42 = vshrl.u32 %v2644_v28, 16  ;;  %v2787_v33 = vshll.u32 %v2644_v28, 16  ;;  %v2635_v52 = vld [vmem:[#allocation6 + $0x28] sm:$0x3f]  ;;  %v5384_v28 = vld [vmem:[%s7352_s12 + $0x124] ss:$16 sps:$4 sm:$0xff]  }
 0xaef   : > { %v2637_v57 = vpack.c.bf16 %v2635_v52, %v2610_v14  ;;  %v5366_v14 = vld [vmem:[%s7352_s12 + $0xc4] ss:$16 sps:$4 sm:$0xff]   ;;  %v5387_v29 = vld [vmem:[%s7352_s12 + $0x12c] ss:$16 sps:$4 sm:$0xff]   ;;  %v5415_v52 = vld [vmem:[%s7352_s12 + $0x1c8] ss:$16 sps:$4 sm:$0xff]  }
 0xaf0   : > { %v2801_v36 = vshrl.u32 %v2645_v32, 16  ;;  %v2804_v37 = vshll.u32 %v2645_v32, 16  ;;  %v2786_v38 = vrot.slane %v2784_v42, 3  ;;  %v2789_v39 = vrot.slane %v2787_v33, 4  ;;  %v5390_v32 = vld [vmem:[%s7352_s12 + $0x144] ss:$16 sps:$4 sm:$0xff]  }
 0xaf1   : > { %v5393_v42 = vld [vmem:[%s7352_s12 + $0x14c] ss:$16 sps:$4 sm:$0xff]   ;;  %v5388_v33 = vld [vmem:[%s7352_s12 + $0x140] ss:$16 sps:$4 sm:$0xff]  }
 0xaf2   : > { %v2803_v44 = vrot.slane %v2801_v36, 3  ;;  %v2806_v45 = vrot.slane %v2804_v37, 4  ;;  %v2790_v46 = vor.u32 %v2789_v39, %v2786_v38  ;;  %v5399_v36 = vld [vmem:[%s7352_s12 + $0x16c] ss:$16 sps:$4 sm:$0xff]   ;;  %v5394_v37 = vld [vmem:[%s7352_s12 + $0x160] ss:$16 sps:$4 sm:$0xff]  }
 0xaf3   : > { %v5397_v38 = vld [vmem:[%s7352_s12 + $0x168] ss:$16 sps:$4 sm:$0xff]   ;;  %v5402_v39 = vld [vmem:[%s7352_s12 + $0x184] ss:$16 sps:$4 sm:$0xff]  }
 0xaf4   : > { %v2807_v48 = vor.u32 %v2806_v45, %v2803_v44  ;;  %v2791_v54 = vsel %vm2774_vm0, %v2782_v51, %v2790_v46  ;;  %v5403_v44 = vld [vmem:[%s7352_s12 + $0x188] ss:$16 sps:$4 sm:$0xff]   ;;  %v5408_v45 = vld [vmem:[%s7352_s12 + $0x1a4] ss:$16 sps:$4 sm:$0xff]   ;;  %v5411_v46 = vld [vmem:[%s7352_s12 + $0x1ac] ss:$16 sps:$4 sm:$0xff]  }
 0xaf5   : > { %v5412_v51 = vld [vmem:[%s7352_s12 + $0x1c0] ss:$16 sps:$4 sm:$0xff]  }
 0xaf6   : > { %v2808_v53 = vsel %vm2774_vm0, %v2799_v47, %v2807_v48  ;;  %v5406_v47 = vld [vmem:[%s7352_s12 + $0x1a0] ss:$16 sps:$4 sm:$0xff]   ;;  %v5409_v48 = vld [vmem:[%s7352_s12 + $0x1a8] ss:$16 sps:$4 sm:$0xff]  }
 0xaf7   : > { %3163 = vmatprep.mubr.bf16.mxu1 %v2808_v53  ;;  %3206 = vmatprep.mubr.bf16.mxu0 %v2808_v53  ;;  %v5420_v53 = vld [vmem:[%s7352_s12 + $0x1e4] ss:$16 sps:$4 sm:$0xff]  }
 0xaf8   : > { %3164 = vmatmul.mubr.bf16.vlgmr.msra.gmra.mrb[24].mxu1 %v2791_v54  ;;  %3207 = vmatmul.mubr.bf16.vlgmr.msra.gmra.mrb[24].mxu0 %v2791_v54  ;;  %v5423_v54 = vld [vmem:[%s7352_s12 + $0x1ec] ss:$16 sps:$4 sm:$0xff]  }
 0xaf9   : > { %3538 = vmatpush1.bf16.msra.mxu1 %v5328_v49  ;;  %3581 = vmatpush1.bf16.msra.mxu0 %v5331_v50  ;;  %v5414_v49 = vld [vmem:[%s7352_s12 + $0x1c4] ss:$16 sps:$4 sm:$0xff]   ;;  %v5417_v50 = vld [vmem:[%s7352_s12 + $0x1cc] ss:$16 sps:$4 sm:$0xff]  }
 0xafa   : > { %3569 = vmatprep.mubr.bf16.mxu1 %v2637_v57  ;;  %3612 = vmatprep.mubr.bf16.mxu0 %v2637_v57  ;;  %v5424_v57 = vld [vmem:[%s7354_s19 + $0x40] sm:$0xff]  }
 0xafb   : > { %3539 = vmatprep.subr.bf16.mxu1 %v5336_v55  ;;  %3582 = vmatprep.subr.bf16.mxu0 %v5339_v56  ;;  %v5418_v55 = vld [vmem:[%s7352_s12 + $0x1e0] ss:$16 sps:$4 sm:$0xff]   ;;  %v5421_v56 = vld [vmem:[%s7352_s12 + $0x1e8] ss:$16 sps:$4 sm:$0xff]  }
 0xafd   : > { %3540 = vmatpush1.bf16.msra.mxu1 %v5334_v19  ;;  %3583 = vmatpush1.bf16.msra.mxu0 %v5337_v58  ;;  %v2634_v19 = vld [vmem:[#allocation6 + $0x20] sm:$0x3f] }
 0xafe   : > { %3541 = vmatprep.subr.bf16.mxu1 %v5342_v59  ;;  %3584 = vmatprep.subr.bf16.mxu0 %v5345_v60  ;;  %v5425_v58 = vld [vmem:[%s7354_s19] sm:$0xff]   ;;  %v2636_v59 = vpack.c.bf16 %v2634_v19, %v2609_v11  ;;  %v5426_v60 = vld [vmem:[%s7354_s19 + $0x48] sm:$0xff]   ;;  %v5430_v11 = vld [vmem:[%s7354_s19 + $0x58] sm:$0xff]  }
 0xaff   : > { %v5452_v19 = vld [vmem:[%s7354_s19 + $0xf0] sm:$0xff]  }
 0xb01   : > { %3542 = vmatpush1.bf16.msra.mxu1 %v5340_v61  ;;  %3585 = vmatpush1.bf16.msra.mxu0 %v5343_v62  ;;  %v5427_v61 = vld [vmem:[%s7354_s19 + $0x8] sm:$0xff]   ;;  %v5428_v62 = vld [vmem:[%s7354_s19 + $0x50] sm:$0xff]  }
 0xb02   : > { %3543 = vmatprep.subr.bf16.mxu1 %v5348_v63  ;;  %3586 = vmatprep.subr.bf16.mxu0 %v5351_v1  ;;  %v5431_v63 = vld [vmem:[%s7354_s19 + $0x18] sm:$0xff]   ;;  %v5432_v1 = vld [vmem:[%s7354_s19 + $0x60] sm:$0xff]  }
 0xb05   : > { %3544 = vmatpush1.bf16.msra.mxu1 %v5346_v30  ;;  %3587 = vmatpush1.bf16.msra.mxu0 %v5349_v3  ;;  %v5433_v30 = vld [vmem:[%s7354_s19 + $0x20] sm:$0xff]   ;;  %v5434_v3 = vld [vmem:[%s7354_s19 + $0x68] sm:$0xff]  }
 0xb06   : > { %3545 = vmatprep.subr.bf16.mxu1 %v5354_v4  ;;  %3588 = vmatprep.subr.bf16.mxu0 %v5357_v5  ;;  %v5435_v4 = vld [vmem:[%s7354_s19 + $0x28] sm:$0xff]   ;;  %v5436_v5 = vld [vmem:[%s7354_s19 + $0x70] sm:$0xff]  }
 0xb09   : > { %3546 = vmatpush1.bf16.msra.mxu1 %v5352_v6  ;;  %3589 = vmatpush1.bf16.msra.mxu0 %v5355_v8  ;;  %v5437_v6 = vld [vmem:[%s7354_s19 + $0x30] sm:$0xff]   ;;  %v5438_v8 = vld [vmem:[%s7354_s19 + $0x78] sm:$0xff]  }
 0xb0a   : > { %3547 = vmatprep.subr.bf16.mxu1 %v5360_v9  ;;  %3590 = vmatprep.subr.bf16.mxu0 %v5363_v10  ;;  %v5439_v9 = vld [vmem:[%s7354_s19 + $0x38] sm:$0xff]   ;;  %v5440_v10 = vld [vmem:[%s7354_s19 + $0xc0] sm:$0xff]  }
 0xb0d   : > { %3548 = vmatpush1.bf16.msra.mxu1 %v5358_v12  ;;  %3591 = vmatpush1.bf16.msra.mxu0 %v5361_v13  ;;  %v3635_v12 = vsub.s32 2, %v6843_v20  ;;  %v3623_v13 = vld [vmem:[#allocation30] sm:$0xf] }
 0xb0e   : > { %3549 = vmatprep.subr.bf16.mxu1 %v5366_v14  ;;  %3592 = vmatprep.subr.bf16.mxu0 %v5369_v15  ;;  %v3639_v14 = vsub.s32 3, %v6843_v20  ;;  %v3628_v15 = vrot.slane %v3623_v13, %v6846_v22 }
 0xb11   : > { %3550 = vmatpush1.bf16.msra.mxu1 %v5364_v16  ;;  %3593 = vmatpush1.bf16.msra.mxu0 %v5367_v17  ;;  %v3636_v16 = vrot.slane %v3623_v13, %v3635_v12  ;;  %v3632_v17 = vrot.slane %v3623_v13, %v2601_v2 }
 0xb12   : > { %3551 = vmatprep.subr.bf16.mxu1 %v5372_v43  ;;  %3594 = vmatprep.subr.bf16.mxu0 %v5375_v18  ;;  %v3640_v43 = vrot.slane %v3623_v13, %v3639_v14 }
 0xb15   : > { %3552 = vmatpush1.bf16.msra.mxu1 %v5370_v21  ;;  %3595 = vmatpush1.bf16.msra.mxu0 %v5373_v23 }
 0xb16   : > { %3553 = vmatprep.subr.bf16.mxu1 %v5378_v24  ;;  %3596 = vmatprep.subr.bf16.mxu0 %v5381_v25 }
 0xb19   : > { %3554 = vmatpush1.bf16.msra.mxu1 %v5376_v26  ;;  %3597 = vmatpush1.bf16.msra.mxu0 %v5379_v27 }
 0xb1a   : > { %3555 = vmatprep.subr.bf16.mxu1 %v5384_v28  ;;  %3598 = vmatprep.subr.bf16.mxu0 %v5387_v29 }
 0xb1d   : > { %3556 = vmatpush1.bf16.msra.mxu1 %v5382_v0  ;;  %3599 = vmatpush1.bf16.msra.mxu0 %v5385_v31 }
 0xb1e   : > { %3557 = vmatprep.subr.bf16.mxu1 %v5390_v32  ;;  %3600 = vmatprep.subr.bf16.mxu0 %v5393_v42 }
 0xb21   : > { %3558 = vmatpush1.bf16.msra.mxu1 %v5388_v33  ;;  %3601 = vmatpush1.bf16.msra.mxu0 %v5391_v34 }
 0xb22   : > { %3559 = vmatprep.subr.bf16.mxu1 %v5396_v35  ;;  %3602 = vmatprep.subr.bf16.mxu0 %v5399_v36 }
 0xb25   : > { %3560 = vmatpush1.bf16.msra.mxu1 %v5394_v37  ;;  %3603 = vmatpush1.bf16.msra.mxu0 %v5397_v38 }
 0xb26   : > { %3561 = vmatprep.subr.bf16.mxu1 %v5402_v39  ;;  %3604 = vmatprep.subr.bf16.mxu0 %v5405_v40 }
 0xb29   : > { %3562 = vmatpush1.bf16.msra.mxu1 %v5400_v41  ;;  %3605 = vmatpush1.bf16.msra.mxu0 %v5403_v44 }
 0xb2a   : > { %3563 = vmatprep.subr.bf16.mxu1 %v5408_v45  ;;  %3606 = vmatprep.subr.bf16.mxu0 %v5411_v46 }
 0xb2d   : > { %3564 = vmatpush1.bf16.msra.mxu1 %v5406_v47  ;;  %3607 = vmatpush1.bf16.msra.mxu0 %v5409_v48  ;;  %v5441_v47 = vld [vmem:[%s7354_s19 + $0x80] sm:$0xff]   ;;  %v5442_v48 = vld [vmem:[%s7354_s19 + $0xc8] sm:$0xff]  }
 0xb2e   : > { %3565 = vmatprep.subr.bf16.mxu1 %v5414_v49  ;;  %3608 = vmatprep.subr.bf16.mxu0 %v5417_v50  ;;  %v5443_v49 = vld [vmem:[%s7354_s19 + $0x88] sm:$0xff]   ;;  %v5444_v50 = vld [vmem:[%s7354_s19 + $0xd0] sm:$0xff]  }
 0xb31   : > { %3566 = vmatpush1.bf16.msra.mxu1 %v5412_v51  ;;  %3609 = vmatpush1.bf16.msra.mxu0 %v5415_v52  ;;  %v5445_v51 = vld [vmem:[%s7354_s19 + $0x90] sm:$0xff]   ;;  %v5446_v52 = vld [vmem:[%s7354_s19 + $0xd8] sm:$0xff]  }
 0xb32   : > { %3567 = vmatprep.subr.bf16.mxu1 %v5420_v53  ;;  %3610 = vmatprep.subr.bf16.mxu0 %v5423_v54  ;;  %v5447_v53 = vld [vmem:[%s7354_s19 + $0x98] sm:$0xff]   ;;  %v5448_v54 = vld [vmem:[%s7354_s19 + $0xe0] sm:$0xff]  }
 0xb35   : > { %3568 = vmatpush1.bf16.msra.mxu1 %v5418_v55  ;;  %3611 = vmatpush1.bf16.msra.mxu0 %v5421_v56  ;;  %v5449_v55 = vld [vmem:[%s7354_s19 + $0xa0] sm:$0xff]   ;;  %v5450_v56 = vld [vmem:[%s7354_s19 + $0xe8] sm:$0xff]  }
 0xb36   : > { %4627 = vmatprep.subr.bf16.mxu1 %v5424_v57  ;;  %v5451_v57 = vld [vmem:[%s7354_s19 + $0xa8] sm:$0xff]  }
 0xb38   : > { %3570 = vmatmul.mubr.bf16.vlgmr.msra.gmra.mrb[24].mxu1 %v2636_v59  ;;  %3613 = vmatmul.mubr.bf16.vlgmr.msra.gmra.mrb[24].mxu0 %v2636_v59  ;;  %v5454_v59 = vld [vmem:[%s7354_s19 + $0xf8] sm:$0xff]  }
 0xb39   : > { %4628 = vmatpush3.bf16.msra.mxu1 %v5425_v58  ;;  %v5453_v58 = vld [vmem:[%s7354_s19 + $0xb0] sm:$0xff]  }
 0xb3a   : > { %4629 = vmatprep.subr.bf16.mxu1 %v5426_v60  ;;  %v5455_v60 = vld [vmem:[%s7354_s19 + $0xb8] sm:$0xff]  }
 0xb3d   : > { %4630 = vmatpush3.bf16.msra.mxu1 %v5427_v61 }
 0xb3e   : > { %4631 = vmatprep.subr.bf16.mxu1 %v5428_v62 }
 0xb41   : > { %4632 = vmatpush3.bf16.msra.mxu1 %v5429_v7 }
 0xb42   : > { %4633 = vmatprep.subr.bf16.mxu1 %v5430_v11 }
 0xb45   : > { %4634 = vmatpush3.bf16.msra.mxu1 %v5431_v63 }
 0xb46   : > { %4635 = vmatprep.subr.bf16.mxu1 %v5432_v1 }
 0xb49   : > { %4636 = vmatpush3.bf16.msra.mxu1 %v5433_v30  ;;  %v4495_v30 = vld [vmem:[#allocation32] ss:$0 sm:$0xff] }
 0xb4a   : > { %4637 = vmatprep.subr.bf16.mxu1 %v5434_v3 }
 0xb4d   : > { %4638 = vmatpush3.bf16.msra.mxu1 %v5435_v4 }
 0xb4e   : > { %4639 = vmatprep.subr.bf16.mxu1 %v5436_v5 }
 0xb51   : > { %4640 = vmatpush3.bf16.msra.mxu1 %v5437_v6 }
 0xb52   : > { %4641 = vmatprep.subr.bf16.mxu1 %v5438_v8 }
 0xb55   : > { %4642 = vmatpush3.bf16.msra.mxu1 %v5439_v9 }
 0xb56   : > { %4649 = vmatprep.subr.bf16.mxu1 %v5440_v10 }
 0xc0b   : > { %v3571_v18 = vpop.f32.mrb[24].mxu1  ;;  %v3614_v21 = vpop.f32.mrb[24].mxu0 }
 0xc0c   : > { %v3645_v23 = vadd.f32 %v3628_v15, %v3571_v18  ;;  %v3647_v24 = vadd.f32 %v3636_v16, %v3614_v21  ;;  %v3573_v25 = vpop.f32.mrb[25].mxu1  ;;  %v3616_v26 = vpop.f32.mrb[25].mxu0 }
 0xc0d   : > { %v3646_v27 = vadd.f32 %v3632_v17, %v3573_v25  ;;  %v3648_v28 = vadd.f32 %v3640_v43, %v3616_v26  ;;  %v3575_v29 = vpop.f32.mrb[26].mxu1  ;;  %v3618_v0 = vpop.f32.mrb[26].mxu0 }
 0xc0e   : > { %v3649_v31 = vadd.f32 %v3628_v15, %v3575_v29  ;;  %v3651_v32 = vadd.f32 %v3636_v16, %v3618_v0  ;;  %v3577_v42 = vpop.f32.mrb[27].mxu1  ;;  %v3620_v33 = vpop.f32.mrb[27].mxu0  ;;  %v3653_v35 = vmax.f32 %v3645_v23, 0.0  ;;  %v3655_v20 = vmax.f32 %v3647_v24, 0.0 }
 0xc0f   : > { %v3650_v22 = vadd.f32 %v3632_v17, %v3577_v42  ;;  %v3652_v34 = vadd.f32 %v3640_v43, %v3620_v33  ;;  %v3654_v37 = vmax.f32 %v3646_v27, 0.0  ;;  %v3656_v38 = vmax.f32 %v3648_v28, 0.0 }
 0xc10   : > { %v3657_v2 = vmax.f32 %v3649_v31, 0.0  ;;  %v3659_v36 = vmax.f32 %v3651_v32, 0.0 }
 0xc11   : > { %v3658_v39 = vmax.f32 %v3650_v22, 0.0  ;;  %v3660_v40 = vmax.f32 %v3652_v34, 0.0 }
 0xc12   : > { %v3661_v41 = vpack.c.bf16 %v3657_v2, %v3653_v35  ;;  %v3663_v44 = vpack.c.bf16 %v3659_v36, %v3655_v20 }
 0xc13   : > { %v3662_v45 = vpack.c.bf16 %v3658_v39, %v3654_v37  ;;  %v3664_v46 = vpack.c.bf16 %v3660_v40, %v3656_v38 }
 0xc15   : > { %3960 = vmatprep.mubr.bf16.mxu1 %v3662_v45 }
 0xc16   : > { %3961 = vmatmul.mubr.bf16.vlgmr.msra.gmra.mrb[28].mxu1 %v3661_v41 }
 0xc17   : > { %4650 = vmatpush3.bf16.msra.mxu1 %v5441_v47  ;;  %4001 = vmatprep.mubr.bf16.mxu1 %v3664_v46 }
 0xc18   : > { %4651 = vmatprep.subr.bf16.mxu1 %v5442_v48 }
 0xc1b   : > { %4652 = vmatpush3.bf16.msra.mxu1 %v5443_v49 }
 0xc1c   : > { %4653 = vmatprep.subr.bf16.mxu1 %v5444_v50 }
 0xc1f   : > { %4654 = vmatpush3.bf16.msra.mxu1 %v5445_v51 }
 0xc20   : > { %4655 = vmatprep.subr.bf16.mxu1 %v5446_v52 }
 0xc23   : > { %4656 = vmatpush3.bf16.msra.mxu1 %v5447_v53 }
 0xc24   : > { %4657 = vmatprep.subr.bf16.mxu1 %v5448_v54 }
 0xc27   : > { %4658 = vmatpush3.bf16.msra.mxu1 %v5449_v55 }
 0xc28   : > { %4659 = vmatprep.subr.bf16.mxu1 %v5450_v56 }
 0xc2b   : > { %4660 = vmatpush3.bf16.msra.mxu1 %v5451_v57 }
 0xc2c   : > { %4661 = vmatprep.subr.bf16.mxu1 %v5452_v19 }
 0xc2f   : > { %4662 = vmatpush3.bf16.msra.mxu1 %v5453_v58 }
 0xc30   : > { %4663 = vmatprep.subr.bf16.mxu1 %v5454_v59 }
 0xc33   : > { %4664 = vmatpush3.bf16.msra.mxu1 %v5455_v60 }
 0xc36   : > { %4002 = vmatmul.mubr.bf16.vlgmr.msra.gmra.mrb[32].mxu1 %v3663_v44 }
 0xce9   : > { %v4643_v61 = vpop.f32.mrb[28].mxu1 }
 0xcea   : > { %v4644_v62 = vpop.f32.mrb[29].mxu1 }
 0xceb   : > { %v4645_v7 = vadd.f32 %v4644_v62, %v4643_v61  ;;  %v4646_v11 = vpop.f32.mrb[30].mxu1 }
 0xcec   : > { %v4647_v63 = vpop.f32.mrb[31].mxu1 }
 0xced   : > { %v4648_v1 = vadd.f32 %v4647_v63, %v4646_v11  ;;  %v3963_v5 = vadd.f32 %v4645_v7, %v4495_v30 }
 0xcef   : > { %v3966_v10 = vadd.f32 %v4648_v1, %v4495_v30 }
 0xd09   : > { %v4665_v3 = vpop.f32.mrb[32].mxu1 }
 0xd0a   : > { %v4666_v4 = vpop.f32.mrb[33].mxu1 }
 0xd0b   : > { %v4667_v6 = vadd.f32 %v4666_v4, %v4665_v3  ;;  %v4668_v8 = vpop.f32.mrb[34].mxu1 }
 0xd0c   : > { %v4669_v9 = vpop.f32.mrb[35].mxu1 }
 0xd0d   : > { %v4004_v12 = vadd.f32 %v4667_v6, %v3963_v5  ;;  %v4670_v13 = vadd.f32 %v4669_v9, %v4668_v8 }
 0xd0f   : > { %4010 = vst [vmem:[%s1076_s11] sm:$0xff] %v4004_v12  ;;  %v4007_v14 = vadd.f32 %v4670_v13, %v3966_v10 }
 0xd11   : > { %4011 = vst [vmem:[%s1076_s11 + $0x8] sm:$0x3f] %v4007_v14 }
 0xd12 PF: > { %s7357_s8 = sld [smem:[#allocation42_spill]] }
 0xd18   : > { %s47_s8 = sadd.s32 1, %s7357_s8  }
 0xd19   : > { %p44_p5 = scmp.ge.s32.totalorder %s47_s8, 4  }
 0xd1b   :  { %46 = sbr.rel (!%p44_p5) target bundleno = 31 (0x1f), region = 231 }
 0xd22   :  { %4033 = vsyncpa [#allocation8], 1 }
 0xd23   :  { %4035 = vsyncpa [#allocation8 + $0x1], 1 }
 0xd24   :  { %4036 = vsyncpa [#allocation10], 1 }
 0xd25   :  { %4037 = vsyncpa [#allocation13], 1 }
 0xd26   :  { %4038 = vsyncpa [#allocation16], 1 }
 0xd27   :  { %4039 = vsyncpa [#allocation19], 1 }
 0xd28   :  { %4040 = vsyncpa [#allocation22], 1 }
 0xd29   :  { %4041 = vsyncpa [#allocation25], 1 }
 0xd2a   :  { %4042 = vsyncpa [#allocation28], 1 }
 0xd2b   :  { %4043 = vsyncpa [#allocation31], 1 }

</bundles_post_ra>
